<compile_context>
chip_gen: v7x
topology: tpu7x:2x2x1
jax: 0.10.0
libtpu: 0.0.40
codegen_flags: <defaults>
</compile_context>

<pallas_src>
import jax
import jax.numpy as jnp
from jax.experimental import pallas as pl
from jax.experimental.pallas import tpu as pltpu

EPS = 1e-5               # PyTorch BatchNorm1d default eps
IN_RAW = 64 * 21         # 1344
IN_PAD = 1408            # 11 * 128, lane-aligned K for block 1
H1 = 512
H2 = 128
N_OUT = 38
N_OUT_PAD = 128          # lane-dense output slab width


# ----------------------------- kernel ---------------------------------------

def _bn_train(h, gamma, beta):
    """PyTorch BatchNorm1d training-mode forward (biased batch stats).

    One-pass stats: var = E[h^2] - mean^2.  Written in scale/shift form so the
    normalization is 2 VPU ops per element; rsqrt goes to the EUP slot.
    """
    inv_b = 1.0 / h.shape[0]
    mean = jnp.sum(h, axis=0, keepdims=True) * inv_b
    mean_sq = jnp.sum(h * h, axis=0, keepdims=True) * inv_b
    var = mean_sq - mean * mean                    # biased batch variance
    scale = gamma * jax.lax.rsqrt(var + EPS)
    shift = beta - mean * scale
    return h * scale + shift


def _res_block(h, w_fused_ref, w2_ref, v_ref, out_f):
    """Residual block with fused main/shortcut matmul.

    w_fused_ref: (in, 2*out_f) bf16, cols [0:out_f] = lin1.W^T, [out_f:] = shortcut.W^T
    w2_ref:      (out_f, out_f) bf16 (lin2.W^T)
    v_ref:       (6, out_f) f32 rows = [g1, be1, g2, be2, gs, bes]
    Linear biases feeding a training-mode BN are exactly absorbed by the batch-mean
    subtraction, so they are omitted (identical math).
    """
    fused = jnp.dot(h.astype(jnp.bfloat16), w_fused_ref[...],
                    preferred_element_type=jnp.float32)      # (B, 2*out_f) f32
    main = fused[:, :out_f]
    short = fused[:, out_f:]

    g1, be1 = v_ref[0:1, :], v_ref[1:2, :]
    g2, be2 = v_ref[2:3, :], v_ref[3:4, :]
    gs, bes = v_ref[4:5, :], v_ref[5:6, :]

    identity = _bn_train(short, gs, bes)
    out = jnp.maximum(_bn_train(main, g1, be1), 0.0)
    out = jnp.dot(out.astype(jnp.bfloat16), w2_ref[...],
                  preferred_element_type=jnp.float32)
    out = _bn_train(out, g2, be2)
    return jnp.maximum(out + identity, 0.0)


def res_linear_kernel(x_ref,
                      wfa_ref, w2a_ref, va_ref,     # block 1 (1408 -> 512)
                      wfb_ref, w2b_ref, vb_ref,     # block 2 (512 -> 128)
                      wf_ref, bf_ref,               # final linear (128 -> 128 padded)
                      out_ref):
    x = x_ref[...]                                  # (B, 1408) bf16 (zero-padded tail)
    h = _res_block(x, wfa_ref, w2a_ref, va_ref, H1)
    h = _res_block(h, wfb_ref, w2b_ref, vb_ref, H2)
    out_ref[...] = jnp.dot(h.astype(jnp.bfloat16), wf_ref[...],
                           preferred_element_type=jnp.float32) + bf_ref[...]


# ----------------------------- params ----------------------------------------

def _kaiming_normal(key, out_f, in_f, a=0.1):
    # nn.init.kaiming_normal_(w, a=0.1): gain = sqrt(2/(1+a^2)), std = gain/sqrt(fan_in)
    gain = (2.0 / (1.0 + a * a)) ** 0.5
    std = gain / (in_f ** 0.5)
    return jax.random.normal(key, (out_f, in_f), jnp.float32) * std


def _res_block_params(key, in_f, out_f, pad_in=None):
    k1, k2, ks = jax.random.split(key, 3)
    w1 = _kaiming_normal(k1, out_f, in_f).T         # (in, out) = lin1.W^T
    w2 = _kaiming_normal(k2, out_f, out_f).T        # lin2.W^T
    ws = _kaiming_normal(ks, out_f, in_f).T         # shortcut.W^T
    w_fused = jnp.concatenate([w1, ws], axis=1)     # (in, 2*out): [main | shortcut]
    if pad_in is not None and pad_in > in_f:
        w_fused = jnp.pad(w_fused, ((0, pad_in - in_f), (0, 0)))   # zero K-padding
    # BN params: gamma = 1, beta = 0; rows = [g1, be1, g2, be2, gs, bes]
    ones = jnp.ones((out_f,), jnp.float32)
    zeros = jnp.zeros((out_f,), jnp.float32)
    vecs = jnp.stack([ones, zeros, ones, zeros, ones, zeros])       # (6, out_f) f32
    # Linear biases (0.01) feeding training-mode BN are mathematically absorbed -> dropped.
    return [w_fused.astype(jnp.bfloat16), w2.astype(jnp.bfloat16), vecs]


def init_params(key):
    kb1, kb2, kf = jax.random.split(key, 3)
    params = []
    params += _res_block_params(kb1, IN_RAW, H1, pad_in=IN_PAD)
    params += _res_block_params(kb2, H1, H2)
    # Final linear, padded to a lane-dense (128, 128) / (1, 128); extra cols are zero.
    wf = _kaiming_normal(kf, N_OUT, H2).T                           # (128, 38)
    wf = jnp.pad(wf, ((0, 0), (0, N_OUT_PAD - N_OUT))).astype(jnp.bfloat16)
    bf = jnp.zeros((1, N_OUT_PAD), jnp.float32).at[:, :N_OUT].set(0.01)  # bias = 0.01
    params += [wf, bf]
    return params


# ----------------------------- wrapper ---------------------------------------

def _cost_estimate(B):
    flops = 2 * B * (IN_PAD * 2 * H1 + H1 * H1 + H1 * 2 * H2 + H2 * H2 + H2 * N_OUT_PAD)
    transcendentals = 3 * H1 + 3 * H2                 # one rsqrt per BN channel
    weight_bytes = (IN_PAD * 2 * H1 * 2 + H1 * H1 * 2 + 6 * H1 * 4
                    + H1 * 2 * H2 * 2 + H2 * H2 * 2 + 6 * H2 * 4
                    + H2 * N_OUT_PAD * 2 + N_OUT_PAD * 4)
    bytes_accessed = weight_bytes + B * IN_PAD * 2 + B * N_OUT_PAD * 4
    return pl.CostEstimate(flops=flops, transcendentals=transcendentals,
                           bytes_accessed=bytes_accessed)


def res_linear_network(x, params):
    # x: (B, 1, 64, 21) -> flatten to (B, 1344) bf16 -> zero-pad to (B, 1408)
    B = x.shape[0]
    x_flat = x.reshape(B, -1).astype(jnp.bfloat16)    # cast before pad: half the bytes
    x_flat = jnp.pad(x_flat, ((0, 0), (0, IN_PAD - IN_RAW)))

    vmem = pl.BlockSpec(memory_space=pltpu.MemorySpace.VMEM)
    out_pad = pl.pallas_call(
        res_linear_kernel,
        out_shape=jax.ShapeDtypeStruct((B, N_OUT_PAD), jnp.float32),
        in_specs=[vmem] * (1 + len(params)),
        out_specs=vmem,
        compiler_params=pltpu.CompilerParams(vmem_limit_bytes=32 << 20),
        cost_estimate=_cost_estimate(B),
    )(x_flat, *params)
    return out_pad[:, :N_OUT]                         # drop lane padding


# ----------------------------- main -------------------------------------------

if __name__ == "__main__":
    key = jax.random.PRNGKey(0)
    kx, kp = jax.random.split(key)

    # CNN-style dataset shape (B, 1, D, L) = (2, 1, 64, 21)
    x = jax.random.normal(kx, (2, 1, 64, 21), jnp.float32)
    params = init_params(kp)

    # TODO(synk): training-mode BN stats are computed over the whole batch inside one
    # kernel invocation; batch tiling over a grid (or v7x's 2nd TensorCore) would need a
    # two-pass / cross-core stats exchange to preserve these semantics.
    out = res_linear_network(x, params)
    out = jax.block_until_ready(out)
    assert out.shape == (2, 38) and out.dtype == jnp.float32
    assert bool(jnp.all(jnp.isfinite(out)))
    print("KERNEL_OK")
</pallas_src>

<mosaic_0001>
module attributes {stable_mosaic.version = 11 : i64} {
  func.func @res_linear_kernel(%arg0: memref<2x1408xbf16, #tpu.memory_space<vmem>>, %arg1: memref<1408x1024xbf16, #tpu.memory_space<vmem>>, %arg2: memref<512x512xbf16, #tpu.memory_space<vmem>>, %arg3: memref<6x512xf32, #tpu.memory_space<vmem>>, %arg4: memref<512x256xbf16, #tpu.memory_space<vmem>>, %arg5: memref<128x128xbf16, #tpu.memory_space<vmem>>, %arg6: memref<6x128xf32, #tpu.memory_space<vmem>>, %arg7: memref<128x128xbf16, #tpu.memory_space<vmem>>, %arg8: memref<1x128xf32, #tpu.memory_space<vmem>>, %arg9: memref<2x128xf32, #tpu.memory_space<vmem>>) attributes {dimension_semantics = [], scalar_prefetch = 0 : i64, scratch_operands = 0 : i64, tpu.core_type = #tpu.core_type<tc>} {
    %c0 = arith.constant 0 : index
    %c0_0 = arith.constant 0 : index
    %0 = vector.load %arg0[%c0, %c0_0] : memref<2x1408xbf16, #tpu.memory_space<vmem>>, vector<2x1408xbf16>
    %c0_1 = arith.constant 0 : index
    %c0_2 = arith.constant 0 : index
    %1 = vector.load %arg1[%c0_1, %c0_2] : memref<1408x1024xbf16, #tpu.memory_space<vmem>>, vector<1408x1024xbf16>
    %cst = arith.constant dense<0.000000e+00> : vector<2x1024xf32>
    %2 = tpu.matmul %0, %1, %cst {dimension_numbers = #tpu.dot_dimension_numbers<[1], [0], [0], [1], [0, 0, 1, 1], [], []>} : vector<2x1408xbf16>, vector<1408x1024xbf16>, vector<2x1024xf32> -> vector<2x1024xf32>
    %3 = vector.extract_strided_slice %2 {offsets = [0, 0], sizes = [2, 512], strides = [1, 1]} : vector<2x1024xf32> to vector<2x512xf32>
    %4 = vector.extract_strided_slice %2 {offsets = [0, 512], sizes = [2, 512], strides = [1, 1]} : vector<2x1024xf32> to vector<2x512xf32>
    %c0_3 = arith.constant 0 : index
    %c0_4 = arith.constant 0 : index
    %5 = vector.load %arg3[%c0_3, %c0_4] : memref<6x512xf32, #tpu.memory_space<vmem>>, vector<1x512xf32>
    %c1 = arith.constant 1 : index
    %c0_5 = arith.constant 0 : index
    %6 = vector.load %arg3[%c1, %c0_5] : memref<6x512xf32, #tpu.memory_space<vmem>>, vector<1x512xf32>
    %c2 = arith.constant 2 : index
    %c0_6 = arith.constant 0 : index
    %7 = vector.load %arg3[%c2, %c0_6] : memref<6x512xf32, #tpu.memory_space<vmem>>, vector<1x512xf32>
    %c3 = arith.constant 3 : index
    %c0_7 = arith.constant 0 : index
    %8 = vector.load %arg3[%c3, %c0_7] : memref<6x512xf32, #tpu.memory_space<vmem>>, vector<1x512xf32>
    %c4 = arith.constant 4 : index
    %c0_8 = arith.constant 0 : index
    %9 = vector.load %arg3[%c4, %c0_8] : memref<6x512xf32, #tpu.memory_space<vmem>>, vector<1x512xf32>
    %c5 = arith.constant 5 : index
    %c0_9 = arith.constant 0 : index
    %10 = vector.load %arg3[%c5, %c0_9] : memref<6x512xf32, #tpu.memory_space<vmem>>, vector<1x512xf32>
    %cst_10 = arith.constant dense<0.000000e+00> : vector<512xf32>
    %11 = vector.multi_reduction <add>, %4, %cst_10 [0] : vector<2x512xf32> to vector<512xf32>
    %12 = vector.shape_cast %11 : vector<512xf32> to vector<1x512xf32>
    %cst_11 = arith.constant 5.000000e-01 : f32
    %13 = vector.broadcast %cst_11 : f32 to vector<1x512xf32>
    %14 = arith.mulf %12, %13 : vector<1x512xf32>
    %15 = arith.mulf %4, %4 : vector<2x512xf32>
    %cst_12 = arith.constant dense<0.000000e+00> : vector<512xf32>
    %16 = vector.multi_reduction <add>, %15, %cst_12 [0] : vector<2x512xf32> to vector<512xf32>
    %17 = vector.shape_cast %16 : vector<512xf32> to vector<1x512xf32>
    %cst_13 = arith.constant 5.000000e-01 : f32
    %18 = vector.broadcast %cst_13 : f32 to vector<1x512xf32>
    %19 = arith.mulf %17, %18 : vector<1x512xf32>
    %20 = arith.mulf %14, %14 : vector<1x512xf32>
    %21 = arith.subf %19, %20 : vector<1x512xf32>
    %cst_14 = arith.constant 9.99999974E-6 : f32
    %22 = vector.broadcast %cst_14 : f32 to vector<1x512xf32>
    %23 = arith.addf %21, %22 : vector<1x512xf32>
    %24 = math.rsqrt %23 : vector<1x512xf32>
    %25 = arith.mulf %9, %24 : vector<1x512xf32>
    %26 = arith.mulf %14, %25 : vector<1x512xf32>
    %27 = arith.subf %10, %26 : vector<1x512xf32>
    %28 = vector.broadcast %25 : vector<1x512xf32> to vector<2x512xf32>
    %29 = arith.mulf %4, %28 : vector<2x512xf32>
    %30 = vector.broadcast %27 : vector<1x512xf32> to vector<2x512xf32>
    %31 = arith.addf %29, %30 : vector<2x512xf32>
    %cst_15 = arith.constant dense<0.000000e+00> : vector<512xf32>
    %32 = vector.multi_reduction <add>, %3, %cst_15 [0] : vector<2x512xf32> to vector<512xf32>
    %33 = vector.shape_cast %32 : vector<512xf32> to vector<1x512xf32>
    %cst_16 = arith.constant 5.000000e-01 : f32
    %34 = vector.broadcast %cst_16 : f32 to vector<1x512xf32>
    %35 = arith.mulf %33, %34 : vector<1x512xf32>
    %36 = arith.mulf %3, %3 : vector<2x512xf32>
    %cst_17 = arith.constant dense<0.000000e+00> : vector<512xf32>
    %37 = vector.multi_reduction <add>, %36, %cst_17 [0] : vector<2x512xf32> to vector<512xf32>
    %38 = vector.shape_cast %37 : vector<512xf32> to vector<1x512xf32>
    %cst_18 = arith.constant 5.000000e-01 : f32
    %39 = vector.broadcast %cst_18 : f32 to vector<1x512xf32>
    %40 = arith.mulf %38, %39 : vector<1x512xf32>
    %41 = arith.mulf %35, %35 : vector<1x512xf32>
    %42 = arith.subf %40, %41 : vector<1x512xf32>
    %cst_19 = arith.constant 9.99999974E-6 : f32
    %43 = vector.broadcast %cst_19 : f32 to vector<1x512xf32>
    %44 = arith.addf %42, %43 : vector<1x512xf32>
    %45 = math.rsqrt %44 : vector<1x512xf32>
    %46 = arith.mulf %5, %45 : vector<1x512xf32>
    %47 = arith.mulf %35, %46 : vector<1x512xf32>
    %48 = arith.subf %6, %47 : vector<1x512xf32>
    %49 = vector.broadcast %46 : vector<1x512xf32> to vector<2x512xf32>
    %50 = arith.mulf %3, %49 : vector<2x512xf32>
    %51 = vector.broadcast %48 : vector<1x512xf32> to vector<2x512xf32>
    %52 = arith.addf %50, %51 : vector<2x512xf32>
    %cst_20 = arith.constant 0.000000e+00 : f32
    %53 = vector.broadcast %cst_20 : f32 to vector<2x512xf32>
    %54 = arith.maximumf %52, %53 : vector<2x512xf32>
    %55 = arith.truncf %54 : vector<2x512xf32> to vector<2x512xbf16>
    %c0_21 = arith.constant 0 : index
    %c0_22 = arith.constant 0 : index
    %56 = vector.load %arg2[%c0_21, %c0_22] : memref<512x512xbf16, #tpu.memory_space<vmem>>, vector<512x512xbf16>
    %cst_23 = arith.constant dense<0.000000e+00> : vector<2x512xf32>
    %57 = tpu.matmul %55, %56, %cst_23 {dimension_numbers = #tpu.dot_dimension_numbers<[1], [0], [0], [1], [0, 0, 1, 1], [], []>} : vector<2x512xbf16>, vector<512x512xbf16>, vector<2x512xf32> -> vector<2x512xf32>
    %cst_24 = arith.constant dense<0.000000e+00> : vector<512xf32>
    %58 = vector.multi_reduction <add>, %57, %cst_24 [0] : vector<2x512xf32> to vector<512xf32>
    %59 = vector.shape_cast %58 : vector<512xf32> to vector<1x512xf32>
    %cst_25 = arith.constant 5.000000e-01 : f32
    %60 = vector.broadcast %cst_25 : f32 to vector<1x512xf32>
    %61 = arith.mulf %59, %60 : vector<1x512xf32>
    %62 = arith.mulf %57, %57 : vector<2x512xf32>
    %cst_26 = arith.constant dense<0.000000e+00> : vector<512xf32>
    %63 = vector.multi_reduction <add>, %62, %cst_26 [0] : vector<2x512xf32> to vector<512xf32>
    %64 = vector.shape_cast %63 : vector<512xf32> to vector<1x512xf32>
    %cst_27 = arith.constant 5.000000e-01 : f32
    %65 = vector.broadcast %cst_27 : f32 to vector<1x512xf32>
    %66 = arith.mulf %64, %65 : vector<1x512xf32>
    %67 = arith.mulf %61, %61 : vector<1x512xf32>
    %68 = arith.subf %66, %67 : vector<1x512xf32>
    %cst_28 = arith.constant 9.99999974E-6 : f32
    %69 = vector.broadcast %cst_28 : f32 to vector<1x512xf32>
    %70 = arith.addf %68, %69 : vector<1x512xf32>
    %71 = math.rsqrt %70 : vector<1x512xf32>
    %72 = arith.mulf %7, %71 : vector<1x512xf32>
    %73 = arith.mulf %61, %72 : vector<1x512xf32>
    %74 = arith.subf %8, %73 : vector<1x512xf32>
    %75 = vector.broadcast %72 : vector<1x512xf32> to vector<2x512xf32>
    %76 = arith.mulf %57, %75 : vector<2x512xf32>
    %77 = vector.broadcast %74 : vector<1x512xf32> to vector<2x512xf32>
    %78 = arith.addf %76, %77 : vector<2x512xf32>
    %79 = arith.addf %78, %31 : vector<2x512xf32>
    %cst_29 = arith.constant 0.000000e+00 : f32
    %80 = vector.broadcast %cst_29 : f32 to vector<2x512xf32>
    %81 = arith.maximumf %79, %80 : vector<2x512xf32>
    %82 = arith.truncf %81 : vector<2x512xf32> to vector<2x512xbf16>
    %c0_30 = arith.constant 0 : index
    %c0_31 = arith.constant 0 : index
    %83 = vector.load %arg4[%c0_30, %c0_31] : memref<512x256xbf16, #tpu.memory_space<vmem>>, vector<512x256xbf16>
    %cst_32 = arith.constant dense<0.000000e+00> : vector<2x256xf32>
    %84 = tpu.matmul %82, %83, %cst_32 {dimension_numbers = #tpu.dot_dimension_numbers<[1], [0], [0], [1], [0, 0, 1, 1], [], []>} : vector<2x512xbf16>, vector<512x256xbf16>, vector<2x256xf32> -> vector<2x256xf32>
    %85 = vector.extract_strided_slice %84 {offsets = [0, 0], sizes = [2, 128], strides = [1, 1]} : vector<2x256xf32> to vector<2x128xf32>
    %86 = vector.extract_strided_slice %84 {offsets = [0, 128], sizes = [2, 128], strides = [1, 1]} : vector<2x256xf32> to vector<2x128xf32>
    %c0_33 = arith.constant 0 : index
    %c0_34 = arith.constant 0 : index
    %87 = vector.load %arg6[%c0_33, %c0_34] : memref<6x128xf32, #tpu.memory_space<vmem>>, vector<1x128xf32>
    %c1_35 = arith.constant 1 : index
    %c0_36 = arith.constant 0 : index
    %88 = vector.load %arg6[%c1_35, %c0_36] : memref<6x128xf32, #tpu.memory_space<vmem>>, vector<1x128xf32>
    %c2_37 = arith.constant 2 : index
    %c0_38 = arith.constant 0 : index
    %89 = vector.load %arg6[%c2_37, %c0_38] : memref<6x128xf32, #tpu.memory_space<vmem>>, vector<1x128xf32>
    %c3_39 = arith.constant 3 : index
    %c0_40 = arith.constant 0 : index
    %90 = vector.load %arg6[%c3_39, %c0_40] : memref<6x128xf32, #tpu.memory_space<vmem>>, vector<1x128xf32>
    %c4_41 = arith.constant 4 : index
    %c0_42 = arith.constant 0 : index
    %91 = vector.load %arg6[%c4_41, %c0_42] : memref<6x128xf32, #tpu.memory_space<vmem>>, vector<1x128xf32>
    %c5_43 = arith.constant 5 : index
    %c0_44 = arith.constant 0 : index
    %92 = vector.load %arg6[%c5_43, %c0_44] : memref<6x128xf32, #tpu.memory_space<vmem>>, vector<1x128xf32>
    %cst_45 = arith.constant dense<0.000000e+00> : vector<128xf32>
    %93 = vector.multi_reduction <add>, %86, %cst_45 [0] : vector<2x128xf32> to vector<128xf32>
    %94 = vector.shape_cast %93 : vector<128xf32> to vector<1x128xf32>
    %cst_46 = arith.constant 5.000000e-01 : f32
    %95 = vector.broadcast %cst_46 : f32 to vector<1x128xf32>
    %96 = arith.mulf %94, %95 : vector<1x128xf32>
    %97 = arith.mulf %86, %86 : vector<2x128xf32>
    %cst_47 = arith.constant dense<0.000000e+00> : vector<128xf32>
    %98 = vector.multi_reduction <add>, %97, %cst_47 [0] : vector<2x128xf32> to vector<128xf32>
    %99 = vector.shape_cast %98 : vector<128xf32> to vector<1x128xf32>
    %cst_48 = arith.constant 5.000000e-01 : f32
    %100 = vector.broadcast %cst_48 : f32 to vector<1x128xf32>
    %101 = arith.mulf %99, %100 : vector<1x128xf32>
    %102 = arith.mulf %96, %96 : vector<1x128xf32>
    %103 = arith.subf %101, %102 : vector<1x128xf32>
    %cst_49 = arith.constant 9.99999974E-6 : f32
    %104 = vector.broadcast %cst_49 : f32 to vector<1x128xf32>
    %105 = arith.addf %103, %104 : vector<1x128xf32>
    %106 = math.rsqrt %105 : vector<1x128xf32>
    %107 = arith.mulf %91, %106 : vector<1x128xf32>
    %108 = arith.mulf %96, %107 : vector<1x128xf32>
    %109 = arith.subf %92, %108 : vector<1x128xf32>
    %110 = vector.broadcast %107 : vector<1x128xf32> to vector<2x128xf32>
    %111 = arith.mulf %86, %110 : vector<2x128xf32>
    %112 = vector.broadcast %109 : vector<1x128xf32> to vector<2x128xf32>
    %113 = arith.addf %111, %112 : vector<2x128xf32>
    %cst_50 = arith.constant dense<0.000000e+00> : vector<128xf32>
    %114 = vector.multi_reduction <add>, %85, %cst_50 [0] : vector<2x128xf32> to vector<128xf32>
    %115 = vector.shape_cast %114 : vector<128xf32> to vector<1x128xf32>
    %cst_51 = arith.constant 5.000000e-01 : f32
    %116 = vector.broadcast %cst_51 : f32 to vector<1x128xf32>
    %117 = arith.mulf %115, %116 : vector<1x128xf32>
    %118 = arith.mulf %85, %85 : vector<2x128xf32>
    %cst_52 = arith.constant dense<0.000000e+00> : vector<128xf32>
    %119 = vector.multi_reduction <add>, %118, %cst_52 [0] : vector<2x128xf32> to vector<128xf32>
    %120 = vector.shape_cast %119 : vector<128xf32> to vector<1x128xf32>
    %cst_53 = arith.constant 5.000000e-01 : f32
    %121 = vector.broadcast %cst_53 : f32 to vector<1x128xf32>
    %122 = arith.mulf %120, %121 : vector<1x128xf32>
    %123 = arith.mulf %117, %117 : vector<1x128xf32>
    %124 = arith.subf %122, %123 : vector<1x128xf32>
    %cst_54 = arith.constant 9.99999974E-6 : f32
    %125 = vector.broadcast %cst_54 : f32 to vector<1x128xf32>
    %126 = arith.addf %124, %125 : vector<1x128xf32>
    %127 = math.rsqrt %126 : vector<1x128xf32>
    %128 = arith.mulf %87, %127 : vector<1x128xf32>
    %129 = arith.mulf %117, %128 : vector<1x128xf32>
    %130 = arith.subf %88, %129 : vector<1x128xf32>
    %131 = vector.broadcast %128 : vector<1x128xf32> to vector<2x128xf32>
    %132 = arith.mulf %85, %131 : vector<2x128xf32>
    %133 = vector.broadcast %130 : vector<1x128xf32> to vector<2x128xf32>
    %134 = arith.addf %132, %133 : vector<2x128xf32>
    %cst_55 = arith.constant 0.000000e+00 : f32
    %135 = vector.broadcast %cst_55 : f32 to vector<2x128xf32>
    %136 = arith.maximumf %134, %135 : vector<2x128xf32>
    %137 = arith.truncf %136 : vector<2x128xf32> to vector<2x128xbf16>
    %c0_56 = arith.constant 0 : index
    %c0_57 = arith.constant 0 : index
    %138 = vector.load %arg5[%c0_56, %c0_57] : memref<128x128xbf16, #tpu.memory_space<vmem>>, vector<128x128xbf16>
    %cst_58 = arith.constant dense<0.000000e+00> : vector<2x128xf32>
    %139 = tpu.matmul %137, %138, %cst_58 {dimension_numbers = #tpu.dot_dimension_numbers<[1], [0], [0], [1], [0, 0, 1, 1], [], []>} : vector<2x128xbf16>, vector<128x128xbf16>, vector<2x128xf32> -> vector<2x128xf32>
    %cst_59 = arith.constant dense<0.000000e+00> : vector<128xf32>
    %140 = vector.multi_reduction <add>, %139, %cst_59 [0] : vector<2x128xf32> to vector<128xf32>
    %141 = vector.shape_cast %140 : vector<128xf32> to vector<1x128xf32>
    %cst_60 = arith.constant 5.000000e-01 : f32
    %142 = vector.broadcast %cst_60 : f32 to vector<1x128xf32>
    %143 = arith.mulf %141, %142 : vector<1x128xf32>
    %144 = arith.mulf %139, %139 : vector<2x128xf32>
    %cst_61 = arith.constant dense<0.000000e+00> : vector<128xf32>
    %145 = vector.multi_reduction <add>, %144, %cst_61 [0] : vector<2x128xf32> to vector<128xf32>
    %146 = vector.shape_cast %145 : vector<128xf32> to vector<1x128xf32>
    %cst_62 = arith.constant 5.000000e-01 : f32
    %147 = vector.broadcast %cst_62 : f32 to vector<1x128xf32>
    %148 = arith.mulf %146, %147 : vector<1x128xf32>
    %149 = arith.mulf %143, %143 : vector<1x128xf32>
    %150 = arith.subf %148, %149 : vector<1x128xf32>
    %cst_63 = arith.constant 9.99999974E-6 : f32
    %151 = vector.broadcast %cst_63 : f32 to vector<1x128xf32>
    %152 = arith.addf %150, %151 : vector<1x128xf32>
    %153 = math.rsqrt %152 : vector<1x128xf32>
    %154 = arith.mulf %89, %153 : vector<1x128xf32>
    %155 = arith.mulf %143, %154 : vector<1x128xf32>
    %156 = arith.subf %90, %155 : vector<1x128xf32>
    %157 = vector.broadcast %154 : vector<1x128xf32> to vector<2x128xf32>
    %158 = arith.mulf %139, %157 : vector<2x128xf32>
    %159 = vector.broadcast %156 : vector<1x128xf32> to vector<2x128xf32>
    %160 = arith.addf %158, %159 : vector<2x128xf32>
    %161 = arith.addf %160, %113 : vector<2x128xf32>
    %cst_64 = arith.constant 0.000000e+00 : f32
    %162 = vector.broadcast %cst_64 : f32 to vector<2x128xf32>
    %163 = arith.maximumf %161, %162 : vector<2x128xf32>
    %164 = arith.truncf %163 : vector<2x128xf32> to vector<2x128xbf16>
    %c0_65 = arith.constant 0 : index
    %c0_66 = arith.constant 0 : index
    %165 = vector.load %arg7[%c0_65, %c0_66] : memref<128x128xbf16, #tpu.memory_space<vmem>>, vector<128x128xbf16>
    %cst_67 = arith.constant dense<0.000000e+00> : vector<2x128xf32>
    %166 = tpu.matmul %164, %165, %cst_67 {dimension_numbers = #tpu.dot_dimension_numbers<[1], [0], [0], [1], [0, 0, 1, 1], [], []>} : vector<2x128xbf16>, vector<128x128xbf16>, vector<2x128xf32> -> vector<2x128xf32>
    %c0_68 = arith.constant 0 : index
    %c0_69 = arith.constant 0 : index
    %167 = vector.load %arg8[%c0_68, %c0_69] : memref<1x128xf32, #tpu.memory_space<vmem>>, vector<1x128xf32>
    %168 = vector.broadcast %167 : vector<1x128xf32> to vector<2x128xf32>
    %169 = arith.addf %166, %168 : vector<2x128xf32>
    %c0_70 = arith.constant 0 : index
    %c0_71 = arith.constant 0 : index
    %170 = vector.load %arg9[%c0_70, %c0_71] : memref<2x128xf32, #tpu.memory_space<vmem>>, vector<2x128xf32>
    tpu.vector_store %arg9[%c0_70, %c0_71], %169 {strides = array<i32>} : memref<2x128xf32, #tpu.memory_space<vmem>>, vector<2x128xf32>,
    return
  }
}

</mosaic_0001>

<bundles_post_ra>
// kernel: tpu_custom_call.1
= control target key start
LH: loop header
LB: loop body
LE: loop exit
PB: predicated region body
PF: predicated region fallthrough
CT: control target
= control target key end

     0   :  { %14 = vsyncpa [#allocation3], 0  ;;  %s10075_s0 = inlined_call_operand.hbm [shape: bf16[2,1408], index: 0, kind: input, shape index: {}]   ;;  %s10076_s1 = inlined_call_operand.hbm [shape: bf16[1408,1024], index: 1, kind: input, shape index: {}]   ;;  %s10077_s2 = inlined_call_operand.hbm [shape: bf16[512,512], index: 2, kind: input, shape index: {}]   ;;  %s10078_s3 = inlined_call_operand.hbm [shape: f32[6,512], index: 3, kind: input, shape index: {}]   ;;  %s10079_s4 = inlined_call_operand.hbm [shape: bf16[512,256], index: 4, kind: input, shape index: {}]   ;;  %s10080_s5 = inlined_call_operand.hbm [shape: bf16[128,128], index: 5, kind: input, shape index: {}]   ;;  %s10081_s6 = inlined_call_operand.hbm [shape: f32[6,128], index: 6, kind: input, shape index: {}]   ;;  %s10082_s7 = inlined_call_operand.hbm [shape: bf16[128,128], index: 7, kind: input, shape index: {}]   ;;  %s10083_s8 = inlined_call_operand.hbm [shape: f32[1,128], index: 8, kind: input, shape index: {}]   ;;  %s10084_s9 = inlined_call_operand.hbm [shape: f32[2,128], index: 9, kind: output, shape index: {}]  }
   0x1   :  { %15 = vsyncpa [#allocation6], 0 }
   0x2   :  { %16 = vsyncpa [#allocation9], 0 }
   0x3   :  { %17 = vsyncpa [#allocation12], 0 }
   0x4   :  { %18 = vsyncpa [#allocation15], 0 }
   0x5   :  { %19 = vsyncpa [#allocation4], 0  ;;  %s9467_s30 = smov [#allocation5]   ;;  %s9235_s13 = scalar_lea.hbm %s10076_s1, 90112 }
   0x6   :  { %s35_s10 = sshll.u32 %s9467_s30, 4  ;;  %p9236_p0 = scmp.ne.s32.totalorder %s10076_s1, %s9235_s13  ;;  %s36_s10 = int_to_ptr.vmem [resolvable:$true] %s35_s10 }
   0x7   :  { %p9239_p1 = scmp.lt.u32.totalorder %s9235_s13, %s10076_s1 }
   0x9   :  { %p9241_p2 = pnand %p9239_p1, %p9236_p0 }
   0xb   :  { %9244 = shalt.err (!%p9241_p2)
}
   0xc   :  { %s9245_s18 = scalar_lea.vmem %s36_s10, 90112  ;;  %p9250_p4 = scmp.lt.s32.totalorder %s36_s10, %s36_s10 }
   0xd   :  { %p9246_p3 = scmp.ne.s32.totalorder %s36_s10, %s9245_s18  ;;  %p9251_p5 = scmp.lt.s32.totalorder %s9245_s18, %s9245_s18 }
   0xf   :  { %p9252_p6 = por %p9251_p5, %p9250_p4 }
  0x11   :  { %p9253_p7 = pnand %p9252_p6, %p9246_p3 }
  0x13   :  { %9256 = shalt.err (!%p9253_p7)
}
  0x14   :  { %s9468_s19 = smov 512   ;;  %s9469_s20 = smov 32  }
  0x15   :  { %41 = dma.hbm_to_vmem [thread:$0]  %s10076_s1, 90112, %s36_s10, [#allocation6], %s9468_s19, %s9468_s19, %s9469_s20  }
  0x16   :  { %s9470_s23 = smov [#allocation8]   ;;  %s9471_s25 = smov [#allocation11]  }
  0x17   :  { %s60_s24 = sshll.u32 %s9470_s23, 4  ;;  %s81_s26 = sshll.u32 %s9471_s25, 4  ;;  %s61_s24 = int_to_ptr.vmem [resolvable:$true] %s60_s24  ;;  %s82_s26 = int_to_ptr.vmem [resolvable:$true] %s81_s26 }
  0x18   :  { %s9257_s29 = scalar_lea.hbm %s10078_s3, 512 }
  0x19   :  { %p9258_p8 = scmp.ne.s32.totalorder %s10078_s3, %s9257_s29  ;;  %p9261_p9 = scmp.lt.u32.totalorder %s9257_s29, %s10078_s3 }
  0x1b   :  { %p9263_p10 = pnand %p9261_p9, %p9258_p8 }
  0x1d   :  { %9266 = shalt.err (!%p9263_p10)
}
  0x1e   :  { %s9267_s1 = scalar_lea.vmem %s61_s24, 512  ;;  %p9272_p12 = scmp.lt.s32.totalorder %s61_s24, %s61_s24 }
  0x1f   :  { %p9268_p11 = scmp.ne.s32.totalorder %s61_s24, %s9267_s1  ;;  %p9273_p13 = scmp.lt.s32.totalorder %s9267_s1, %s9267_s1 }
  0x21   :  { %p9274_p0 = por %p9273_p13, %p9272_p12 }
  0x23   :  { %p9275_p1 = pnand %p9274_p0, %p9268_p11 }
  0x25   :  { %9278 = shalt.err (!%p9275_p1)
}
  0x26   :  { %63 = dma.hbm_to_vmem [thread:$0]  %s10078_s3, 512, %s61_s24, [#allocation9]  }
  0x27   :  { %s9279_s17 = scalar_lea.hbm %s10080_s5, 1024 }
  0x28   :  { %p9280_p2 = scmp.ne.s32.totalorder %s10080_s5, %s9279_s17  ;;  %p9283_p3 = scmp.lt.u32.totalorder %s9279_s17, %s10080_s5 }
  0x2a   :  { %p9285_p4 = pnand %p9283_p3, %p9280_p2 }
  0x2c   :  { %9288 = shalt.err (!%p9285_p4)
}
  0x2d   :  { %s9289_s22 = scalar_lea.vmem %s82_s26, 1024  ;;  %p9294_p6 = scmp.lt.s32.totalorder %s82_s26, %s82_s26 }
  0x2e   :  { %p9290_p5 = scmp.ne.s32.totalorder %s82_s26, %s9289_s22  ;;  %p9295_p7 = scmp.lt.s32.totalorder %s9289_s22, %s9289_s22 }
  0x30   :  { %p9296_p8 = por %p9295_p7, %p9294_p6 }
  0x32   :  { %p9297_p9 = pnand %p9296_p8, %p9290_p5 }
  0x34   :  { %9300 = shalt.err (!%p9297_p9)
}
  0x35   :  { %s9472_s3 = smov 64   ;;  %s9473_s23 = smov 4  }
  0x36   :  { %87 = dma.hbm_to_vmem [thread:$0]  %s10080_s5, 1024, %s82_s26, [#allocation12], %s9472_s3, %s9472_s3, %s9473_s23  }
  0x37   :  { %s9474_s27 = smov [#allocation14]   ;;  %s9475_s29 = smov [#allocation2]  }
  0x38   :  { %s103_s28 = sshll.u32 %s9474_s27, 4  ;;  %s26_s30 = sshll.u32 %s9475_s29, 4  ;;  %s104_s28 = int_to_ptr.vmem [resolvable:$true] %s103_s28  ;;  %s27_s30 = int_to_ptr.vmem [resolvable:$true] %s26_s30 }
  0x39   :  { %s9301_s13 = scalar_lea.hbm %s10082_s7, 1024 }
  0x3a   :  { %p9302_p10 = scmp.ne.s32.totalorder %s10082_s7, %s9301_s13  ;;  %p9305_p11 = scmp.lt.u32.totalorder %s9301_s13, %s10082_s7 }
  0x3c   :  { %p9307_p12 = pnand %p9305_p11, %p9302_p10 }
  0x3e   :  { %9310 = shalt.err (!%p9307_p12)
}
  0x3f   :  { %s9311_s5 = scalar_lea.vmem %s104_s28, 1024  ;;  %p9316_p0 = scmp.lt.s32.totalorder %s104_s28, %s104_s28 }
  0x40   :  { %p9312_p13 = scmp.ne.s32.totalorder %s104_s28, %s9311_s5  ;;  %p9317_p1 = scmp.lt.s32.totalorder %s9311_s5, %s9311_s5 }
  0x42   :  { %p9318_p2 = por %p9317_p1, %p9316_p0 }
  0x44   :  { %p9319_p3 = pnand %p9318_p2, %p9312_p13 }
  0x46   :  { %9322 = shalt.err (!%p9319_p3)
}
  0x47   :  { %109 = dma.hbm_to_vmem [thread:$0]  %s10082_s7, 1024, %s104_s28, [#allocation15], %s9472_s3, %s9472_s3, %s9473_s23  }
  0x48   :  { %s9323_s19 = scalar_lea.hbm %s10075_s0, 176 }
  0x49   :  { %p9324_p4 = scmp.ne.s32.totalorder %s10075_s0, %s9323_s19  ;;  %p9327_p5 = scmp.lt.u32.totalorder %s9323_s19, %s10075_s0 }
  0x4b   :  { %p9329_p6 = pnand %p9327_p5, %p9324_p4 }
  0x4d   :  { %9332 = shalt.err (!%p9329_p6)
}
  0x4e   :  { %s9333_s25 = scalar_lea.vmem %s27_s30, 176  ;;  %s9337_s27 = scalar_lea.vmem %s27_s30, 192 }
  0x4f   :  { %p9334_p7 = scmp.ne.s32.totalorder %s27_s30, %s9333_s25  ;;  %p9338_p8 = scmp.lt.s32.totalorder %s27_s30, %s27_s30 }
  0x50   :  { %p9339_p9 = scmp.lt.s32.totalorder %s9337_s27, %s9333_s25 }
  0x52   :  { %p9340_p10 = por %p9339_p9, %p9338_p8 }
  0x54   :  { %p9341_p11 = pnand %p9340_p10, %p9334_p7 }
  0x56   :  { %9344 = shalt.err (!%p9341_p11)
}
  0x57   :  { %29 = dma.hbm_to_vmem [thread:$0]  %s10075_s0, 176, %s27_s30, [#allocation3]  }
  0x58   :  { %s9476_s23 = smov [#allocation7]   ;;  %s9345_s12 = scalar_lea.hbm %s10077_s2, 16384 }
  0x59   :  { %s47_s28 = sshll.u32 %s9476_s23, 4  ;;  %p9346_p12 = scmp.ne.s32.totalorder %s10077_s2, %s9345_s12  ;;  %s48_s28 = int_to_ptr.vmem [resolvable:$true] %s47_s28 }
  0x5a   :  { %p9349_p13 = scmp.lt.u32.totalorder %s9345_s12, %s10077_s2 }
  0x5c   :  { %p9351_p0 = pnand %p9349_p13, %p9346_p12 }
  0x5e   :  { %9354 = shalt.err (!%p9351_p0)
}
  0x5f   :  { %s9355_s15 = scalar_lea.vmem %s48_s28, 16384  ;;  %p9360_p2 = scmp.lt.s32.totalorder %s48_s28, %s48_s28 }
  0x60   :  { %p9356_p1 = scmp.ne.s32.totalorder %s48_s28, %s9355_s15  ;;  %p9361_p3 = scmp.lt.s32.totalorder %s9355_s15, %s9355_s15 }
  0x62   :  { %p9362_p4 = por %p9361_p3, %p9360_p2 }
  0x64   :  { %p9363_p5 = pnand %p9362_p4, %p9356_p1 }
  0x66   :  { %9366 = shalt.err (!%p9363_p5)
}
  0x67   :  { %s9477_s0 = smov 256   ;;  %s9478_s30 = smov 16  }
  0x68   :  { %53 = dma.hbm_to_vmem [thread:$0]  %s10077_s2, 16384, %s48_s28, [#allocation6], %s9477_s0, %s9477_s0, %s9478_s30  }
  0x69   :  { %s9479_s16 = smov [#allocation10]   ;;  %s9367_s20 = scalar_lea.hbm %s10079_s4, 8192 }
  0x6a   :  { %s69_s17 = sshll.u32 %s9479_s16, 4  ;;  %p9368_p6 = scmp.ne.s32.totalorder %s10079_s4, %s9367_s20  ;;  %s70_s17 = int_to_ptr.vmem [resolvable:$true] %s69_s17 }
  0x6b   :  { %p9371_p7 = scmp.lt.u32.totalorder %s9367_s20, %s10079_s4 }
  0x6d   :  { %p9373_p8 = pnand %p9371_p7, %p9368_p6 }
  0x6f   :  { %9376 = shalt.err (!%p9373_p8)
}
  0x70   :  { %s9377_s27 = scalar_lea.vmem %s70_s17, 8192  ;;  %p9382_p10 = scmp.lt.s32.totalorder %s70_s17, %s70_s17 }
  0x71   :  { %p9378_p9 = scmp.ne.s32.totalorder %s70_s17, %s9377_s27  ;;  %p9383_p11 = scmp.lt.s32.totalorder %s9377_s27, %s9377_s27 }
  0x73   :  { %p9384_p12 = por %p9383_p11, %p9382_p10 }
  0x75   :  { %p9385_p13 = pnand %p9384_p12, %p9378_p9 }
  0x77   :  { %9388 = shalt.err (!%p9385_p13)
}
  0x78   :  { %s9480_s2 = smov 128   ;;  %s9481_s7 = smov 8  }
  0x79   :  { %75 = dma.hbm_to_vmem [thread:$0]  %s10079_s4, 8192, %s70_s17, [#allocation9], %s9480_s2, %s9480_s2, %s9481_s7  }
  0x7a   :  { %s9482_s28 = smov [#allocation13]   ;;  %s9483_s11 = smov [#allocation16]  }
  0x7b   :  { %s94_s29 = sshll.u32 %s9482_s28, 4  ;;  %s116_s12 = sshll.u32 %s9483_s11, 4  ;;  %s95_s29 = int_to_ptr.vmem [resolvable:$true] %s94_s29  ;;  %s117_s12 = int_to_ptr.vmem [resolvable:$true] %s116_s12 }
  0x7c   :  { %s9389_s10 = scalar_lea.hbm %s10081_s6, 128 }
  0x7d   :  { %p9390_p0 = scmp.ne.s32.totalorder %s10081_s6, %s9389_s10  ;;  %p9393_p1 = scmp.lt.u32.totalorder %s9389_s10, %s10081_s6 }
  0x7f   :  { %p9395_p2 = pnand %p9393_p1, %p9390_p0 }
  0x81   :  { %9398 = shalt.err (!%p9395_p2)
}
  0x82   :  { %s9399_s4 = scalar_lea.vmem %s95_s29, 128  ;;  %p9404_p4 = scmp.lt.s32.totalorder %s95_s29, %s95_s29 }
  0x83   :  { %p9400_p3 = scmp.ne.s32.totalorder %s95_s29, %s9399_s4  ;;  %p9405_p5 = scmp.lt.s32.totalorder %s9399_s4, %s9399_s4 }
  0x85   :  { %p9406_p6 = por %p9405_p5, %p9404_p4 }
  0x87   :  { %p9407_p7 = pnand %p9406_p6, %p9400_p3 }
  0x89   :  { %9410 = shalt.err (!%p9407_p7)
}
  0x8a   :  { %97 = dma.hbm_to_vmem [thread:$0]  %s10081_s6, 128, %s95_s29, [#allocation12]  }
  0x8b   :  { %s9411_s18 = scalar_lea.hbm %s10083_s8, 16 }
  0x8c   :  { %p9412_p8 = scmp.ne.s32.totalorder %s10083_s8, %s9411_s18  ;;  %p9415_p9 = scmp.lt.u32.totalorder %s9411_s18, %s10083_s8 }
  0x8e   :  { %p9417_p10 = pnand %p9415_p9, %p9412_p8 }
  0x90   :  { %9420 = shalt.err (!%p9417_p10)
}
  0x91   :  { %s9421_s24 = scalar_lea.vmem %s117_s12, 16  ;;  %s9425_s25 = scalar_lea.vmem %s117_s12, 32 }
  0x92   :  { %p9422_p11 = scmp.ne.s32.totalorder %s117_s12, %s9421_s24  ;;  %p9426_p12 = scmp.lt.s32.totalorder %s117_s12, %s117_s12 }
  0x93   :  { %p9427_p13 = scmp.lt.s32.totalorder %s9425_s25, %s9421_s24 }
  0x95   :  { %p9428_p0 = por %p9427_p13, %p9426_p12 }
  0x97   :  { %p9429_p1 = pnand %p9428_p0, %p9422_p11 }
  0x99   :  { %9432 = shalt.err (!%p9429_p1)
}
  0x9a   :  { %119 = dma.hbm_to_vmem [thread:$0]  %s10083_s8, 16, %s117_s12, [#allocation15]  }
  0x9b   :  { %9455 = dma.done.wait [#allocation3], 176  }
  0x9c   :  { %9456 = vsyncadd [#allocation3], 4294967120 }
  0x9d   :  { %9457 = dma.done.wait [#allocation6], 106496  }
  0x9e   :  { %9458 = vsyncadd [#allocation6], 4294860800 }
  0x9f   :  { %9459 = dma.done.wait [#allocation9], 8704  }
  0xa0   :  { %9460 = vsyncadd [#allocation9], 4294958592 }
  0xa1   :  { %9461 = dma.done.wait [#allocation12], 1152  }
  0xa2   :  { %9462 = vsyncadd [#allocation12], 4294966144 }
  0xa3   :  { %9463 = dma.done.wait [#allocation15], 1040  }
  0xa4   :  { %9464 = vsyncadd [#allocation15], 4294966256  ;;  %v9484_v0 = vmov 0   ;;  %v150_v1 = vld [vmem:[#allocation5] sm:$0xff]  ;;  %v9485_v36 = vmov 1966171168   ;;  %v860_v38 = vlaneseq }
  0xa5   :  { %4696 = vmatprep.mubr.bf16.mxu1 %v9484_v0  ;;  %v154_v2 = vld [vmem:[#allocation5 + $0x20] sm:$0xff]  ;;  %v858_v37 = vunpack.c.l.s4 %v9485_v36  ;;  %v9653_v60 = vld [vmem:[#allocation2] sm:$0xff]  ;;  %vm5454_vm0 = vcmask 1041408   ;;  %vm9487_vm1 = vmmov 0   ;;  %s9488_s8 = smov [#allocation17]  }
  0xa6   :  { %v790_v3 = vld [vmem:[#allocation5 + $0x1400] sm:$0xff]  ;;  %v7817_v4 = vcombine.high %v150_v1, %v154_v2  ;;  %v7816_v6 = vcombine.low %v150_v1, %v154_v2  ;;  %v9648_v48 = vshrl.u32 %v860_v38, 7  ;;  %s7802_s2 = sshll.u32 %s9488_s8, 4  ;;  %s7803_s2 = int_to_ptr.vmem [resolvable:$true] %s7802_s2 }
  0xa7   :  { %v794_v5 = vld [vmem:[#allocation5 + $0x1420] sm:$0xff]  ;;  %v859_v47 = vunpack.c.0.s8 %v858_v37  ;;  %s9433_s7 = scalar_lea.vmem %s7803_s2, 32  ;;  %p9438_p3 = scmp.lt.s32.totalorder %s7803_s2, %s7803_s2 }
  0xa8   :  { %v158_v7 = vld [vmem:[#allocation5 + $0x40] sm:$0xff]  ;;  %v8457_v9 = vcombine.high %v790_v3, %v794_v5  ;;  %v8456_v10 = vcombine.low %v790_v3, %v794_v5  ;;  %4459 = vmatprep.subr.bf16.mxu0 %v7817_v4  ;;  %p9434_p2 = scmp.ne.s32.totalorder %s7803_s2, %s9433_s7  ;;  %p9439_p4 = scmp.lt.s32.totalorder %s9433_s7, %s9433_s7 }
  0xa9   :  { %v162_v8 = vld [vmem:[#allocation5 + $0x60] sm:$0xff]  ;;  %4460 = vmatpush1.bf16.msra.mxu0 %v7816_v6  ;;  %v9651_v57 = vsub.s32 %v859_v47, %v9648_v48  ;;  %v183_v47 = vld [vmem:[#allocation5 + $0x108] sm:$0xff] }
  0xaa   :  { %v7825_v11 = vcombine.high %v158_v7, %v162_v8  ;;  %v798_v12 = vld [vmem:[#allocation5 + $0x1440] sm:$0xff]  ;;  %4664 = vmatprep.subr.bf16.mxu1 %v8457_v9  ;;  %v7824_v19 = vcombine.low %v158_v7, %v162_v8  ;;  %v7815_v8 = vld.sshfl [vmem:[#allocation2 + $0x8] sm:$0x13 pattern:$0x75316420]  ;;  %p9440_p5 = por %p9439_p4, %p9438_p3 }
  0xab   :  { %v802_v13 = vld [vmem:[#allocation5 + $0x1460] sm:$0xff]  ;;  %4665 = vmatpush1.bf16.msra.mxu1 %v8456_v10  ;;  %v9657_v1 = vrot.slane %v9653_v60, %v9651_v57 }
  0xac   :  { %v166_v14 = vld [vmem:[#allocation5 + $0x80] sm:$0xff]  ;;  %v8465_v15 = vcombine.high %v798_v12, %v802_v13  ;;  %4461 = vmatprep.subr.bf16.mxu0 %v7825_v11  ;;  %v8464_v20 = vcombine.low %v798_v12, %v802_v13  ;;  %v151_v13 = vld [vmem:[#allocation5 + $0x8] sm:$0xff]  ;;  %p9441_p6 = pnand %p9440_p5, %p9434_p2 }
  0xad   :  { %v170_v16 = vld [vmem:[#allocation5 + $0xa0] sm:$0xff]  ;;  %4462 = vmatpush1.bf16.msra.mxu0 %v7824_v19  ;;  %v871_v5 = vcombine.high %v9657_v1, %v9657_v1 }
  0xae   :  { %v806_v17 = vld [vmem:[#allocation5 + $0x1480] sm:$0xff]  ;;  %v7833_v21 = vcombine.high %v166_v14, %v170_v16  ;;  %4666 = vmatprep.subr.bf16.mxu1 %v8465_v15  ;;  %v7832_v27 = vcombine.low %v166_v14, %v170_v16  ;;  %v155_v14 = vld [vmem:[#allocation5 + $0x28] sm:$0xff]  ;;  %v9665_v16 = vrot.slane %v7815_v8, %v9651_v57 }
  0xaf   :  { %v810_v18 = vld [vmem:[#allocation5 + $0x14a0] sm:$0xff]  ;;  %4667 = vmatpush1.bf16.msra.mxu1 %v8464_v20  ;;  %v9662_v12 = vrot.slane %v871_v5, %v9651_v57  ;;  %v7819_v19 = vcombine.high %v151_v13, %v155_v14  ;;  %v203_v5 = vld [vmem:[#allocation5 + $0x1a8] sm:$0xff] }
  0xb0   :  { %v8473_v22 = vcombine.high %v806_v17, %v810_v18  ;;  %v174_v23 = vld [vmem:[#allocation5 + $0xc0] sm:$0xff]  ;;  %4463 = vmatprep.subr.bf16.mxu0 %v7833_v21  ;;  %v8472_v28 = vcombine.low %v806_v17, %v810_v18 }
  0xb1   :  { %v178_v24 = vld [vmem:[#allocation5 + $0xe0] sm:$0xff]  ;;  %4464 = vmatpush1.bf16.msra.mxu0 %v7832_v27  ;;  %4491 = vmatprep.mubr.bf16.mxu0 %v9662_v12 }
  0xb2   :  { %v814_v25 = vld [vmem:[#allocation5 + $0x14c0] sm:$0xff]  ;;  %v7841_v29 = vcombine.high %v174_v23, %v178_v24  ;;  %4668 = vmatprep.subr.bf16.mxu1 %v8473_v22  ;;  %v7840_v35 = vcombine.low %v174_v23, %v178_v24  ;;  %v159_v22 = vld [vmem:[#allocation5 + $0x48] sm:$0xff]  ;;  %v9670_v24 = vcombine.high %v9665_v16, %v9665_v16 }
  0xb3   :  { %v818_v26 = vld [vmem:[#allocation5 + $0x14e0] sm:$0xff]  ;;  %4669 = vmatpush1.bf16.msra.mxu1 %v8472_v28  ;;  %v163_v23 = vld [vmem:[#allocation5 + $0x68] sm:$0xff] }
  0xb4   :  { %v8481_v30 = vcombine.high %v814_v25, %v818_v26  ;;  %v182_v31 = vld [vmem:[#allocation5 + $0x100] sm:$0xff]  ;;  %4465 = vmatprep.subr.bf16.mxu0 %v7841_v29  ;;  %v8480_v39 = vcombine.low %v814_v25, %v818_v26  ;;  %v7818_v26 = vcombine.low %v151_v13, %v155_v14  ;;  %v7827_v28 = vcombine.high %v159_v22, %v163_v23  ;;  %v207_v13 = vld [vmem:[#allocation5 + $0x1c8] sm:$0xff] }
  0xb5   :  { %v186_v32 = vld [vmem:[#allocation5 + $0x120] sm:$0xff]  ;;  %4466 = vmatpush1.bf16.msra.mxu0 %v7840_v35  ;;  %v211_v14 = vld [vmem:[#allocation5 + $0x1e8] sm:$0xff] }
  0xb6   :  { %v822_v33 = vld [vmem:[#allocation5 + $0x1500] sm:$0xff]  ;;  %v7849_v40 = vcombine.high %v182_v31, %v186_v32  ;;  %4670 = vmatprep.subr.bf16.mxu1 %v8481_v30  ;;  %v7848_v46 = vcombine.low %v182_v31, %v186_v32  ;;  %v167_v31 = vld [vmem:[#allocation5 + $0x88] sm:$0xff] }
  0xb7   :  { %v826_v34 = vld [vmem:[#allocation5 + $0x1520] sm:$0xff]  ;;  %4671 = vmatpush1.bf16.msra.mxu1 %v8480_v39  ;;  %v171_v32 = vld [vmem:[#allocation5 + $0xa8] sm:$0xff] }
  0xb8   :  { %v8489_v41 = vcombine.high %v822_v33, %v826_v34  ;;  %v190_v42 = vld [vmem:[#allocation5 + $0x140] sm:$0xff]  ;;  %4467 = vmatprep.subr.bf16.mxu0 %v7849_v40  ;;  %v8488_v49 = vcombine.low %v822_v33, %v826_v34  ;;  %v7826_v34 = vcombine.low %v159_v22, %v163_v23  ;;  %v7835_v36 = vcombine.high %v167_v31, %v171_v32  ;;  %v175_v39 = vld [vmem:[#allocation5 + $0xc8] sm:$0xff] }
  0xb9   :  { %v194_v43 = vld [vmem:[#allocation5 + $0x160] sm:$0xff]  ;;  %4468 = vmatpush1.bf16.msra.mxu0 %v7848_v46  ;;  %v179_v40 = vld [vmem:[#allocation5 + $0xe8] sm:$0xff] }
  0xba   :  { %v830_v44 = vld [vmem:[#allocation5 + $0x1540] sm:$0xff]  ;;  %v7857_v50 = vcombine.high %v190_v42, %v194_v43  ;;  %4672 = vmatprep.subr.bf16.mxu1 %v8489_v41  ;;  %v7856_v56 = vcombine.low %v190_v42, %v194_v43  ;;  %v7834_v42 = vcombine.low %v167_v31, %v171_v32  ;;  %v215_v22 = vld [vmem:[#allocation5 + $0x208] sm:$0xff]  ;;  %v9676_v31 = vrot.slane %v9657_v1, %v9651_v57 }
  0xbb   :  { %v834_v45 = vld [vmem:[#allocation5 + $0x1560] sm:$0xff]  ;;  %4673 = vmatpush1.bf16.msra.mxu1 %v8488_v49  ;;  %v187_v49 = vld [vmem:[#allocation5 + $0x128] sm:$0xff] }
  0xbc   :  { %v8497_v51 = vcombine.high %v830_v44, %v834_v45  ;;  %v198_v52 = vld [vmem:[#allocation5 + $0x180] sm:$0xff]  ;;  %4469 = vmatprep.subr.bf16.mxu0 %v7857_v50  ;;  %v8496_v58 = vcombine.low %v830_v44, %v834_v45  ;;  %v7843_v44 = vcombine.high %v175_v39, %v179_v40  ;;  %v219_v23 = vld [vmem:[#allocation5 + $0x228] sm:$0xff] }
  0xbd   :  { %v202_v53 = vld [vmem:[#allocation5 + $0x1a0] sm:$0xff]  ;;  %4470 = vmatpush1.bf16.msra.mxu0 %v7856_v56  ;;  %v191_v56 = vld [vmem:[#allocation5 + $0x148] sm:$0xff] }
  0xbe   :  { %v838_v54 = vld [vmem:[#allocation5 + $0x1580] sm:$0xff]  ;;  %v7865_v59 = vcombine.high %v198_v52, %v202_v53  ;;  %4674 = vmatprep.subr.bf16.mxu1 %v8497_v51  ;;  %v7864_v4 = vcombine.low %v198_v52, %v202_v53  ;;  %v7842_v51 = vcombine.low %v175_v39, %v179_v40  ;;  %v7851_v53 = vcombine.high %v183_v47, %v187_v49  ;;  %v223_v32 = vld [vmem:[#allocation5 + $0x248] sm:$0xff] }
  0xbf   :  { %v842_v55 = vld [vmem:[#allocation5 + $0x15a0] sm:$0xff]  ;;  %4675 = vmatpush1.bf16.msra.mxu1 %v8496_v58  ;;  %v195_v58 = vld [vmem:[#allocation5 + $0x168] sm:$0xff] }
  0xc0   :  { %v8505_v61 = vcombine.high %v838_v54, %v842_v55  ;;  %v206_v62 = vld [vmem:[#allocation5 + $0x1c0] sm:$0xff]  ;;  %4471 = vmatprep.subr.bf16.mxu0 %v7865_v59  ;;  %v8504_v6 = vcombine.low %v838_v54, %v842_v55  ;;  %v231_v40 = vld [vmem:[#allocation5 + $0x288] sm:$0xff] }
  0xc1   :  { %v210_v63 = vld [vmem:[#allocation5 + $0x1e0] sm:$0xff]  ;;  %4472 = vmatpush1.bf16.msra.mxu0 %v7864_v4  ;;  %v199_v4 = vld [vmem:[#allocation5 + $0x188] sm:$0xff] }
  0xc2   :  { %v846_v2 = vld [vmem:[#allocation5 + $0x15c0] sm:$0xff]  ;;  %v7873_v7 = vcombine.high %v206_v62, %v210_v63  ;;  %4676 = vmatprep.subr.bf16.mxu1 %v8505_v61  ;;  %v7872_v15 = vcombine.low %v206_v62, %v210_v63  ;;  %v7850_v61 = vcombine.low %v183_v47, %v187_v49  ;;  %v7859_v63 = vcombine.high %v191_v56, %v195_v58  ;;  %v239_v47 = vld [vmem:[#allocation5 + $0x2c8] sm:$0xff] }
  0xc3   :  { %v850_v3 = vld [vmem:[#allocation5 + $0x15e0] sm:$0xff]  ;;  %4677 = vmatpush1.bf16.msra.mxu1 %v8504_v6 }
  0xc4   :  { %v8513_v9 = vcombine.high %v846_v2, %v850_v3  ;;  %v214_v10 = vld [vmem:[#allocation5 + $0x200] sm:$0xff]  ;;  %4473 = vmatprep.subr.bf16.mxu0 %v7873_v7  ;;  %v8512_v17 = vcombine.low %v846_v2, %v850_v3  ;;  %v7858_v7 = vcombine.low %v191_v56, %v195_v58  ;;  %v247_v56 = vld [vmem:[#allocation5 + $0x308] sm:$0xff] }
  0xc5   :  { %v218_v11 = vld [vmem:[#allocation5 + $0x220] sm:$0xff]  ;;  %4474 = vmatpush1.bf16.msra.mxu0 %v7872_v15 }
  0xc6   :  { %v7881_v18 = vcombine.high %v214_v10, %v218_v11  ;;  %4678 = vmatprep.subr.bf16.mxu1 %v8513_v9  ;;  %v222_v20 = vld [vmem:[#allocation5 + $0x240] sm:$0xff]  ;;  %v7880_v25 = vcombine.low %v214_v10, %v218_v11  ;;  %v7867_v9 = vcombine.high %v199_v4, %v203_v5 }
  0xc7   :  { %v226_v21 = vld [vmem:[#allocation5 + $0x260] sm:$0xff]  ;;  %4679 = vmatpush1.bf16.msra.mxu1 %v8512_v17  ;;  %v7866_v17 = vcombine.low %v199_v4, %v203_v5  ;;  %v255_v4 = vld [vmem:[#allocation5 + $0x348] sm:$0xff] }
  0xc8   :  { %4475 = vmatprep.subr.bf16.mxu0 %v7881_v18  ;;  %v7889_v27 = vcombine.high %v222_v20, %v226_v21  ;;  %4705 = vmatprep.subr.bf16.mxu1 %v7819_v19  ;;  %v230_v29 = vld [vmem:[#allocation5 + $0x280] sm:$0xff]  ;;  %v7888_v33 = vcombine.low %v222_v20, %v226_v21  ;;  %v7875_v19 = vcombine.high %v207_v13, %v211_v14 }
  0xc9   :  { %v234_v30 = vld [vmem:[#allocation5 + $0x2a0] sm:$0xff]  ;;  %4476 = vmatpush1.bf16.msra.mxu0 %v7880_v25 }
  0xca   :  { %4697 = vmatmul.mubr.bf16.vlgmr.msra.gmra.mrb[0].mxu1 %v9670_v24  ;;  %4477 = vmatprep.subr.bf16.mxu0 %v7889_v27  ;;  %v7897_v35 = vcombine.high %v230_v29, %v234_v30  ;;  %v238_v37 = vld [vmem:[#allocation5 + $0x2c0] sm:$0xff]  ;;  %v7896_v41 = vcombine.low %v230_v29, %v234_v30 }
  0xcb   :  { %4706 = vmatpush1.bf16.msra.mxu1 %v7818_v26  ;;  %v242_v38 = vld [vmem:[#allocation5 + $0x2e0] sm:$0xff]  ;;  %4737 = vmatprep.mubr.bf16.mxu1 %v9662_v12  ;;  %v7874_v26 = vcombine.low %v207_v13, %v211_v14  ;;  %v263_v13 = vld [vmem:[#allocation5 + $0x388] sm:$0xff] }
  0xcc   :  { %4707 = vmatprep.subr.bf16.mxu1 %v7827_v28  ;;  %v7905_v43 = vcombine.high %v238_v37, %v242_v38  ;;  %v246_v45 = vld [vmem:[#allocation5 + $0x300] sm:$0xff]  ;;  %v7904_v50 = vcombine.low %v238_v37, %v242_v38  ;;  %v7883_v28 = vcombine.high %v215_v22, %v219_v23 }
  0xcd   :  { %4478 = vmatpush1.bf16.msra.mxu0 %v7888_v33  ;;  %v250_v46 = vld [vmem:[#allocation5 + $0x320] sm:$0xff]  ;;  %v227_v33 = vld [vmem:[#allocation5 + $0x268] sm:$0xff] }
  0xce   :  { %4479 = vmatprep.subr.bf16.mxu0 %v7897_v35  ;;  %v7913_v52 = vcombine.high %v246_v45, %v250_v46  ;;  %v254_v54 = vld [vmem:[#allocation5 + $0x340] sm:$0xff]  ;;  %v7912_v59 = vcombine.low %v246_v45, %v250_v46  ;;  %v9680_v35 = vcombine.high %v9662_v12, %v9662_v12 }
  0xcf   :  { %4708 = vmatpush1.bf16.msra.mxu1 %v7826_v34  ;;  %v258_v55 = vld [vmem:[#allocation5 + $0x360] sm:$0xff] }
  0xd0   :  { %4709 = vmatprep.subr.bf16.mxu1 %v7835_v36  ;;  %v7921_v62 = vcombine.high %v254_v54, %v258_v55  ;;  %v262_v2 = vld [vmem:[#allocation5 + $0x380] sm:$0xff]  ;;  %v7920_v6 = vcombine.low %v254_v54, %v258_v55  ;;  %v7882_v36 = vcombine.low %v215_v22, %v219_v23  ;;  %v271_v22 = vld [vmem:[#allocation5 + $0x3c8] sm:$0xff] }
  0xd1   :  { %4480 = vmatpush1.bf16.msra.mxu0 %v7896_v41  ;;  %v266_v3 = vld [vmem:[#allocation5 + $0x3a0] sm:$0xff]  ;;  %v7891_v41 = vcombine.high %v223_v32, %v227_v33 }
  0xd2   :  { %4481 = vmatprep.subr.bf16.mxu0 %v7905_v43  ;;  %v7929_v8 = vcombine.high %v262_v2, %v266_v3  ;;  %v270_v10 = vld [vmem:[#allocation5 + $0x3c0] sm:$0xff]  ;;  %v7928_v15 = vcombine.low %v262_v2, %v266_v3  ;;  %v7890_v43 = vcombine.low %v223_v32, %v227_v33  ;;  %v279_v32 = vld [vmem:[#allocation5 + $0x408] sm:$0xff] }
  0xd3   :  { %4710 = vmatpush1.bf16.msra.mxu1 %v7834_v42  ;;  %v274_v11 = vld [vmem:[#allocation5 + $0x3e0] sm:$0xff]  ;;  %v235_v42 = vld [vmem:[#allocation5 + $0x2a8] sm:$0xff] }
  0xd4   :  { %4711 = vmatprep.subr.bf16.mxu1 %v7843_v44  ;;  %v7937_v18 = vcombine.high %v270_v10, %v274_v11  ;;  %v278_v20 = vld [vmem:[#allocation5 + $0x400] sm:$0xff]  ;;  %v7936_v25 = vcombine.low %v270_v10, %v274_v11  ;;  %v7899_v49 = vcombine.high %v231_v40, %v235_v42 }
  0xd5   :  { %4482 = vmatpush1.bf16.msra.mxu0 %v7904_v50  ;;  %v282_v21 = vld [vmem:[#allocation5 + $0x420] sm:$0xff]  ;;  %v243_v50 = vld [vmem:[#allocation5 + $0x2e8] sm:$0xff] }
  0xd6   :  { %4483 = vmatprep.subr.bf16.mxu0 %v7913_v52  ;;  %v7945_v27 = vcombine.high %v278_v20, %v282_v21  ;;  %v286_v29 = vld [vmem:[#allocation5 + $0x440] sm:$0xff]  ;;  %v7944_v34 = vcombine.low %v278_v20, %v282_v21  ;;  %v7898_v52 = vcombine.low %v231_v40, %v235_v42  ;;  %v7907_v58 = vcombine.high %v239_v47, %v243_v50 }
  0xd7   :  { %4712 = vmatpush1.bf16.msra.mxu1 %v7842_v51  ;;  %v290_v30 = vld [vmem:[#allocation5 + $0x460] sm:$0xff] }
  0xd8   :  { %4713 = vmatprep.subr.bf16.mxu1 %v7851_v53  ;;  %v7953_v37 = vcombine.high %v286_v29, %v290_v30  ;;  %v294_v38 = vld [vmem:[#allocation5 + $0x480] sm:$0xff]  ;;  %v7952_v1 = vcombine.low %v286_v29, %v290_v30 }
  0xd9   :  { %4484 = vmatpush1.bf16.msra.mxu0 %v7912_v59  ;;  %v298_v39 = vld [vmem:[#allocation5 + $0x4a0] sm:$0xff]  ;;  %v251_v59 = vld [vmem:[#allocation5 + $0x328] sm:$0xff] }
  0xda   :  { %4485 = vmatprep.subr.bf16.mxu0 %v7921_v62  ;;  %v7961_v44 = vcombine.high %v294_v38, %v298_v39  ;;  %v302_v45 = vld [vmem:[#allocation5 + $0x4c0] sm:$0xff]  ;;  %v7960_v51 = vcombine.low %v294_v38, %v298_v39  ;;  %v7906_v62 = vcombine.low %v239_v47, %v243_v50  ;;  %v7915_v5 = vcombine.high %v247_v56, %v251_v59 }
  0xdb   :  { %4714 = vmatpush1.bf16.msra.mxu1 %v7850_v61  ;;  %v306_v46 = vld [vmem:[#allocation5 + $0x4e0] sm:$0xff] }
  0xdc   :  { %4715 = vmatprep.subr.bf16.mxu1 %v7859_v63  ;;  %v7969_v53 = vcombine.high %v302_v45, %v306_v46  ;;  %v310_v54 = vld [vmem:[#allocation5 + $0x500] sm:$0xff]  ;;  %v7968_v61 = vcombine.low %v302_v45, %v306_v46 }
  0xdd   :  { %4486 = vmatpush1.bf16.msra.mxu0 %v7920_v6  ;;  %v314_v55 = vld [vmem:[#allocation5 + $0x520] sm:$0xff]  ;;  %v259_v6 = vld [vmem:[#allocation5 + $0x368] sm:$0xff] }
  0xde   :  { %4487 = vmatprep.subr.bf16.mxu0 %v7929_v8  ;;  %v7977_v63 = vcombine.high %v310_v54, %v314_v55  ;;  %v318_v2 = vld [vmem:[#allocation5 + $0x540] sm:$0xff]  ;;  %v7914_v8 = vcombine.low %v247_v56, %v251_v59  ;;  %v7923_v14 = vcombine.high %v255_v4, %v259_v6 }
  0xdf   :  { %4716 = vmatpush1.bf16.msra.mxu1 %v7858_v7  ;;  %v322_v3 = vld [vmem:[#allocation5 + $0x560] sm:$0xff]  ;;  %v7976_v7 = vcombine.low %v310_v54, %v314_v55 }
  0xe0   :  { %4717 = vmatprep.subr.bf16.mxu1 %v7867_v9  ;;  %v7985_v9 = vcombine.high %v318_v2, %v322_v3  ;;  %v326_v10 = vld [vmem:[#allocation5 + $0x580] sm:$0xff] }
  0xe1   :  { %4488 = vmatpush1.bf16.msra.mxu0 %v7928_v15  ;;  %v330_v11 = vld [vmem:[#allocation5 + $0x5a0] sm:$0xff]  ;;  %v267_v15 = vld [vmem:[#allocation5 + $0x3a8] sm:$0xff] }
  0xe2   :  { %4489 = vmatprep.subr.bf16.mxu0 %v7937_v18  ;;  %v7922_v18 = vcombine.low %v255_v4, %v259_v6  ;;  %v334_v20 = vld [vmem:[#allocation5 + $0x5c0] sm:$0xff]  ;;  %v7931_v23 = vcombine.high %v263_v13, %v267_v15 }
  0xe3   :  { %4718 = vmatpush1.bf16.msra.mxu1 %v7866_v17  ;;  %v7984_v17 = vcombine.low %v318_v2, %v322_v3  ;;  %v338_v21 = vld [vmem:[#allocation5 + $0x5e0] sm:$0xff] }
  0xe4   :  { %4719 = vmatprep.subr.bf16.mxu1 %v7875_v19  ;;  %v7993_v19 = vcombine.high %v326_v10, %v330_v11  ;;  %v342_v29 = vld [vmem:[#allocation5 + $0x600] sm:$0xff] }
  0xe5   :  { %4490 = vmatpush1.bf16.msra.mxu0 %v7936_v25  ;;  %v275_v25 = vld [vmem:[#allocation5 + $0x3e8] sm:$0xff]  ;;  %v346_v30 = vld [vmem:[#allocation5 + $0x620] sm:$0xff] }
  0xe6   :  { %4500 = vmatprep.subr.bf16.mxu0 %v7945_v27  ;;  %v7930_v27 = vcombine.low %v263_v13, %v267_v15  ;;  %v7939_v33 = vcombine.high %v271_v22, %v275_v25  ;;  %v8009_v38 = vcombine.high %v342_v29, %v346_v30  ;;  %v350_v39 = vld [vmem:[#allocation5 + $0x640] sm:$0xff] }
  0xe7   :  { %4720 = vmatpush1.bf16.msra.mxu1 %v7874_v26  ;;  %v7992_v26 = vcombine.low %v326_v10, %v330_v11  ;;  %v354_v40 = vld [vmem:[#allocation5 + $0x660] sm:$0xff] }
  0xe8   :  { %4721 = vmatprep.subr.bf16.mxu1 %v7883_v28  ;;  %4492 = vmatmul.mubr.bf16.vlgmr.msra.gmra.mrb[0].mxu0 %v9676_v31  ;;  %v8001_v28 = vcombine.high %v334_v20, %v338_v21  ;;  %v8017_v45 = vcombine.high %v350_v39, %v354_v40  ;;  %v358_v46 = vld [vmem:[#allocation5 + $0x680] sm:$0xff] }
  0xe9   :  { %4501 = vmatpush1.bf16.msra.mxu0 %v7944_v34  ;;  %4532 = vmatprep.mubr.bf16.mxu0 %v9680_v35  ;;  %v283_v34 = vld [vmem:[#allocation5 + $0x428] sm:$0xff]  ;;  %v362_v47 = vld [vmem:[#allocation5 + $0x6a0] sm:$0xff] }
  0xea   :  { %4502 = vmatprep.subr.bf16.mxu0 %v7953_v37  ;;  %v7938_v37 = vcombine.low %v271_v22, %v275_v25  ;;  %v7947_v42 = vcombine.high %v279_v32, %v283_v34  ;;  %v8025_v54 = vcombine.high %v358_v46, %v362_v47  ;;  %v366_v55 = vld [vmem:[#allocation5 + $0x6c0] sm:$0xff] }
  0xeb   :  { %4722 = vmatpush1.bf16.msra.mxu1 %v7882_v36  ;;  %v8000_v36 = vcombine.low %v334_v20, %v338_v21  ;;  %v370_v56 = vld [vmem:[#allocation5 + $0x6e0] sm:$0xff] }
  0xec   :  { %4723 = vmatprep.subr.bf16.mxu1 %v7891_v41  ;;  %v287_v41 = vld [vmem:[#allocation5 + $0x448] sm:$0xff]  ;;  %v8033_v2 = vcombine.high %v366_v55, %v370_v56  ;;  %v374_v3 = vld [vmem:[#allocation5 + $0x700] sm:$0xff] }
  0xed   :  { %4503 = vmatpush1.bf16.msra.mxu0 %v7952_v1  ;;  %v291_v1 = vld [vmem:[#allocation5 + $0x468] sm:$0xff]  ;;  %v378_v4 = vld [vmem:[#allocation5 + $0x720] sm:$0xff] }
  0xee   :  { %4504 = vmatprep.subr.bf16.mxu0 %v7961_v44  ;;  %v7946_v44 = vcombine.low %v279_v32, %v283_v34  ;;  %v7955_v50 = vcombine.high %v287_v41, %v291_v1  ;;  %v8041_v10 = vcombine.high %v374_v3, %v378_v4  ;;  %v382_v11 = vld [vmem:[#allocation5 + $0x740] sm:$0xff]  ;;  %v335_v34 = vld [vmem:[#allocation5 + $0x5c8] sm:$0xff] }
  0xef   :  { %4724 = vmatpush1.bf16.msra.mxu1 %v7890_v43  ;;  %v8008_v43 = vcombine.low %v342_v29, %v346_v30  ;;  %v386_v13 = vld [vmem:[#allocation5 + $0x760] sm:$0xff] }
  0xf0   :  { %4725 = vmatprep.subr.bf16.mxu1 %v7899_v49  ;;  %v295_v49 = vld [vmem:[#allocation5 + $0x488] sm:$0xff]  ;;  %v8049_v20 = vcombine.high %v382_v11, %v386_v13  ;;  %v390_v21 = vld [vmem:[#allocation5 + $0x780] sm:$0xff] }
  0xf1   :  { %4505 = vmatpush1.bf16.msra.mxu0 %v7960_v51  ;;  %v299_v51 = vld [vmem:[#allocation5 + $0x4a8] sm:$0xff]  ;;  %v394_v22 = vld [vmem:[#allocation5 + $0x7a0] sm:$0xff] }
  0xf2   :  { %4506 = vmatprep.subr.bf16.mxu0 %v7969_v53  ;;  %v7954_v53 = vcombine.low %v287_v41, %v291_v1  ;;  %v7963_v59 = vcombine.high %v295_v49, %v299_v51  ;;  %v8057_v30 = vcombine.high %v390_v21, %v394_v22  ;;  %v398_v32 = vld [vmem:[#allocation5 + $0x7c0] sm:$0xff]  ;;  %v343_v1 = vld [vmem:[#allocation5 + $0x608] sm:$0xff] }
  0xf3   :  { %4726 = vmatpush1.bf16.msra.mxu1 %v7898_v52  ;;  %v8016_v52 = vcombine.low %v350_v39, %v354_v40 }
  0xf4   :  { %4727 = vmatprep.subr.bf16.mxu1 %v7907_v58  ;;  %v303_v58 = vld [vmem:[#allocation5 + $0x4c8] sm:$0xff] }
  0xf5   :  { %4507 = vmatpush1.bf16.msra.mxu0 %v7968_v61  ;;  %v307_v61 = vld [vmem:[#allocation5 + $0x4e8] sm:$0xff] }
  0xf6   :  { %4508 = vmatprep.subr.bf16.mxu0 %v7977_v63  ;;  %v7962_v63 = vcombine.low %v295_v49, %v299_v51  ;;  %v7971_v6 = vcombine.high %v303_v58, %v307_v61  ;;  %v418_v51 = vld [vmem:[#allocation5 + $0x860] sm:$0xff] }
  0xf7   :  { %4728 = vmatpush1.bf16.msra.mxu1 %v7906_v62  ;;  %v8024_v62 = vcombine.low %v358_v46, %v362_v47 }
  0xf8   :  { %4729 = vmatprep.subr.bf16.mxu1 %v7915_v5  ;;  %v311_v5 = vld [vmem:[#allocation5 + $0x508] sm:$0xff] }
  0xf9   :  { %4509 = vmatpush1.bf16.msra.mxu0 %v7976_v7  ;;  %v315_v7 = vld [vmem:[#allocation5 + $0x528] sm:$0xff] }
  0xfa   :  { %4510 = vmatprep.subr.bf16.mxu0 %v7985_v9  ;;  %v7970_v9 = vcombine.low %v303_v58, %v307_v61  ;;  %v7979_v15 = vcombine.high %v311_v5, %v315_v7 }
  0xfb   :  { %4730 = vmatpush1.bf16.msra.mxu1 %v7914_v8  ;;  %v8032_v8 = vcombine.low %v366_v55, %v370_v56  ;;  %v9695_v55 = vcombine.high %v9676_v31, %v9676_v31 }
  0xfc   :  { %4731 = vmatprep.subr.bf16.mxu1 %v7923_v14  ;;  %v319_v14 = vld [vmem:[#allocation5 + $0x548] sm:$0xff] }
  0xfd   :  { %4511 = vmatpush1.bf16.msra.mxu0 %v7984_v17  ;;  %v323_v17 = vld [vmem:[#allocation5 + $0x568] sm:$0xff] }
  0xfe   :  { %4512 = vmatprep.subr.bf16.mxu0 %v7993_v19  ;;  %v7978_v19 = vcombine.low %v311_v5, %v315_v7  ;;  %v7987_v25 = vcombine.high %v319_v14, %v323_v17  ;;  %v7986_v29 = vcombine.low %v319_v14, %v323_v17 }
  0xff   :  { %4732 = vmatpush1.bf16.msra.mxu1 %v7922_v18  ;;  %v8040_v18 = vcombine.low %v374_v3, %v378_v4  ;;  %v363_v4 = vld [vmem:[#allocation5 + $0x6a8] sm:$0xff] }
 0x100   :  { %4733 = vmatprep.subr.bf16.mxu1 %v7931_v23  ;;  %v327_v23 = vld [vmem:[#allocation5 + $0x588] sm:$0xff] }
 0x101   :  { %4513 = vmatpush1.bf16.msra.mxu0 %v7992_v26  ;;  %v331_v26 = vld [vmem:[#allocation5 + $0x5a8] sm:$0xff] }
 0x102   :  { %4514 = vmatprep.subr.bf16.mxu0 %v8001_v28  ;;  %v856_v28 = vcombine.high %v9653_v60, %v9653_v60  ;;  %v7994_v40 = vcombine.low %v327_v23, %v331_v26  ;;  %v406_v60 = vld [vmem:[#allocation5 + $0x800] sm:$0xff] }
 0x103   :  { %4734 = vmatpush1.bf16.msra.mxu1 %v7930_v27  ;;  %v8048_v27 = vcombine.low %v382_v11, %v386_v13  ;;  %v371_v13 = vld [vmem:[#allocation5 + $0x6e8] sm:$0xff] }
 0x104   :  { %4735 = vmatprep.subr.bf16.mxu1 %v7939_v33  ;;  %v402_v33 = vld [vmem:[#allocation5 + $0x7e0] sm:$0xff]  ;;  %v9689_v39 = vrot.slane %v856_v28, %v9651_v57 }
 0x105   :  { %4515 = vmatpush1.bf16.msra.mxu0 %v8000_v36  ;;  %v7995_v36 = vcombine.high %v327_v23, %v331_v26  ;;  %v8065_v41 = vcombine.high %v398_v32, %v402_v33  ;;  %v450_v28 = vld [vmem:[#allocation5 + $0x960] sm:$0xff] }
 0x106   :  { %4516 = vmatprep.subr.bf16.mxu0 %v8009_v38  ;;  %v8056_v38 = vcombine.low %v390_v21, %v394_v22  ;;  %v872_v46 = vcombine.high %v9689_v39, %v9689_v39  ;;  %v379_v22 = vld [vmem:[#allocation5 + $0x728] sm:$0xff] }
 0x107   :  { %4736 = vmatpush1.bf16.msra.mxu1 %v7938_v37  ;;  %v339_v37 = vld [vmem:[#allocation5 + $0x5e8] sm:$0xff] }
 0x108   :  { %4746 = vmatprep.subr.bf16.mxu1 %v7947_v42  ;;  %v410_v42 = vld [vmem:[#allocation5 + $0x820] sm:$0xff]  ;;  %v8002_v47 = vcombine.low %v335_v34, %v339_v37  ;;  %v9698_v58 = vrot.slane %v872_v46, %v9651_v57  ;;  %v399_v46 = vld [vmem:[#allocation5 + $0x7c8] sm:$0xff] }
 0x109   :  { %4517 = vmatpush1.bf16.msra.mxu0 %v8008_v43  ;;  %v8003_v43 = vcombine.high %v335_v34, %v339_v37  ;;  %v8073_v49 = vcombine.high %v406_v60, %v410_v42  ;;  %v8072_v56 = vcombine.low %v406_v60, %v410_v42  ;;  %v454_v37 = vld [vmem:[#allocation5 + $0x980] sm:$0xff]  ;;  %v395_v60 = vld [vmem:[#allocation5 + $0x7a8] sm:$0xff] }
 0x10a   :  { %4738 = vmatmul.mubr.bf16.vlgmr.msra.gmra.mrb[4].mxu1 %v9676_v31  ;;  %4518 = vmatprep.subr.bf16.mxu0 %v8017_v45  ;;  %v8064_v45 = vcombine.low %v398_v32, %v402_v33  ;;  %v387_v32 = vld [vmem:[#allocation5 + $0x768] sm:$0xff] }
 0x10b   :  { %4747 = vmatpush1.bf16.msra.mxu1 %v7946_v44  ;;  %4778 = vmatprep.mubr.bf16.mxu1 %v9680_v35  ;;  %v347_v44 = vld [vmem:[#allocation5 + $0x628] sm:$0xff] }
 0x10c   :  { %4748 = vmatprep.subr.bf16.mxu1 %v7955_v50  ;;  %v414_v50 = vld [vmem:[#allocation5 + $0x840] sm:$0xff] }
 0x10d   :  { %4519 = vmatpush1.bf16.msra.mxu0 %v8016_v52  ;;  %v351_v52 = vld [vmem:[#allocation5 + $0x648] sm:$0xff]  ;;  %v8081_v61 = vcombine.high %v414_v50, %v418_v51  ;;  %v8080_v5 = vcombine.low %v414_v50, %v418_v51 }
 0x10e   :  { %4520 = vmatprep.subr.bf16.mxu0 %v8025_v54  ;;  %v355_v54 = vld [vmem:[#allocation5 + $0x668] sm:$0xff] }
 0x10f   :  { %4749 = vmatpush1.bf16.msra.mxu1 %v7954_v53  ;;  %v8011_v53 = vcombine.high %v343_v1, %v347_v44  ;;  %v8019_v3 = vcombine.high %v351_v52, %v355_v54 }
 0x110   :  { %4750 = vmatprep.subr.bf16.mxu1 %v7963_v59  ;;  %v8010_v59 = vcombine.low %v343_v1, %v347_v44  ;;  %v462_v44 = vld [vmem:[#allocation5 + $0x9c0] sm:$0xff] }
 0x111   :  { %4521 = vmatpush1.bf16.msra.mxu0 %v8024_v62  ;;  %v422_v62 = vld [vmem:[#allocation5 + $0x880] sm:$0xff] }
 0x112   :  { %4522 = vmatprep.subr.bf16.mxu0 %v8033_v2  ;;  %v359_v2 = vld [vmem:[#allocation5 + $0x688] sm:$0xff] }
 0x113   :  { %4751 = vmatpush1.bf16.msra.mxu1 %v7962_v63  ;;  %v426_v63 = vld [vmem:[#allocation5 + $0x8a0] sm:$0xff]  ;;  %v8027_v11 = vcombine.high %v359_v2, %v363_v4 }
 0x114   :  { %4752 = vmatprep.subr.bf16.mxu1 %v7971_v6  ;;  %v8018_v6 = vcombine.low %v351_v52, %v355_v54  ;;  %v8089_v7 = vcombine.high %v422_v62, %v426_v63  ;;  %v8088_v14 = vcombine.low %v422_v62, %v426_v63  ;;  %v474_v54 = vld [vmem:[#allocation5 + $0xa20] sm:$0xff] }
 0x115   :  { %4523 = vmatpush1.bf16.msra.mxu0 %v8032_v8  ;;  %v430_v8 = vld [vmem:[#allocation5 + $0x8c0] sm:$0xff] }
 0x116   :  { %4524 = vmatprep.subr.bf16.mxu0 %v8041_v10  ;;  %v367_v10 = vld [vmem:[#allocation5 + $0x6c8] sm:$0xff] }
 0x117   :  { %4753 = vmatpush1.bf16.msra.mxu1 %v7970_v9  ;;  %v434_v9 = vld [vmem:[#allocation5 + $0x8e0] sm:$0xff]  ;;  %v8035_v21 = vcombine.high %v367_v10, %v371_v13 }
 0x118   :  { %4754 = vmatprep.subr.bf16.mxu1 %v7979_v15  ;;  %v8026_v15 = vcombine.low %v359_v2, %v363_v4  ;;  %v8097_v17 = vcombine.high %v430_v8, %v434_v9  ;;  %v8096_v23 = vcombine.low %v430_v8, %v434_v9  ;;  %v482_v4 = vld [vmem:[#allocation5 + $0xa60] sm:$0xff] }
 0x119   :  { %4525 = vmatpush1.bf16.msra.mxu0 %v8040_v18  ;;  %v438_v18 = vld [vmem:[#allocation5 + $0x900] sm:$0xff] }
 0x11a   :  { %4526 = vmatprep.subr.bf16.mxu0 %v8049_v20  ;;  %v375_v20 = vld [vmem:[#allocation5 + $0x708] sm:$0xff] }
 0x11b   :  { %4755 = vmatpush1.bf16.msra.mxu1 %v7978_v19  ;;  %v442_v19 = vld [vmem:[#allocation5 + $0x920] sm:$0xff]  ;;  %v8042_v34 = vcombine.low %v375_v20, %v379_v22 }
 0x11c   :  { %4756 = vmatprep.subr.bf16.mxu1 %v7987_v25  ;;  %v8034_v25 = vcombine.low %v367_v10, %v371_v13  ;;  %v8105_v26 = vcombine.high %v438_v18, %v442_v19  ;;  %v8104_v33 = vcombine.low %v438_v18, %v442_v19  ;;  %v490_v13 = vld [vmem:[#allocation5 + $0xaa0] sm:$0xff] }
 0x11d   :  { %4527 = vmatpush1.bf16.msra.mxu0 %v8048_v27  ;;  %v446_v27 = vld [vmem:[#allocation5 + $0x940] sm:$0xff] }
 0x11e   :  { %4528 = vmatprep.subr.bf16.mxu0 %v8057_v30  ;;  %v8043_v30 = vcombine.high %v375_v20, %v379_v22  ;;  %v8112_v42 = vcombine.low %v446_v27, %v450_v28  ;;  %v498_v22 = vld [vmem:[#allocation5 + $0xae0] sm:$0xff] }
 0x11f   :  { %4757 = vmatpush1.bf16.msra.mxu1 %v7986_v29  ;;  %v383_v29 = vld [vmem:[#allocation5 + $0x748] sm:$0xff] }
 0x120   :  { %4758 = vmatprep.subr.bf16.mxu1 %v7995_v36  ;;  %v8113_v36 = vcombine.high %v446_v27, %v450_v28  ;;  %v8050_v1 = vcombine.low %v383_v29, %v387_v32 }
 0x121   :  { %4529 = vmatpush1.bf16.msra.mxu0 %v8056_v38  ;;  %v458_v38 = vld [vmem:[#allocation5 + $0x9a0] sm:$0xff] }
 0x122   :  { %4530 = vmatprep.subr.bf16.mxu0 %v8065_v41  ;;  %v8051_v41 = vcombine.high %v383_v29, %v387_v32  ;;  %v8120_v50 = vcombine.low %v454_v37, %v458_v38  ;;  %v506_v32 = vld [vmem:[#allocation5 + $0xb20] sm:$0xff] }
 0x123   :  { %4759 = vmatpush1.bf16.msra.mxu1 %v7994_v40  ;;  %v391_v40 = vld [vmem:[#allocation5 + $0x788] sm:$0xff] }
 0x124   :  { %4760 = vmatprep.subr.bf16.mxu1 %v8003_v43  ;;  %v8121_v43 = vcombine.high %v454_v37, %v458_v38  ;;  %v8058_v51 = vcombine.low %v391_v40, %v395_v60 }
 0x125   :  { %4531 = vmatpush1.bf16.msra.mxu0 %v8064_v45  ;;  %v466_v45 = vld [vmem:[#allocation5 + $0x9e0] sm:$0xff] }
 0x126   :  { %4541 = vmatprep.subr.bf16.mxu0 %v8073_v49  ;;  %v403_v49 = vld [vmem:[#allocation5 + $0x7e8] sm:$0xff]  ;;  %v8129_v52 = vcombine.high %v462_v44, %v466_v45  ;;  %v8128_v62 = vcombine.low %v462_v44, %v466_v45 }
 0x127   :  { %4761 = vmatpush1.bf16.msra.mxu1 %v8002_v47  ;;  %v8059_v47 = vcombine.high %v391_v40, %v395_v60  ;;  %v8066_v63 = vcombine.low %v399_v46, %v403_v49  ;;  %v514_v60 = vld [vmem:[#allocation5 + $0xb60] sm:$0xff] }
 0x128   :  { %4762 = vmatprep.subr.bf16.mxu1 %v8011_v53  ;;  %4533 = vmatmul.mubr.bf16.vlgmr.msra.gmra.mrb[0].mxu0 %v9695_v55  ;;  %v470_v53 = vld [vmem:[#allocation5 + $0xa00] sm:$0xff] }
 0x129   :  { %4542 = vmatpush1.bf16.msra.mxu0 %v8072_v56  ;;  %4573 = vmatprep.mubr.bf16.mxu0 %v9698_v58  ;;  %v407_v56 = vld [vmem:[#allocation5 + $0x808] sm:$0xff]  ;;  %v8137_v2 = vcombine.high %v470_v53, %v474_v54  ;;  %v8136_v8 = vcombine.low %v470_v53, %v474_v54 }
 0x12a   :  { %4543 = vmatprep.subr.bf16.mxu0 %v8081_v61  ;;  %v411_v61 = vld [vmem:[#allocation5 + $0x828] sm:$0xff] }
 0x12b   :  { %4763 = vmatpush1.bf16.msra.mxu1 %v8010_v59  ;;  %v8067_v59 = vcombine.high %v399_v46, %v403_v49  ;;  %v8074_v9 = vcombine.low %v407_v56, %v411_v61  ;;  %v518_v49 = vld [vmem:[#allocation5 + $0xb80] sm:$0xff] }
 0x12c   :  { %4764 = vmatprep.subr.bf16.mxu1 %v8019_v3  ;;  %v478_v3 = vld [vmem:[#allocation5 + $0xa40] sm:$0xff] }
 0x12d   :  { %4544 = vmatpush1.bf16.msra.mxu0 %v8080_v5  ;;  %v415_v5 = vld [vmem:[#allocation5 + $0x848] sm:$0xff]  ;;  %v8145_v10 = vcombine.high %v478_v3, %v482_v4  ;;  %v8144_v18 = vcombine.low %v478_v3, %v482_v4 }
 0x12e   :  { %4545 = vmatprep.subr.bf16.mxu0 %v8089_v7  ;;  %v419_v7 = vld [vmem:[#allocation5 + $0x868] sm:$0xff] }
 0x12f   :  { %4765 = vmatpush1.bf16.msra.mxu1 %v8018_v6  ;;  %v8075_v6 = vcombine.high %v407_v56, %v411_v61  ;;  %v8082_v19 = vcombine.low %v415_v5, %v419_v7  ;;  %v526_v61 = vld [vmem:[#allocation5 + $0xbc0] sm:$0xff] }
 0x130   :  { %4766 = vmatprep.subr.bf16.mxu1 %v8027_v11  ;;  %v486_v11 = vld [vmem:[#allocation5 + $0xa80] sm:$0xff] }
 0x131   :  { %4546 = vmatpush1.bf16.msra.mxu0 %v8088_v14  ;;  %v423_v14 = vld [vmem:[#allocation5 + $0x888] sm:$0xff]  ;;  %v8153_v20 = vcombine.high %v486_v11, %v490_v13  ;;  %v8152_v27 = vcombine.low %v486_v11, %v490_v13 }
 0x132   :  { %4547 = vmatprep.subr.bf16.mxu0 %v8097_v17  ;;  %v427_v17 = vld [vmem:[#allocation5 + $0x8a8] sm:$0xff] }
 0x133   :  { %4767 = vmatpush1.bf16.msra.mxu1 %v8026_v15  ;;  %v8083_v15 = vcombine.high %v415_v5, %v419_v7  ;;  %v8090_v28 = vcombine.low %v423_v14, %v427_v17  ;;  %v534_v7 = vld [vmem:[#allocation5 + $0xc00] sm:$0xff] }
 0x134   :  { %4768 = vmatprep.subr.bf16.mxu1 %v8035_v21  ;;  %v494_v21 = vld [vmem:[#allocation5 + $0xac0] sm:$0xff] }
 0x135   :  { %4548 = vmatpush1.bf16.msra.mxu0 %v8096_v23  ;;  %v431_v23 = vld [vmem:[#allocation5 + $0x8c8] sm:$0xff]  ;;  %v8161_v29 = vcombine.high %v494_v21, %v498_v22  ;;  %v8160_v37 = vcombine.low %v494_v21, %v498_v22 }
 0x136   :  { %4549 = vmatprep.subr.bf16.mxu0 %v8105_v26  ;;  %v435_v26 = vld [vmem:[#allocation5 + $0x8e8] sm:$0xff] }
 0x137   :  { %4769 = vmatpush1.bf16.msra.mxu1 %v8034_v25  ;;  %v8091_v25 = vcombine.high %v423_v14, %v427_v17  ;;  %v8098_v38 = vcombine.low %v431_v23, %v435_v26  ;;  %v542_v17 = vld [vmem:[#allocation5 + $0xc40] sm:$0xff]  ;;  %v483_v21 = vld [vmem:[#allocation5 + $0xa68] sm:$0xff] }
 0x138   :  { %4770 = vmatprep.subr.bf16.mxu1 %v8043_v30  ;;  %v502_v30 = vld [vmem:[#allocation5 + $0xb00] sm:$0xff] }
 0x139   :  { %4550 = vmatpush1.bf16.msra.mxu0 %v8104_v33  ;;  %v439_v33 = vld [vmem:[#allocation5 + $0x908] sm:$0xff]  ;;  %v8169_v40 = vcombine.high %v502_v30, %v506_v32  ;;  %v8168_v44 = vcombine.low %v502_v30, %v506_v32 }
 0x13a   :  { %4551 = vmatprep.subr.bf16.mxu0 %v8113_v36  ;;  %v443_v36 = vld [vmem:[#allocation5 + $0x928] sm:$0xff] }
 0x13b   :  { %4771 = vmatpush1.bf16.msra.mxu1 %v8042_v34  ;;  %v8099_v34 = vcombine.high %v431_v23, %v435_v26  ;;  %v8106_v45 = vcombine.low %v439_v33, %v443_v36  ;;  %v9710_v23 = vcombine.high %v9698_v58, %v9698_v58  ;;  %v491_v30 = vld [vmem:[#allocation5 + $0xaa8] sm:$0xff] }
 0x13c   :  { %4772 = vmatprep.subr.bf16.mxu1 %v8051_v41  ;;  %v510_v41 = vld [vmem:[#allocation5 + $0xb40] sm:$0xff] }
 0x13d   :  { %4552 = vmatpush1.bf16.msra.mxu0 %v8112_v42  ;;  %v447_v42 = vld [vmem:[#allocation5 + $0x948] sm:$0xff]  ;;  %v8177_v46 = vcombine.high %v510_v41, %v514_v60  ;;  %v8176_v53 = vcombine.low %v510_v41, %v514_v60 }
 0x13e   :  { %4553 = vmatprep.subr.bf16.mxu0 %v8121_v43  ;;  %v451_v43 = vld [vmem:[#allocation5 + $0x968] sm:$0xff] }
 0x13f   :  { %4773 = vmatpush1.bf16.msra.mxu1 %v8050_v1  ;;  %v8107_v1 = vcombine.high %v439_v33, %v443_v36  ;;  %v8114_v54 = vcombine.low %v447_v42, %v451_v43  ;;  %v499_v41 = vld [vmem:[#allocation5 + $0xae8] sm:$0xff] }
 0x140   :  { %4774 = vmatprep.subr.bf16.mxu1 %v8059_v47  ;;  %v8115_v47 = vcombine.high %v447_v42, %v451_v43 }
 0x141   :  { %4554 = vmatpush1.bf16.msra.mxu0 %v8120_v50  ;;  %v522_v50 = vld [vmem:[#allocation5 + $0xba0] sm:$0xff] }
 0x142   :  { %4555 = vmatprep.subr.bf16.mxu0 %v8129_v52  ;;  %v459_v52 = vld [vmem:[#allocation5 + $0x9a8] sm:$0xff]  ;;  %v8185_v56 = vcombine.high %v518_v49, %v522_v50  ;;  %v8184_v3 = vcombine.low %v518_v49, %v522_v50 }
 0x143   :  { %4775 = vmatpush1.bf16.msra.mxu1 %v8058_v51  ;;  %v455_v51 = vld [vmem:[#allocation5 + $0x988] sm:$0xff] }
 0x144   :  { %4776 = vmatprep.subr.bf16.mxu1 %v8067_v59  ;;  %v8123_v59 = vcombine.high %v455_v51, %v459_v52  ;;  %v8122_v4 = vcombine.low %v455_v51, %v459_v52 }
 0x145   :  { %4556 = vmatpush1.bf16.msra.mxu0 %v8128_v62  ;;  %v530_v62 = vld [vmem:[#allocation5 + $0xbe0] sm:$0xff] }
 0x146   :  { %4557 = vmatprep.subr.bf16.mxu0 %v8137_v2  ;;  %v467_v2 = vld [vmem:[#allocation5 + $0x9e8] sm:$0xff]  ;;  %v8193_v5 = vcombine.high %v526_v61, %v530_v62  ;;  %v8192_v11 = vcombine.low %v526_v61, %v530_v62 }
 0x147   :  { %4777 = vmatpush1.bf16.msra.mxu1 %v8066_v63  ;;  %v463_v63 = vld [vmem:[#allocation5 + $0x9c8] sm:$0xff] }
 0x148   :  { %4787 = vmatprep.subr.bf16.mxu1 %v8075_v6  ;;  %v8131_v6 = vcombine.high %v463_v63, %v467_v2  ;;  %v8130_v13 = vcombine.low %v463_v63, %v467_v2 }
 0x149   :  { %4558 = vmatpush1.bf16.msra.mxu0 %v8136_v8  ;;  %v538_v8 = vld [vmem:[#allocation5 + $0xc20] sm:$0xff] }
 0x14a   :  { %4779 = vmatmul.mubr.bf16.vlgmr.msra.gmra.mrb[4].mxu1 %v9695_v55  ;;  %4559 = vmatprep.subr.bf16.mxu0 %v8145_v10  ;;  %v475_v10 = vld [vmem:[#allocation5 + $0xa28] sm:$0xff]  ;;  %v8201_v14 = vcombine.high %v534_v7, %v538_v8  ;;  %v8200_v22 = vcombine.low %v534_v7, %v538_v8 }
 0x14b   :  { %4788 = vmatpush1.bf16.msra.mxu1 %v8074_v9  ;;  %4819 = vmatprep.mubr.bf16.mxu1 %v9698_v58  ;;  %v471_v9 = vld [vmem:[#allocation5 + $0xa08] sm:$0xff] }
 0x14c   :  { %4789 = vmatprep.subr.bf16.mxu1 %v8083_v15  ;;  %v8139_v15 = vcombine.high %v471_v9, %v475_v10 }
 0x14d   :  { %4560 = vmatpush1.bf16.msra.mxu0 %v8144_v18  ;;  %v546_v18 = vld [vmem:[#allocation5 + $0xc60] sm:$0xff] }
 0x14e   :  { %4561 = vmatprep.subr.bf16.mxu0 %v8153_v20  ;;  %v479_v20 = vld [vmem:[#allocation5 + $0xa48] sm:$0xff]  ;;  %v8209_v26 = vcombine.high %v542_v17, %v546_v18  ;;  %v8208_v32 = vcombine.low %v542_v17, %v546_v18 }
 0x14f   :  { %4790 = vmatpush1.bf16.msra.mxu1 %v8082_v19  ;;  %v9706_v19 = vrot.slane %v9689_v39, %v9651_v57  ;;  %v487_v39 = vld [vmem:[#allocation5 + $0xa88] sm:$0xff]  ;;  %v8146_v33 = vcombine.low %v479_v20, %v483_v21 }
 0x150   :  { %4791 = vmatprep.subr.bf16.mxu1 %v8091_v25  ;;  %v8138_v25 = vcombine.low %v471_v9, %v475_v10  ;;  %v8155_v36 = vcombine.high %v487_v39, %v491_v30  ;;  %v8154_v42 = vcombine.low %v487_v39, %v491_v30 }
 0x151   :  { %4562 = vmatpush1.bf16.msra.mxu0 %v8152_v27  ;;  %v8147_v27 = vcombine.high %v479_v20, %v483_v21 }
 0x152   :  { %4563 = vmatprep.subr.bf16.mxu0 %v8161_v29  ;;  %v554_v29 = vld [vmem:[#allocation5 + $0xca0] sm:$0xff] }
 0x153   :  { %4792 = vmatpush1.bf16.msra.mxu1 %v8090_v28  ;;  %v550_v28 = vld [vmem:[#allocation5 + $0xc80] sm:$0xff] }
 0x154   :  { %4793 = vmatprep.subr.bf16.mxu1 %v8099_v34  ;;  %v8217_v34 = vcombine.high %v550_v28, %v554_v29  ;;  %v8216_v60 = vcombine.low %v550_v28, %v554_v29 }
 0x155   :  { %4564 = vmatpush1.bf16.msra.mxu0 %v8160_v37  ;;  %v558_v37 = vld [vmem:[#allocation5 + $0xcc0] sm:$0xff] }
 0x156   :  { %4565 = vmatprep.subr.bf16.mxu0 %v8169_v40  ;;  %v495_v40 = vld [vmem:[#allocation5 + $0xac8] sm:$0xff] }
 0x157   :  { %4794 = vmatpush1.bf16.msra.mxu1 %v8098_v38  ;;  %v562_v38 = vld [vmem:[#allocation5 + $0xce0] sm:$0xff]  ;;  %v8163_v43 = vcombine.high %v495_v40, %v499_v41  ;;  %v8162_v50 = vcombine.low %v495_v40, %v499_v41 }
 0x158   :  { %4795 = vmatprep.subr.bf16.mxu1 %v8107_v1  ;;  %v8225_v1 = vcombine.high %v558_v37, %v562_v38  ;;  %v8224_v49 = vcombine.low %v558_v37, %v562_v38 }
 0x159   :  { %4566 = vmatpush1.bf16.msra.mxu0 %v8168_v44  ;;  %v566_v44 = vld [vmem:[#allocation5 + $0xd00] sm:$0xff] }
 0x15a   :  { %4567 = vmatprep.subr.bf16.mxu0 %v8177_v46  ;;  %v503_v46 = vld [vmem:[#allocation5 + $0xb08] sm:$0xff] }
 0x15b   :  { %4796 = vmatpush1.bf16.msra.mxu1 %v8106_v45  ;;  %v570_v45 = vld [vmem:[#allocation5 + $0xd20] sm:$0xff] }
 0x15c   :  { %4797 = vmatprep.subr.bf16.mxu1 %v8115_v47  ;;  %v507_v47 = vld [vmem:[#allocation5 + $0xb28] sm:$0xff]  ;;  %v8233_v51 = vcombine.high %v566_v44, %v570_v45  ;;  %v8232_v61 = vcombine.low %v566_v44, %v570_v45 }
 0x15d   :  { %4568 = vmatpush1.bf16.msra.mxu0 %v8176_v53  ;;  %v8171_v52 = vcombine.high %v503_v46, %v507_v47  ;;  %v574_v53 = vld [vmem:[#allocation5 + $0xd40] sm:$0xff]  ;;  %v8170_v62 = vcombine.low %v503_v46, %v507_v47 }
 0x15e   :  { %4569 = vmatprep.subr.bf16.mxu0 %v8185_v56  ;;  %v511_v56 = vld [vmem:[#allocation5 + $0xb48] sm:$0xff] }
 0x15f   :  { %4798 = vmatpush1.bf16.msra.mxu1 %v8114_v54  ;;  %v578_v54 = vld [vmem:[#allocation5 + $0xd60] sm:$0xff] }
 0x160   :  { %4799 = vmatprep.subr.bf16.mxu1 %v8123_v59  ;;  %v515_v59 = vld [vmem:[#allocation5 + $0xb68] sm:$0xff]  ;;  %v8241_v63 = vcombine.high %v574_v53, %v578_v54  ;;  %v8240_v7 = vcombine.low %v574_v53, %v578_v54 }
 0x161   :  { %4570 = vmatpush1.bf16.msra.mxu0 %v8184_v3  ;;  %v8179_v2 = vcombine.high %v511_v56, %v515_v59  ;;  %v582_v3 = vld [vmem:[#allocation5 + $0xd80] sm:$0xff]  ;;  %v8178_v8 = vcombine.low %v511_v56, %v515_v59 }
 0x162   :  { %4571 = vmatprep.subr.bf16.mxu0 %v8193_v5  ;;  %v519_v5 = vld [vmem:[#allocation5 + $0xb88] sm:$0xff] }
 0x163   :  { %4800 = vmatpush1.bf16.msra.mxu1 %v8122_v4  ;;  %v586_v4 = vld [vmem:[#allocation5 + $0xda0] sm:$0xff] }
 0x164   :  { %4801 = vmatprep.subr.bf16.mxu1 %v8131_v6  ;;  %v523_v6 = vld [vmem:[#allocation5 + $0xba8] sm:$0xff]  ;;  %v8249_v9 = vcombine.high %v582_v3, %v586_v4  ;;  %v8248_v17 = vcombine.low %v582_v3, %v586_v4 }
 0x165   :  { %4572 = vmatpush1.bf16.msra.mxu0 %v8192_v11  ;;  %v8187_v10 = vcombine.high %v519_v5, %v523_v6  ;;  %v590_v11 = vld [vmem:[#allocation5 + $0xdc0] sm:$0xff]  ;;  %v8186_v18 = vcombine.low %v519_v5, %v523_v6 }
 0x166   :  { %4582 = vmatprep.subr.bf16.mxu0 %v8201_v14  ;;  %v527_v14 = vld [vmem:[#allocation5 + $0xbc8] sm:$0xff] }
 0x167   :  { %4802 = vmatpush1.bf16.msra.mxu1 %v8130_v13  ;;  %v594_v13 = vld [vmem:[#allocation5 + $0xde0] sm:$0xff] }
 0x168   :  { %4803 = vmatprep.subr.bf16.mxu1 %v8139_v15  ;;  %4574 = vmatmul.mubr.bf16.vlgmr.msra.gmra.mrb[0].mxu0 %v9706_v19  ;;  %v531_v15 = vld [vmem:[#allocation5 + $0xbe8] sm:$0xff]  ;;  %v8257_v20 = vcombine.high %v590_v11, %v594_v13  ;;  %v8256_v28 = vcombine.low %v590_v11, %v594_v13 }
 0x169   :  { %4583 = vmatpush1.bf16.msra.mxu0 %v8200_v22  ;;  %4614 = vmatprep.mubr.bf16.mxu0 %v9710_v23  ;;  %v8195_v21 = vcombine.high %v527_v14, %v531_v15  ;;  %v598_v22 = vld [vmem:[#allocation5 + $0xe00] sm:$0xff]  ;;  %v8194_v29 = vcombine.low %v527_v14, %v531_v15 }
 0x16a   :  { %4584 = vmatprep.subr.bf16.mxu0 %v8209_v26  ;;  %v535_v26 = vld [vmem:[#allocation5 + $0xc08] sm:$0xff] }
 0x16b   :  { %4804 = vmatpush1.bf16.msra.mxu1 %v8138_v25  ;;  %v602_v25 = vld [vmem:[#allocation5 + $0xe20] sm:$0xff] }
 0x16c   :  { %4805 = vmatprep.subr.bf16.mxu1 %v8147_v27  ;;  %v539_v27 = vld [vmem:[#allocation5 + $0xc28] sm:$0xff]  ;;  %v8265_v39 = vcombine.high %v598_v22, %v602_v25  ;;  %v8264_v37 = vcombine.low %v598_v22, %v602_v25 }
 0x16d   :  { %4585 = vmatpush1.bf16.msra.mxu0 %v8208_v32  ;;  %v8203_v30 = vcombine.high %v535_v26, %v539_v27  ;;  %v606_v32 = vld [vmem:[#allocation5 + $0xe40] sm:$0xff]  ;;  %v8202_v38 = vcombine.low %v535_v26, %v539_v27 }
 0x16e   :  { %4586 = vmatprep.subr.bf16.mxu0 %v8217_v34  ;;  %v543_v34 = vld [vmem:[#allocation5 + $0xc48] sm:$0xff] }
 0x16f   :  { %4806 = vmatpush1.bf16.msra.mxu1 %v8146_v33  ;;  %v610_v33 = vld [vmem:[#allocation5 + $0xe60] sm:$0xff] }
 0x170   :  { %4807 = vmatprep.subr.bf16.mxu1 %v8155_v36  ;;  %v547_v36 = vld [vmem:[#allocation5 + $0xc68] sm:$0xff]  ;;  %v8273_v40 = vcombine.high %v606_v32, %v610_v33  ;;  %v8272_v44 = vcombine.low %v606_v32, %v610_v33 }
 0x171   :  { %4587 = vmatpush1.bf16.msra.mxu0 %v8216_v60  ;;  %v8211_v41 = vcombine.high %v543_v34, %v547_v36  ;;  %v614_v60 = vld [vmem:[#allocation5 + $0xe80] sm:$0xff]  ;;  %v8210_v45 = vcombine.low %v543_v34, %v547_v36  ;;  %v595_v32 = vld [vmem:[#allocation5 + $0xde8] sm:$0xff] }
 0x172   :  { %4588 = vmatprep.subr.bf16.mxu0 %v8225_v1  ;;  %v551_v1 = vld [vmem:[#allocation5 + $0xc88] sm:$0xff] }
 0x173   :  { %4808 = vmatpush1.bf16.msra.mxu1 %v8154_v42  ;;  %v618_v42 = vld [vmem:[#allocation5 + $0xea0] sm:$0xff] }
 0x174   :  { %4809 = vmatprep.subr.bf16.mxu1 %v8163_v43  ;;  %v555_v43 = vld [vmem:[#allocation5 + $0xca8] sm:$0xff]  ;;  %v8281_v46 = vcombine.high %v614_v60, %v618_v42  ;;  %v8280_v53 = vcombine.low %v614_v60, %v618_v42  ;;  %v662_v60 = vld [vmem:[#allocation5 + $0x1000] sm:$0xff] }
 0x175   :  { %4589 = vmatpush1.bf16.msra.mxu0 %v8224_v49  ;;  %v8219_v47 = vcombine.high %v551_v1, %v555_v43  ;;  %v622_v49 = vld [vmem:[#allocation5 + $0xec0] sm:$0xff]  ;;  %v8218_v54 = vcombine.low %v551_v1, %v555_v43  ;;  %v599_v1 = vld [vmem:[#allocation5 + $0xe08] sm:$0xff] }
 0x176   :  { %4590 = vmatprep.subr.bf16.mxu0 %v8233_v51  ;;  %v559_v51 = vld [vmem:[#allocation5 + $0xcc8] sm:$0xff]  ;;  %v666_v42 = vld [vmem:[#allocation5 + $0x1020] sm:$0xff] }
 0x177   :  { %4810 = vmatpush1.bf16.msra.mxu1 %v8162_v50  ;;  %v626_v50 = vld [vmem:[#allocation5 + $0xee0] sm:$0xff]  ;;  %v603_v43 = vld [vmem:[#allocation5 + $0xe28] sm:$0xff] }
 0x178   :  { %4811 = vmatprep.subr.bf16.mxu1 %v8171_v52  ;;  %v563_v52 = vld [vmem:[#allocation5 + $0xce8] sm:$0xff]  ;;  %v8289_v56 = vcombine.high %v622_v49, %v626_v50  ;;  %v8288_v3 = vcombine.low %v622_v49, %v626_v50  ;;  %v8329_v49 = vcombine.high %v662_v60, %v666_v42  ;;  %v8267_v50 = vcombine.high %v599_v1, %v603_v43 }
 0x179   :  { %4591 = vmatpush1.bf16.msra.mxu0 %v8232_v61  ;;  %v8227_v59 = vcombine.high %v559_v51, %v563_v52  ;;  %v630_v61 = vld [vmem:[#allocation5 + $0xf00] sm:$0xff]  ;;  %v8226_v4 = vcombine.low %v559_v51, %v563_v52 }
 0x17a   :  { %4592 = vmatprep.subr.bf16.mxu0 %v8241_v63  ;;  %v567_v63 = vld [vmem:[#allocation5 + $0xd08] sm:$0xff]  ;;  %v670_v51 = vld [vmem:[#allocation5 + $0x1040] sm:$0xff] }
 0x17b   :  { %4812 = vmatpush1.bf16.msra.mxu1 %v8170_v62  ;;  %v634_v62 = vld [vmem:[#allocation5 + $0xf20] sm:$0xff] }
 0x17c   :  { %4813 = vmatprep.subr.bf16.mxu1 %v8179_v2  ;;  %v571_v2 = vld [vmem:[#allocation5 + $0xd28] sm:$0xff]  ;;  %v8297_v5 = vcombine.high %v630_v61, %v634_v62  ;;  %v8296_v11 = vcombine.low %v630_v61, %v634_v62  ;;  %v674_v52 = vld [vmem:[#allocation5 + $0x1060] sm:$0xff]  ;;  %v8266_v62 = vcombine.low %v599_v1, %v603_v43 }
 0x17d   :  { %4593 = vmatpush1.bf16.msra.mxu0 %v8240_v7  ;;  %v8235_v6 = vcombine.high %v567_v63, %v571_v2  ;;  %v638_v7 = vld [vmem:[#allocation5 + $0xf40] sm:$0xff]  ;;  %v8234_v13 = vcombine.low %v567_v63, %v571_v2  ;;  %v8337_v63 = vcombine.high %v670_v51, %v674_v52 }
 0x17e   :  { %4594 = vmatprep.subr.bf16.mxu0 %v8249_v9  ;;  %v575_v9 = vld [vmem:[#allocation5 + $0xd48] sm:$0xff]  ;;  %v710_v1 = vld [vmem:[#allocation5 + $0x1180] sm:$0xff] }
 0x17f   :  { %4814 = vmatpush1.bf16.msra.mxu1 %v8178_v8  ;;  %v642_v8 = vld [vmem:[#allocation5 + $0xf60] sm:$0xff] }
 0x180   :  { %4815 = vmatprep.subr.bf16.mxu1 %v8187_v10  ;;  %v579_v10 = vld [vmem:[#allocation5 + $0xd68] sm:$0xff]  ;;  %v8305_v14 = vcombine.high %v638_v7, %v642_v8  ;;  %v8304_v22 = vcombine.low %v638_v7, %v642_v8  ;;  %v8336_v7 = vcombine.low %v670_v51, %v674_v52  ;;  %v714_v43 = vld [vmem:[#allocation5 + $0x11a0] sm:$0xff] }
 0x181   :  { %4595 = vmatpush1.bf16.msra.mxu0 %v8248_v17  ;;  %v8243_v15 = vcombine.high %v575_v9, %v579_v10  ;;  %v646_v17 = vld [vmem:[#allocation5 + $0xf80] sm:$0xff]  ;;  %v8242_v25 = vcombine.low %v575_v9, %v579_v10 }
 0x182   :  { %4596 = vmatprep.subr.bf16.mxu0 %v8257_v20  ;;  %v583_v20 = vld [vmem:[#allocation5 + $0xd88] sm:$0xff]  ;;  %v718_v51 = vld [vmem:[#allocation5 + $0x11c0] sm:$0xff] }
 0x183   :  { %4816 = vmatpush1.bf16.msra.mxu1 %v8186_v18  ;;  %v650_v18 = vld [vmem:[#allocation5 + $0xfa0] sm:$0xff] }
 0x184   :  { %4817 = vmatprep.subr.bf16.mxu1 %v8195_v21  ;;  %v587_v21 = vld [vmem:[#allocation5 + $0xda8] sm:$0xff]  ;;  %v8313_v26 = vcombine.high %v646_v17, %v650_v18  ;;  %v8312_v34 = vcombine.low %v646_v17, %v650_v18  ;;  %v722_v52 = vld [vmem:[#allocation5 + $0x11e0] sm:$0xff] }
 0x185   :  { %4597 = vmatpush1.bf16.msra.mxu0 %v8256_v28  ;;  %v8251_v27 = vcombine.high %v583_v20, %v587_v21  ;;  %v654_v28 = vld [vmem:[#allocation5 + $0xfc0] sm:$0xff] }
 0x186   :  { %4598 = vmatprep.subr.bf16.mxu0 %v8265_v39 }
 0x187   :  { %4818 = vmatpush1.bf16.msra.mxu1 %v8194_v29  ;;  %v658_v29 = vld [vmem:[#allocation5 + $0xfe0] sm:$0xff] }
 0x188   :  { %4828 = vmatprep.subr.bf16.mxu1 %v8203_v30  ;;  %v591_v30 = vld [vmem:[#allocation5 + $0xdc8] sm:$0xff] }
 0x189   :  { %4599 = vmatpush1.bf16.msra.mxu0 %v8264_v37  ;;  %v8250_v37 = vcombine.low %v583_v20, %v587_v21 }
 0x18a   :  { %4820 = vmatmul.mubr.bf16.vlgmr.msra.gmra.mrb[4].mxu1 %v9706_v19  ;;  %4600 = vmatprep.subr.bf16.mxu0 %v8273_v40 }
 0x18b   :  { %4829 = vmatpush1.bf16.msra.mxu1 %v8202_v38  ;;  %4860 = vmatprep.mubr.bf16.mxu1 %v9710_v23  ;;  %v8321_v38 = vcombine.high %v654_v28, %v658_v29 }
 0x18c   :  { %4830 = vmatprep.subr.bf16.mxu1 %v8211_v41  ;;  %v8259_v41 = vcombine.high %v591_v30, %v595_v32 }
 0x18d   :  { %4601 = vmatpush1.bf16.msra.mxu0 %v8272_v44  ;;  %v8320_v44 = vcombine.low %v654_v28, %v658_v29 }
 0x18e   :  { %4602 = vmatprep.subr.bf16.mxu0 %v8281_v46 }
 0x18f   :  { %4831 = vmatpush1.bf16.msra.mxu1 %v8210_v45  ;;  %v9234_v45 = vld.sshfl [vmem:[#allocation2 + $0x8] sm:$0x13 pattern:$0x75316420] }
 0x190   :  { %4832 = vmatprep.subr.bf16.mxu1 %v8219_v47  ;;  %v912_v46 = vcombine.high %v9234_v45, %v9234_v45  ;;  %v8258_v47 = vcombine.low %v591_v30, %v595_v32  ;;  %v651_v45 = vld [vmem:[#allocation5 + $0xfa8] sm:$0xff] }
 0x191   :  { %4603 = vmatpush1.bf16.msra.mxu0 %v8280_v53  ;;  %v9722_v53 = vcombine.high %v9706_v19, %v9706_v19 }
 0x192   :  { %4604 = vmatprep.subr.bf16.mxu0 %v8289_v56  ;;  %v611_v56 = vld [vmem:[#allocation5 + $0xe68] sm:$0xff]  ;;  %v9725_v61 = vrot.slane %v912_v46, %v9651_v57 }
 0x193   :  { %4833 = vmatpush1.bf16.msra.mxu1 %v8218_v54  ;;  %v607_v54 = vld [vmem:[#allocation5 + $0xe48] sm:$0xff] }
 0x194   :  { %4834 = vmatprep.subr.bf16.mxu1 %v8227_v59  ;;  %v8328_v59 = vcombine.low %v662_v60, %v666_v42  ;;  %v8275_v2 = vcombine.high %v607_v54, %v611_v56  ;;  %v8274_v8 = vcombine.low %v607_v54, %v611_v56  ;;  %v655_v54 = vld [vmem:[#allocation5 + $0xfc8] sm:$0xff] }
 0x195   :  { %4605 = vmatpush1.bf16.msra.mxu0 %v8288_v3  ;;  %v678_v3 = vld [vmem:[#allocation5 + $0x1080] sm:$0xff]  ;;  %v659_v56 = vld [vmem:[#allocation5 + $0xfe8] sm:$0xff] }
 0x196   :  { %4606 = vmatprep.subr.bf16.mxu0 %v8297_v5  ;;  %v615_v5 = vld [vmem:[#allocation5 + $0xe88] sm:$0xff] }
 0x197   :  { %4835 = vmatpush1.bf16.msra.mxu1 %v8226_v4  ;;  %v682_v4 = vld [vmem:[#allocation5 + $0x10a0] sm:$0xff] }
 0x198   :  { %4836 = vmatprep.subr.bf16.mxu1 %v8235_v6  ;;  %v619_v6 = vld [vmem:[#allocation5 + $0xea8] sm:$0xff]  ;;  %v8345_v9 = vcombine.high %v678_v3, %v682_v4  ;;  %v8344_v17 = vcombine.low %v678_v3, %v682_v4  ;;  %v726_v3 = vld [vmem:[#allocation5 + $0x1200] sm:$0xff] }
 0x199   :  { %4607 = vmatpush1.bf16.msra.mxu0 %v8296_v11  ;;  %v8283_v10 = vcombine.high %v615_v5, %v619_v6  ;;  %v686_v11 = vld [vmem:[#allocation5 + $0x10c0] sm:$0xff]  ;;  %v8282_v18 = vcombine.low %v615_v5, %v619_v6  ;;  %v663_v5 = vld [vmem:[#allocation5 + $0x1008] sm:$0xff] }
 0x19a   :  { %4608 = vmatprep.subr.bf16.mxu0 %v8305_v14  ;;  %v623_v14 = vld [vmem:[#allocation5 + $0xec8] sm:$0xff]  ;;  %v730_v4 = vld [vmem:[#allocation5 + $0x1220] sm:$0xff] }
 0x19b   :  { %4837 = vmatpush1.bf16.msra.mxu1 %v8234_v13  ;;  %v690_v13 = vld [vmem:[#allocation5 + $0x10e0] sm:$0xff]  ;;  %v667_v6 = vld [vmem:[#allocation5 + $0x1028] sm:$0xff] }
 0x19c   :  { %4838 = vmatprep.subr.bf16.mxu1 %v8243_v15  ;;  %v627_v15 = vld [vmem:[#allocation5 + $0xee8] sm:$0xff]  ;;  %v8353_v20 = vcombine.high %v686_v11, %v690_v13  ;;  %v8352_v28 = vcombine.low %v686_v11, %v690_v13  ;;  %v734_v11 = vld [vmem:[#allocation5 + $0x1240] sm:$0xff] }
 0x19d   :  { %v9716_v39 = vpop.f32.mrb[0].mxu1  ;;  %4609 = vmatpush1.bf16.msra.mxu0 %v8304_v22  ;;  %v8291_v21 = vcombine.high %v623_v14, %v627_v15  ;;  %v694_v22 = vld [vmem:[#allocation5 + $0x1100] sm:$0xff]  ;;  %v8290_v29 = vcombine.low %v623_v14, %v627_v15  ;;  %v671_v14 = vld [vmem:[#allocation5 + $0x1048] sm:$0xff] }
 0x19e   :  { %v9718_v33 = vpop.f32.mrb[1].mxu1  ;;  %4610 = vmatprep.subr.bf16.mxu0 %v8313_v26  ;;  %v631_v26 = vld [vmem:[#allocation5 + $0xf08] sm:$0xff]  ;;  %v738_v13 = vld [vmem:[#allocation5 + $0x1260] sm:$0xff] }
 0x19f   :  { %v4702_v36 = vpop.f32.mrb[2].mxu1  ;;  %4839 = vmatpush1.bf16.msra.mxu1 %v8242_v25  ;;  %v698_v25 = vld [vmem:[#allocation5 + $0x1120] sm:$0xff]  ;;  %v675_v15 = vld [vmem:[#allocation5 + $0x1068] sm:$0xff] }
 0x1a0   :  { %v4703_v40 = vpop.f32.mrb[3].mxu1  ;;  %4840 = vmatprep.subr.bf16.mxu1 %v8251_v27  ;;  %v635_v27 = vld [vmem:[#allocation5 + $0xf28] sm:$0xff]  ;;  %v8361_v30 = vcombine.high %v694_v22, %v698_v25  ;;  %v706_v36 = vld [vmem:[#allocation5 + $0x1160] sm:$0xff] }
 0x1a1   :  { %4611 = vmatpush1.bf16.msra.mxu0 %v8312_v34  ;;  %v8299_v32 = vcombine.high %v631_v26, %v635_v27  ;;  %v702_v34 = vld [vmem:[#allocation5 + $0x1140] sm:$0xff]  ;;  %v8360_v40 = vcombine.low %v694_v22, %v698_v25 }
 0x1a2   :  { %4612 = vmatprep.subr.bf16.mxu0 %v8321_v38  ;;  %v643_v38 = vld [vmem:[#allocation5 + $0xf68] sm:$0xff]  ;;  %v8369_v60 = vcombine.high %v702_v34, %v706_v36  ;;  %v8368_v46 = vcombine.low %v702_v34, %v706_v36  ;;  %v742_v22 = vld [vmem:[#allocation5 + $0x1280] sm:$0xff] }
 0x1a3   :  { %4841 = vmatpush1.bf16.msra.mxu1 %v8250_v37  ;;  %v639_v37 = vld [vmem:[#allocation5 + $0xf48] sm:$0xff]  ;;  %v746_v25 = vld [vmem:[#allocation5 + $0x12a0] sm:$0xff] }
 0x1a4   :  { %4842 = vmatprep.subr.bf16.mxu1 %v8259_v41  ;;  %v8298_v41 = vcombine.low %v631_v26, %v635_v27  ;;  %v8307_v42 = vcombine.high %v639_v37, %v643_v38  ;;  %v679_v26 = vld [vmem:[#allocation5 + $0x1088] sm:$0xff]  ;;  %v750_v34 = vld [vmem:[#allocation5 + $0x12c0] sm:$0xff] }
 0x1a5   :  { %4613 = vmatpush1.bf16.msra.mxu0 %v8320_v44  ;;  %v647_v44 = vld [vmem:[#allocation5 + $0xf88] sm:$0xff]  ;;  %v754_v36 = vld [vmem:[#allocation5 + $0x12e0] sm:$0xff] }
 0x1a6   :  { %4623 = vmatprep.subr.bf16.mxu0 %v8329_v49  ;;  %v8377_v49 = vcombine.high %v710_v1, %v714_v43  ;;  %v683_v27 = vld [vmem:[#allocation5 + $0x10a8] sm:$0xff] }
 0x1a7   :  { %4843 = vmatpush1.bf16.msra.mxu1 %v8258_v47  ;;  %v8306_v47 = vcombine.low %v639_v37, %v643_v38  ;;  %v687_v37 = vld [vmem:[#allocation5 + $0x10c8] sm:$0xff] }
 0x1a8   :  { %4844 = vmatprep.subr.bf16.mxu1 %v8267_v50  ;;  %4615 = vmatmul.mubr.bf16.vlgmr.msra.gmra.mrb[0].mxu0 %v9722_v53  ;;  %v8315_v50 = vcombine.high %v647_v44, %v651_v45  ;;  %v691_v38 = vld [vmem:[#allocation5 + $0x10e8] sm:$0xff] }
 0x1a9   :  { %4624 = vmatpush1.bf16.msra.mxu0 %v8328_v59  ;;  %4655 = vmatprep.mubr.bf16.mxu0 %v9725_v61  ;;  %v8376_v59 = vcombine.low %v710_v1, %v714_v43  ;;  %v758_v1 = vld [vmem:[#allocation5 + $0x1300] sm:$0xff] }
 0x1aa   :  { %4625 = vmatprep.subr.bf16.mxu0 %v8337_v63  ;;  %v8385_v63 = vcombine.high %v718_v51, %v722_v52  ;;  %v762_v43 = vld [vmem:[#allocation5 + $0x1320] sm:$0xff] }
 0x1ab   :  { %4845 = vmatpush1.bf16.msra.mxu1 %v8266_v62  ;;  %v8314_v62 = vcombine.low %v647_v44, %v651_v45  ;;  %v695_v44 = vld [vmem:[#allocation5 + $0x1108] sm:$0xff] }
 0x1ac   :  { %4846 = vmatprep.subr.bf16.mxu1 %v8275_v2  ;;  %v8323_v2 = vcombine.high %v655_v54, %v659_v56  ;;  %v699_v45 = vld [vmem:[#allocation5 + $0x1128] sm:$0xff] }
 0x1ad   :  { %4626 = vmatpush1.bf16.msra.mxu0 %v8336_v7  ;;  %v8384_v7 = vcombine.low %v718_v51, %v722_v52  ;;  %v766_v51 = vld [vmem:[#allocation5 + $0x1340] sm:$0xff] }
 0x1ae   :  { %4627 = vmatprep.subr.bf16.mxu0 %v8345_v9  ;;  %v8393_v9 = vcombine.high %v726_v3, %v730_v4  ;;  %v770_v52 = vld [vmem:[#allocation5 + $0x1360] sm:$0xff] }
 0x1af   :  { %4847 = vmatpush1.bf16.msra.mxu1 %v8274_v8  ;;  %v8322_v8 = vcombine.low %v655_v54, %v659_v56  ;;  %v703_v54 = vld [vmem:[#allocation5 + $0x1148] sm:$0xff] }
 0x1b0   :  { %4848 = vmatprep.subr.bf16.mxu1 %v8283_v10  ;;  %v8331_v10 = vcombine.high %v663_v5, %v667_v6  ;;  %v707_v56 = vld [vmem:[#allocation5 + $0x1168] sm:$0xff] }
 0x1b1   :  { %4628 = vmatpush1.bf16.msra.mxu0 %v8344_v17  ;;  %v8392_v17 = vcombine.low %v726_v3, %v730_v4  ;;  %v774_v3 = vld [vmem:[#allocation5 + $0x1380] sm:$0xff] }
 0x1b2   :  { %4629 = vmatprep.subr.bf16.mxu0 %v8353_v20  ;;  %v8401_v20 = vcombine.high %v734_v11, %v738_v13  ;;  %v778_v4 = vld [vmem:[#allocation5 + $0x13a0] sm:$0xff] }
 0x1b3   :  { %4849 = vmatpush1.bf16.msra.mxu1 %v8282_v18  ;;  %v8330_v18 = vcombine.low %v663_v5, %v667_v6  ;;  %v711_v5 = vld [vmem:[#allocation5 + $0x1188] sm:$0xff] }
 0x1b4   :  { %4850 = vmatprep.subr.bf16.mxu1 %v8291_v21  ;;  %v8339_v21 = vcombine.high %v671_v14, %v675_v15  ;;  %v715_v6 = vld [vmem:[#allocation5 + $0x11a8] sm:$0xff] }
 0x1b5   :  { %4630 = vmatpush1.bf16.msra.mxu0 %v8352_v28  ;;  %v8400_v28 = vcombine.low %v734_v11, %v738_v13  ;;  %v782_v11 = vld [vmem:[#allocation5 + $0x13c0] sm:$0xff] }
 0x1b6   :  { %4631 = vmatprep.subr.bf16.mxu0 %v8361_v30  ;;  %v8409_v30 = vcombine.high %v742_v22, %v746_v25  ;;  %v786_v13 = vld [vmem:[#allocation5 + $0x13e0] sm:$0xff] }
 0x1b7   :  { %4851 = vmatpush1.bf16.msra.mxu1 %v8290_v29  ;;  %v8338_v29 = vcombine.low %v671_v14, %v675_v15  ;;  %v719_v14 = vld [vmem:[#allocation5 + $0x11c8] sm:$0xff] }
 0x1b8   :  { %4852 = vmatprep.subr.bf16.mxu1 %v8299_v32  ;;  %v8347_v32 = vcombine.high %v679_v26, %v683_v27  ;;  %v723_v15 = vld [vmem:[#allocation5 + $0x11e8] sm:$0xff] }
 0x1b9   :  { %4632 = vmatpush1.bf16.msra.mxu0 %v8360_v40  ;;  %v8408_v40 = vcombine.low %v742_v22, %v746_v25  ;;  %v152_v22 = vld [vmem:[#allocation5 + $0x10] sm:$0xff] }
 0x1ba   :  { %4633 = vmatprep.subr.bf16.mxu0 %v8369_v60  ;;  %v8417_v60 = vcombine.high %v750_v34, %v754_v36  ;;  %v156_v25 = vld [vmem:[#allocation5 + $0x30] sm:$0xff] }
 0x1bb   :  { %4853 = vmatpush1.bf16.msra.mxu1 %v8298_v41  ;;  %v8346_v41 = vcombine.low %v679_v26, %v683_v27  ;;  %v727_v26 = vld [vmem:[#allocation5 + $0x1208] sm:$0xff] }
 0x1bc   :  { %4854 = vmatprep.subr.bf16.mxu1 %v8307_v42  ;;  %v8355_v42 = vcombine.high %v687_v37, %v691_v38  ;;  %v731_v27 = vld [vmem:[#allocation5 + $0x1228] sm:$0xff] }
 0x1bd   :  { %4634 = vmatpush1.bf16.msra.mxu0 %v8368_v46  ;;  %v8416_v46 = vcombine.low %v750_v34, %v754_v36  ;;  %v160_v34 = vld [vmem:[#allocation5 + $0x50] sm:$0xff] }
 0x1be   :  { %4635 = vmatprep.subr.bf16.mxu0 %v8377_v49  ;;  %v8425_v49 = vcombine.high %v758_v1, %v762_v43  ;;  %v164_v36 = vld [vmem:[#allocation5 + $0x70] sm:$0xff] }
 0x1bf   :  { %4855 = vmatpush1.bf16.msra.mxu1 %v8306_v47  ;;  %v8354_v47 = vcombine.low %v687_v37, %v691_v38  ;;  %v735_v37 = vld [vmem:[#allocation5 + $0x1248] sm:$0xff] }
 0x1c0   :  { %4856 = vmatprep.subr.bf16.mxu1 %v8315_v50  ;;  %v8363_v50 = vcombine.high %v695_v44, %v699_v45  ;;  %v739_v38 = vld [vmem:[#allocation5 + $0x1268] sm:$0xff] }
 0x1c1   :  { %4636 = vmatpush1.bf16.msra.mxu0 %v8376_v59  ;;  %v8424_v59 = vcombine.low %v758_v1, %v762_v43  ;;  %v168_v1 = vld [vmem:[#allocation5 + $0x90] sm:$0xff] }
 0x1c2   :  { %4637 = vmatprep.subr.bf16.mxu0 %v8385_v63  ;;  %v8433_v63 = vcombine.high %v766_v51, %v770_v52  ;;  %v172_v43 = vld [vmem:[#allocation5 + $0xb0] sm:$0xff] }
 0x1c3   :  { %4857 = vmatpush1.bf16.msra.mxu1 %v8314_v62  ;;  %v8362_v62 = vcombine.low %v695_v44, %v699_v45  ;;  %v743_v44 = vld [vmem:[#allocation5 + $0x1288] sm:$0xff] }
 0x1c4   :  { %4858 = vmatprep.subr.bf16.mxu1 %v8323_v2  ;;  %v8371_v2 = vcombine.high %v703_v54, %v707_v56  ;;  %v747_v45 = vld [vmem:[#allocation5 + $0x12a8] sm:$0xff] }
 0x1c5   :  { %4638 = vmatpush1.bf16.msra.mxu0 %v8384_v7  ;;  %v8432_v7 = vcombine.low %v766_v51, %v770_v52  ;;  %v176_v51 = vld [vmem:[#allocation5 + $0xd0] sm:$0xff] }
 0x1c6   :  { %4639 = vmatprep.subr.bf16.mxu0 %v8393_v9  ;;  %v8441_v9 = vcombine.high %v774_v3, %v778_v4  ;;  %v180_v52 = vld [vmem:[#allocation5 + $0xf0] sm:$0xff] }
 0x1c7   :  { %4859 = vmatpush1.bf16.msra.mxu1 %v8322_v8  ;;  %v8370_v8 = vcombine.low %v703_v54, %v707_v56  ;;  %v751_v54 = vld [vmem:[#allocation5 + $0x12c8] sm:$0xff] }
 0x1c8   :  { %4869 = vmatprep.subr.bf16.mxu1 %v8331_v10  ;;  %v8379_v10 = vcombine.high %v711_v5, %v715_v6  ;;  %v755_v56 = vld [vmem:[#allocation5 + $0x12e8] sm:$0xff] }
 0x1c9   :  { %4640 = vmatpush1.bf16.msra.mxu0 %v8392_v17  ;;  %v8440_v17 = vcombine.low %v774_v3, %v778_v4  ;;  %v184_v3 = vld [vmem:[#allocation5 + $0x110] sm:$0xff] }
 0x1ca   :  { %4861 = vmatmul.mubr.bf16.vlgmr.msra.gmra.mrb[4].mxu1 %v9722_v53  ;;  %4641 = vmatprep.subr.bf16.mxu0 %v8401_v20  ;;  %v8449_v20 = vcombine.high %v782_v11, %v786_v13  ;;  %v188_v4 = vld [vmem:[#allocation5 + $0x130] sm:$0xff] }
 0x1cb   :  { %4870 = vmatpush1.bf16.msra.mxu1 %v8330_v18  ;;  %4901 = vmatprep.mubr.bf16.mxu1 %v9725_v61  ;;  %v8378_v18 = vcombine.low %v711_v5, %v715_v6  ;;  %v759_v5 = vld [vmem:[#allocation5 + $0x1308] sm:$0xff] }
 0x1cc   :  { %4871 = vmatprep.subr.bf16.mxu1 %v8339_v21  ;;  %v8387_v21 = vcombine.high %v719_v14, %v723_v15  ;;  %v763_v6 = vld [vmem:[#allocation5 + $0x1328] sm:$0xff] }
 0x1cd   :  { %4642 = vmatpush1.bf16.msra.mxu0 %v8400_v28  ;;  %v8448_v28 = vcombine.low %v782_v11, %v786_v13  ;;  %v192_v11 = vld [vmem:[#allocation5 + $0x150] sm:$0xff] }
 0x1ce   :  { %4643 = vmatprep.subr.bf16.mxu0 %v8409_v30  ;;  %v7821_v30 = vcombine.high %v152_v22, %v156_v25  ;;  %v196_v13 = vld [vmem:[#allocation5 + $0x170] sm:$0xff] }
 0x1cf   :  { %4872 = vmatpush1.bf16.msra.mxu1 %v8338_v29  ;;  %v8386_v29 = vcombine.low %v719_v14, %v723_v15  ;;  %v767_v14 = vld [vmem:[#allocation5 + $0x1348] sm:$0xff] }
 0x1d0   :  { %4873 = vmatprep.subr.bf16.mxu1 %v8347_v32  ;;  %v8395_v32 = vcombine.high %v727_v26, %v731_v27  ;;  %v771_v15 = vld [vmem:[#allocation5 + $0x1368] sm:$0xff] }
 0x1d1   :  { %4644 = vmatpush1.bf16.msra.mxu0 %v8408_v40  ;;  %v7820_v40 = vcombine.low %v152_v22, %v156_v25  ;;  %v200_v22 = vld [vmem:[#allocation5 + $0x190] sm:$0xff] }
 0x1d2   :  { %4645 = vmatprep.subr.bf16.mxu0 %v8417_v60  ;;  %v7829_v60 = vcombine.high %v160_v34, %v164_v36  ;;  %v204_v25 = vld [vmem:[#allocation5 + $0x1b0] sm:$0xff] }
 0x1d3   :  { %4874 = vmatpush1.bf16.msra.mxu1 %v8346_v41  ;;  %v8394_v41 = vcombine.low %v727_v26, %v731_v27  ;;  %v775_v26 = vld [vmem:[#allocation5 + $0x1388] sm:$0xff] }
 0x1d4   :  { %4875 = vmatprep.subr.bf16.mxu1 %v8355_v42  ;;  %v8403_v42 = vcombine.high %v735_v37, %v739_v38  ;;  %v779_v27 = vld [vmem:[#allocation5 + $0x13a8] sm:$0xff] }
 0x1d5   :  { %4646 = vmatpush1.bf16.msra.mxu0 %v8416_v46  ;;  %v7828_v46 = vcombine.low %v160_v34, %v164_v36  ;;  %v208_v34 = vld [vmem:[#allocation5 + $0x1d0] sm:$0xff] }
 0x1d6   :  { %4647 = vmatprep.subr.bf16.mxu0 %v8425_v49  ;;  %v7837_v49 = vcombine.high %v168_v1, %v172_v43  ;;  %v212_v36 = vld [vmem:[#allocation5 + $0x1f0] sm:$0xff] }
 0x1d7   :  { %4876 = vmatpush1.bf16.msra.mxu1 %v8354_v47  ;;  %v8402_v47 = vcombine.low %v735_v37, %v739_v38  ;;  %v783_v37 = vld [vmem:[#allocation5 + $0x13c8] sm:$0xff] }
 0x1d8   :  { %4877 = vmatprep.subr.bf16.mxu1 %v8363_v50  ;;  %v8411_v50 = vcombine.high %v743_v44, %v747_v45  ;;  %v787_v38 = vld [vmem:[#allocation5 + $0x13e8] sm:$0xff] }
 0x1d9   :  { %4648 = vmatpush1.bf16.msra.mxu0 %v8424_v59  ;;  %v7836_v59 = vcombine.low %v168_v1, %v172_v43  ;;  %v216_v1 = vld [vmem:[#allocation5 + $0x210] sm:$0xff] }
 0x1da   :  { %4649 = vmatprep.subr.bf16.mxu0 %v8433_v63  ;;  %v7845_v63 = vcombine.high %v176_v51, %v180_v52  ;;  %v220_v43 = vld [vmem:[#allocation5 + $0x230] sm:$0xff] }
 0x1db   :  { %4878 = vmatpush1.bf16.msra.mxu1 %v8362_v62  ;;  %v8410_v62 = vcombine.low %v743_v44, %v747_v45  ;;  %v791_v44 = vld [vmem:[#allocation5 + $0x1408] sm:$0xff] }
 0x1dc   :  { %4879 = vmatprep.subr.bf16.mxu1 %v8371_v2  ;;  %v8419_v2 = vcombine.high %v751_v54, %v755_v56  ;;  %v795_v45 = vld [vmem:[#allocation5 + $0x1428] sm:$0xff] }
 0x1dd   :  { %4650 = vmatpush1.bf16.msra.mxu0 %v8432_v7  ;;  %v7844_v7 = vcombine.low %v176_v51, %v180_v52  ;;  %v224_v51 = vld [vmem:[#allocation5 + $0x250] sm:$0xff] }
 0x1de   :  { %4651 = vmatprep.subr.bf16.mxu0 %v8441_v9  ;;  %v7853_v9 = vcombine.high %v184_v3, %v188_v4  ;;  %v228_v52 = vld [vmem:[#allocation5 + $0x270] sm:$0xff] }
 0x1df   :  { %4880 = vmatpush1.bf16.msra.mxu1 %v8370_v8  ;;  %v8418_v8 = vcombine.low %v751_v54, %v755_v56  ;;  %v799_v54 = vld [vmem:[#allocation5 + $0x1448] sm:$0xff] }
 0x1e0   :  { %4881 = vmatprep.subr.bf16.mxu1 %v8379_v10  ;;  %v8427_v10 = vcombine.high %v759_v5, %v763_v6  ;;  %v803_v56 = vld [vmem:[#allocation5 + $0x1468] sm:$0xff] }
 0x1e1   :  { %4652 = vmatpush1.bf16.msra.mxu0 %v8440_v17  ;;  %v7852_v17 = vcombine.low %v184_v3, %v188_v4  ;;  %v232_v3 = vld [vmem:[#allocation5 + $0x290] sm:$0xff] }
 0x1e2   :  { %4653 = vmatprep.subr.bf16.mxu0 %v8449_v20  ;;  %v7861_v20 = vcombine.high %v192_v11, %v196_v13  ;;  %v236_v4 = vld [vmem:[#allocation5 + $0x2b0] sm:$0xff] }
 0x1e3   :  { %4882 = vmatpush1.bf16.msra.mxu1 %v8378_v18  ;;  %v8426_v18 = vcombine.low %v759_v5, %v763_v6  ;;  %v807_v5 = vld [vmem:[#allocation5 + $0x1488] sm:$0xff] }
 0x1e4   :  { %4883 = vmatprep.subr.bf16.mxu1 %v8387_v21  ;;  %v8435_v21 = vcombine.high %v767_v14, %v771_v15  ;;  %v811_v6 = vld [vmem:[#allocation5 + $0x14a8] sm:$0xff] }
 0x1e5   :  { %4654 = vmatpush1.bf16.msra.mxu0 %v8448_v28  ;;  %v7860_v28 = vcombine.low %v192_v11, %v196_v13  ;;  %v240_v11 = vld [vmem:[#allocation5 + $0x2d0] sm:$0xff] }
 0x1e6   :  { %4951 = vmatprep.subr.bf16.mxu0 %v7821_v30  ;;  %v7869_v30 = vcombine.high %v200_v22, %v204_v25  ;;  %v244_v13 = vld [vmem:[#allocation5 + $0x2f0] sm:$0xff] }
 0x1e7   :  { %4884 = vmatpush1.bf16.msra.mxu1 %v8386_v29  ;;  %v8434_v29 = vcombine.low %v767_v14, %v771_v15  ;;  %v815_v14 = vld [vmem:[#allocation5 + $0x14c8] sm:$0xff] }
 0x1e8   :  { %4885 = vmatprep.subr.bf16.mxu1 %v8395_v32  ;;  %4656 = vmatmul.mubr.bf16.vlgmr.msra.gmra.mrb[0].mxu0 %v9665_v16  ;;  %v8443_v32 = vcombine.high %v775_v26, %v779_v27  ;;  %v819_v15 = vld [vmem:[#allocation5 + $0x14e8] sm:$0xff] }
 0x1e9   :  { %4952 = vmatpush1.bf16.msra.mxu0 %v7820_v40  ;;  %4983 = vmatprep.mubr.bf16.mxu0 %v9662_v12  ;;  %v7868_v40 = vcombine.low %v200_v22, %v204_v25  ;;  %v248_v22 = vld [vmem:[#allocation5 + $0x310] sm:$0xff] }
 0x1ea   :  { %4953 = vmatprep.subr.bf16.mxu0 %v7829_v60  ;;  %v7877_v60 = vcombine.high %v208_v34, %v212_v36  ;;  %v252_v25 = vld [vmem:[#allocation5 + $0x330] sm:$0xff] }
 0x1eb   :  { %4886 = vmatpush1.bf16.msra.mxu1 %v8394_v41  ;;  %v8442_v41 = vcombine.low %v775_v26, %v779_v27  ;;  %v823_v26 = vld [vmem:[#allocation5 + $0x1508] sm:$0xff] }
 0x1ec   :  { %4887 = vmatprep.subr.bf16.mxu1 %v8403_v42  ;;  %v8451_v42 = vcombine.high %v783_v37, %v787_v38  ;;  %v827_v27 = vld [vmem:[#allocation5 + $0x1528] sm:$0xff] }
 0x1ed   :  { %4954 = vmatpush1.bf16.msra.mxu0 %v7828_v46  ;;  %v7876_v46 = vcombine.low %v208_v34, %v212_v36  ;;  %v256_v34 = vld [vmem:[#allocation5 + $0x350] sm:$0xff] }
 0x1ee   :  { %4955 = vmatprep.subr.bf16.mxu0 %v7837_v49  ;;  %v7885_v49 = vcombine.high %v216_v1, %v220_v43  ;;  %v260_v36 = vld [vmem:[#allocation5 + $0x370] sm:$0xff] }
 0x1ef   :  { %4888 = vmatpush1.bf16.msra.mxu1 %v8402_v47  ;;  %v8450_v47 = vcombine.low %v783_v37, %v787_v38  ;;  %v831_v37 = vld [vmem:[#allocation5 + $0x1548] sm:$0xff] }
 0x1f0   :  { %4889 = vmatprep.subr.bf16.mxu1 %v8411_v50  ;;  %v8459_v50 = vcombine.high %v791_v44, %v795_v45  ;;  %v835_v38 = vld [vmem:[#allocation5 + $0x1568] sm:$0xff] }
 0x1f1   :  { %4956 = vmatpush1.bf16.msra.mxu0 %v7836_v59  ;;  %v7884_v59 = vcombine.low %v216_v1, %v220_v43  ;;  %v264_v1 = vld [vmem:[#allocation5 + $0x390] sm:$0xff] }
 0x1f2   :  { %4957 = vmatprep.subr.bf16.mxu0 %v7845_v63  ;;  %v7893_v63 = vcombine.high %v224_v51, %v228_v52  ;;  %v268_v43 = vld [vmem:[#allocation5 + $0x3b0] sm:$0xff] }
 0x1f3   :  { %4890 = vmatpush1.bf16.msra.mxu1 %v8410_v62  ;;  %v8458_v62 = vcombine.low %v791_v44, %v795_v45  ;;  %v839_v44 = vld [vmem:[#allocation5 + $0x1588] sm:$0xff] }
 0x1f4   :  { %4891 = vmatprep.subr.bf16.mxu1 %v8419_v2  ;;  %v8467_v2 = vcombine.high %v799_v54, %v803_v56  ;;  %v843_v45 = vld [vmem:[#allocation5 + $0x15a8] sm:$0xff] }
 0x1f5   :  { %4958 = vmatpush1.bf16.msra.mxu0 %v7844_v7  ;;  %v7892_v7 = vcombine.low %v224_v51, %v228_v52  ;;  %v272_v51 = vld [vmem:[#allocation5 + $0x3d0] sm:$0xff] }
 0x1f6   :  { %4959 = vmatprep.subr.bf16.mxu0 %v7853_v9  ;;  %v7901_v9 = vcombine.high %v232_v3, %v236_v4  ;;  %v276_v52 = vld [vmem:[#allocation5 + $0x3f0] sm:$0xff] }
 0x1f7   :  { %4892 = vmatpush1.bf16.msra.mxu1 %v8418_v8  ;;  %v8466_v8 = vcombine.low %v799_v54, %v803_v56  ;;  %v847_v54 = vld [vmem:[#allocation5 + $0x15c8] sm:$0xff] }
 0x1f8   :  { %4893 = vmatprep.subr.bf16.mxu1 %v8427_v10  ;;  %v8475_v10 = vcombine.high %v807_v5, %v811_v6  ;;  %v851_v56 = vld [vmem:[#allocation5 + $0x15e8] sm:$0xff] }
 0x1f9   :  { %4960 = vmatpush1.bf16.msra.mxu0 %v7852_v17  ;;  %v7900_v17 = vcombine.low %v232_v3, %v236_v4  ;;  %v280_v3 = vld [vmem:[#allocation5 + $0x410] sm:$0xff] }
 0x1fa   :  { %4961 = vmatprep.subr.bf16.mxu0 %v7861_v20  ;;  %v7909_v20 = vcombine.high %v240_v11, %v244_v13  ;;  %v284_v4 = vld [vmem:[#allocation5 + $0x430] sm:$0xff] }
 0x1fb   :  { %4894 = vmatpush1.bf16.msra.mxu1 %v8426_v18  ;;  %v8474_v18 = vcombine.low %v807_v5, %v811_v6  ;;  %v153_v5 = vld [vmem:[#allocation5 + $0x18] sm:$0xff] }
 0x1fc   :  { %4895 = vmatprep.subr.bf16.mxu1 %v8435_v21  ;;  %v8483_v21 = vcombine.high %v815_v14, %v819_v15  ;;  %v157_v6 = vld [vmem:[#allocation5 + $0x38] sm:$0xff] }
 0x1fd   :  { %4962 = vmatpush1.bf16.msra.mxu0 %v7860_v28  ;;  %v7908_v28 = vcombine.low %v240_v11, %v244_v13  ;;  %v288_v11 = vld [vmem:[#allocation5 + $0x450] sm:$0xff] }
 0x1fe   :  { %4963 = vmatprep.subr.bf16.mxu0 %v7869_v30  ;;  %v7917_v30 = vcombine.high %v248_v22, %v252_v25  ;;  %v292_v13 = vld [vmem:[#allocation5 + $0x470] sm:$0xff] }
 0x1ff   :  { %4896 = vmatpush1.bf16.msra.mxu1 %v8434_v29  ;;  %v8482_v29 = vcombine.low %v815_v14, %v819_v15  ;;  %v161_v14 = vld [vmem:[#allocation5 + $0x58] sm:$0xff] }
 0x200   :  { %4897 = vmatprep.subr.bf16.mxu1 %v8443_v32  ;;  %v8491_v32 = vcombine.high %v823_v26, %v827_v27  ;;  %v165_v15 = vld [vmem:[#allocation5 + $0x78] sm:$0xff] }
 0x201   :  { %4964 = vmatpush1.bf16.msra.mxu0 %v7868_v40  ;;  %v7916_v40 = vcombine.low %v248_v22, %v252_v25  ;;  %v296_v22 = vld [vmem:[#allocation5 + $0x490] sm:$0xff] }
 0x202   :  { %4965 = vmatprep.subr.bf16.mxu0 %v7877_v60  ;;  %v7925_v60 = vcombine.high %v256_v34, %v260_v36  ;;  %v300_v25 = vld [vmem:[#allocation5 + $0x4b0] sm:$0xff] }
 0x203   :  { %4898 = vmatpush1.bf16.msra.mxu1 %v8442_v41  ;;  %v8490_v41 = vcombine.low %v823_v26, %v827_v27  ;;  %v169_v26 = vld [vmem:[#allocation5 + $0x98] sm:$0xff] }
 0x204   :  { %4899 = vmatprep.subr.bf16.mxu1 %v8451_v42  ;;  %v8499_v42 = vcombine.high %v831_v37, %v835_v38  ;;  %v173_v27 = vld [vmem:[#allocation5 + $0xb8] sm:$0xff] }
 0x205   :  { %4966 = vmatpush1.bf16.msra.mxu0 %v7876_v46  ;;  %v7924_v46 = vcombine.low %v256_v34, %v260_v36  ;;  %v304_v34 = vld [vmem:[#allocation5 + $0x4d0] sm:$0xff] }
 0x206   :  { %4967 = vmatprep.subr.bf16.mxu0 %v7885_v49  ;;  %v7933_v49 = vcombine.high %v264_v1, %v268_v43  ;;  %v308_v36 = vld [vmem:[#allocation5 + $0x4f0] sm:$0xff] }
 0x207   :  { %4900 = vmatpush1.bf16.msra.mxu1 %v8450_v47  ;;  %v8498_v47 = vcombine.low %v831_v37, %v835_v38  ;;  %v177_v37 = vld [vmem:[#allocation5 + $0xd8] sm:$0xff] }
 0x208   :  { %4910 = vmatprep.subr.bf16.mxu1 %v8459_v50  ;;  %v8507_v50 = vcombine.high %v839_v44, %v843_v45  ;;  %v181_v38 = vld [vmem:[#allocation5 + $0xf8] sm:$0xff] }
 0x209   :  { %4968 = vmatpush1.bf16.msra.mxu0 %v7884_v59  ;;  %v7932_v59 = vcombine.low %v264_v1, %v268_v43  ;;  %v312_v1 = vld [vmem:[#allocation5 + $0x510] sm:$0xff] }
 0x20a   :  { %4902 = vmatmul.mubr.bf16.vlgmr.msra.gmra.mrb[4].mxu1 %v9665_v16  ;;  %4969 = vmatprep.subr.bf16.mxu0 %v7893_v63  ;;  %v7941_v63 = vcombine.high %v272_v51, %v276_v52  ;;  %v316_v43 = vld [vmem:[#allocation5 + $0x530] sm:$0xff] }
 0x20b   :  { %4911 = vmatpush1.bf16.msra.mxu1 %v8458_v62  ;;  %4942 = vmatprep.mubr.bf16.mxu1 %v9484_v0  ;;  %v8506_v62 = vcombine.low %v839_v44, %v843_v45  ;;  %v185_v44 = vld [vmem:[#allocation5 + $0x118] sm:$0xff] }
 0x20c   :  { %4912 = vmatprep.subr.bf16.mxu1 %v8467_v2  ;;  %v8515_v2 = vcombine.high %v847_v54, %v851_v56  ;;  %v189_v45 = vld [vmem:[#allocation5 + $0x138] sm:$0xff] }
 0x20d   :  { %4970 = vmatpush1.bf16.msra.mxu0 %v7892_v7  ;;  %v7940_v7 = vcombine.low %v272_v51, %v276_v52  ;;  %v324_v51 = vld [vmem:[#allocation5 + $0x570] sm:$0xff]  ;;  %v193_v52 = vld [vmem:[#allocation5 + $0x158] sm:$0xff] }
 0x20e   :  { %4971 = vmatprep.subr.bf16.mxu0 %v7901_v9  ;;  %v7949_v9 = vcombine.high %v280_v3, %v284_v4 }
 0x20f   :  { %4913 = vmatpush1.bf16.msra.mxu1 %v8466_v8  ;;  %v8514_v8 = vcombine.low %v847_v54, %v851_v56  ;;  %v197_v54 = vld [vmem:[#allocation5 + $0x178] sm:$0xff]  ;;  %v7980_v56 = vcombine.low %v312_v1, %v316_v43 }
 0x210   :  { %4914 = vmatprep.subr.bf16.mxu1 %v8475_v10  ;;  %v7823_v10 = vcombine.high %v153_v5, %v157_v6 }
 0x211   :  { %4972 = vmatpush1.bf16.msra.mxu0 %v7900_v17  ;;  %v7948_v17 = vcombine.low %v280_v3, %v284_v4  ;;  %v332_v3 = vld [vmem:[#allocation5 + $0x5b0] sm:$0xff]  ;;  %v201_v4 = vld [vmem:[#allocation5 + $0x198] sm:$0xff] }
 0x212   :  { %4973 = vmatprep.subr.bf16.mxu0 %v7909_v20  ;;  %v7957_v20 = vcombine.high %v288_v11, %v292_v13 }
 0x213   :  { %4915 = vmatpush1.bf16.msra.mxu1 %v8474_v18  ;;  %v7822_v18 = vcombine.low %v153_v5, %v157_v6  ;;  %v205_v5 = vld [vmem:[#allocation5 + $0x1b8] sm:$0xff] }
 0x214   :  { %4916 = vmatprep.subr.bf16.mxu1 %v8483_v21  ;;  %v7831_v21 = vcombine.high %v161_v14, %v165_v15 }
 0x215   :  { %4974 = vmatpush1.bf16.msra.mxu0 %v7908_v28  ;;  %v7956_v28 = vcombine.low %v288_v11, %v292_v13  ;;  %v340_v11 = vld [vmem:[#allocation5 + $0x5f0] sm:$0xff]  ;;  %v209_v13 = vld [vmem:[#allocation5 + $0x1d8] sm:$0xff] }
 0x216   :  { %4975 = vmatprep.subr.bf16.mxu0 %v7917_v30  ;;  %v7965_v30 = vcombine.high %v296_v22, %v300_v25 }
 0x217   :  { %4917 = vmatpush1.bf16.msra.mxu1 %v8482_v29  ;;  %v7830_v29 = vcombine.low %v161_v14, %v165_v15  ;;  %v213_v14 = vld [vmem:[#allocation5 + $0x1f8] sm:$0xff] }
 0x218   :  { %4918 = vmatprep.subr.bf16.mxu1 %v8491_v32  ;;  %v7839_v32 = vcombine.high %v169_v26, %v173_v27 }
 0x219   :  { %4976 = vmatpush1.bf16.msra.mxu0 %v7916_v40  ;;  %v7964_v40 = vcombine.low %v296_v22, %v300_v25  ;;  %v348_v22 = vld [vmem:[#allocation5 + $0x630] sm:$0xff]  ;;  %v217_v25 = vld [vmem:[#allocation5 + $0x218] sm:$0xff] }
 0x21a   :  { %4977 = vmatprep.subr.bf16.mxu0 %v7925_v60  ;;  %v7973_v60 = vcombine.high %v304_v34, %v308_v36 }
 0x21b   :  { %4919 = vmatpush1.bf16.msra.mxu1 %v8490_v41  ;;  %v7838_v41 = vcombine.low %v169_v26, %v173_v27  ;;  %v221_v26 = vld [vmem:[#allocation5 + $0x238] sm:$0xff] }
 0x21c   :  { %4920 = vmatprep.subr.bf16.mxu1 %v8499_v42  ;;  %v7847_v42 = vcombine.high %v177_v37, %v181_v38 }
 0x21d   :  { %4978 = vmatpush1.bf16.msra.mxu0 %v7924_v46  ;;  %v7972_v46 = vcombine.low %v304_v34, %v308_v36  ;;  %v356_v34 = vld [vmem:[#allocation5 + $0x670] sm:$0xff]  ;;  %v225_v36 = vld [vmem:[#allocation5 + $0x258] sm:$0xff] }
 0x21e   :  { %4979 = vmatprep.subr.bf16.mxu0 %v7933_v49  ;;  %v7981_v49 = vcombine.high %v312_v1, %v316_v43  ;;  %v364_v1 = vld [vmem:[#allocation5 + $0x6b0] sm:$0xff]  ;;  %v233_v43 = vld [vmem:[#allocation5 + $0x298] sm:$0xff] }
 0x21f   :  { %4921 = vmatpush1.bf16.msra.mxu1 %v8498_v47  ;;  %v7846_v47 = vcombine.low %v177_v37, %v181_v38  ;;  %v229_v37 = vld [vmem:[#allocation5 + $0x278] sm:$0xff] }
 0x220   :  { %4922 = vmatprep.subr.bf16.mxu1 %v8507_v50  ;;  %v320_v50 = vld [vmem:[#allocation5 + $0x550] sm:$0xff] }
 0x221   :  { %4980 = vmatpush1.bf16.msra.mxu0 %v7932_v59  ;;  %v7854_v59 = vcombine.low %v185_v44, %v189_v45  ;;  %v7988_v6 = vcombine.low %v320_v50, %v324_v51 }
 0x222   :  { %4981 = vmatprep.subr.bf16.mxu0 %v7941_v63  ;;  %v7863_v63 = vcombine.high %v193_v52, %v197_v54 }
 0x223   :  { %4923 = vmatpush1.bf16.msra.mxu1 %v8506_v62  ;;  %v7989_v62 = vcombine.high %v320_v50, %v324_v51  ;;  %v372_v50 = vld [vmem:[#allocation5 + $0x6f0] sm:$0xff]  ;;  %v241_v51 = vld [vmem:[#allocation5 + $0x2d8] sm:$0xff] }
 0x224   :  { %4924 = vmatprep.subr.bf16.mxu1 %v8515_v2  ;;  %v328_v2 = vld [vmem:[#allocation5 + $0x590] sm:$0xff] }
 0x225   :  { %4982 = vmatpush1.bf16.msra.mxu0 %v7940_v7  ;;  %v7862_v7 = vcombine.low %v193_v52, %v197_v54  ;;  %v7996_v15 = vcombine.low %v328_v2, %v332_v3  ;;  %v245_v52 = vld [vmem:[#allocation5 + $0x2f8] sm:$0xff] }
 0x226   :  { %4992 = vmatprep.subr.bf16.mxu0 %v7949_v9  ;;  %v7871_v9 = vcombine.high %v201_v4, %v205_v5 }
 0x227   :  { %4925 = vmatpush1.bf16.msra.mxu1 %v8514_v8  ;;  %v7997_v8 = vcombine.high %v328_v2, %v332_v3  ;;  %v380_v2 = vld [vmem:[#allocation5 + $0x730] sm:$0xff]  ;;  %v249_v3 = vld [vmem:[#allocation5 + $0x318] sm:$0xff] }
 0x228   :  { %5197 = vmatprep.subr.bf16.mxu1 %v7823_v10  ;;  %4984 = vmatmul.mubr.bf16.vlgmr.msra.gmra.mrb[4].mxu0 %v9676_v31  ;;  %v336_v10 = vld [vmem:[#allocation5 + $0x5d0] sm:$0xff] }
 0x229   :  { %4993 = vmatpush1.bf16.msra.mxu0 %v7948_v17  ;;  %5024 = vmatprep.mubr.bf16.mxu0 %v9680_v35  ;;  %v7870_v17 = vcombine.low %v201_v4, %v205_v5  ;;  %v8004_v27 = vcombine.low %v336_v10, %v340_v11  ;;  %v253_v4 = vld [vmem:[#allocation5 + $0x338] sm:$0xff] }
 0x22a   :  { %4943 = vmatmul.mubr.bf16.vlgmr.msra.gmra.mrb[4].mxu1 %v9670_v24  ;;  %4994 = vmatprep.subr.bf16.mxu0 %v7957_v20  ;;  %v7879_v20 = vcombine.high %v209_v13, %v213_v14 }
 0x22b   :  { %5198 = vmatpush1.bf16.msra.mxu1 %v7822_v18  ;;  %5229 = vmatprep.mubr.bf16.mxu1 %v9662_v12  ;;  %v7855_v12 = vcombine.high %v185_v44, %v189_v45  ;;  %v8005_v18 = vcombine.high %v336_v10, %v340_v11  ;;  %v237_v44 = vld [vmem:[#allocation5 + $0x2b8] sm:$0xff]  ;;  %v388_v10 = vld [vmem:[#allocation5 + $0x770] sm:$0xff] }
 0x22c   :  { %5199 = vmatprep.subr.bf16.mxu1 %v7831_v21  ;;  %v344_v21 = vld [vmem:[#allocation5 + $0x610] sm:$0xff]  ;;  %v257_v11 = vld [vmem:[#allocation5 + $0x358] sm:$0xff] }
 0x22d   :  { %4995 = vmatpush1.bf16.msra.mxu0 %v7956_v28  ;;  %v7878_v28 = vcombine.low %v209_v13, %v213_v14  ;;  %v8012_v38 = vcombine.low %v344_v21, %v348_v22  ;;  %v261_v13 = vld [vmem:[#allocation5 + $0x378] sm:$0xff] }
 0x22e   :  { %4996 = vmatprep.subr.bf16.mxu0 %v7965_v30  ;;  %v7887_v30 = vcombine.high %v217_v25, %v221_v26 }
 0x22f   :  { %5200 = vmatpush1.bf16.msra.mxu1 %v7830_v29  ;;  %v8013_v29 = vcombine.high %v344_v21, %v348_v22  ;;  %v396_v21 = vld [vmem:[#allocation5 + $0x7b0] sm:$0xff]  ;;  %v265_v22 = vld [vmem:[#allocation5 + $0x398] sm:$0xff] }
 0x230   :  { %5201 = vmatprep.subr.bf16.mxu1 %v7839_v32  ;;  %v352_v32 = vld [vmem:[#allocation5 + $0x650] sm:$0xff] }
 0x231   :  { %4997 = vmatpush1.bf16.msra.mxu0 %v7964_v40  ;;  %v7886_v40 = vcombine.low %v217_v25, %v221_v26  ;;  %v8020_v45 = vcombine.low %v352_v32, %v356_v34  ;;  %v269_v25 = vld [vmem:[#allocation5 + $0x3b8] sm:$0xff] }
 0x232   :  { %4998 = vmatprep.subr.bf16.mxu0 %v7973_v60  ;;  %v7895_v60 = vcombine.high %v225_v36, %v229_v37 }
 0x233   :  { %5202 = vmatpush1.bf16.msra.mxu1 %v7838_v41  ;;  %v8021_v41 = vcombine.high %v352_v32, %v356_v34  ;;  %v404_v32 = vld [vmem:[#allocation5 + $0x7f0] sm:$0xff]  ;;  %v273_v34 = vld [vmem:[#allocation5 + $0x3d8] sm:$0xff] }
 0x234   :  { %5203 = vmatprep.subr.bf16.mxu1 %v7847_v42  ;;  %v360_v42 = vld [vmem:[#allocation5 + $0x690] sm:$0xff] }
 0x235   :  { %4999 = vmatpush1.bf16.msra.mxu0 %v7972_v46  ;;  %v7894_v46 = vcombine.low %v225_v36, %v229_v37  ;;  %v8028_v54 = vcombine.low %v360_v42, %v364_v1  ;;  %v277_v36 = vld [vmem:[#allocation5 + $0x3f8] sm:$0xff] }
 0x236   :  { %5000 = vmatprep.subr.bf16.mxu0 %v7981_v49  ;;  %v7903_v49 = vcombine.high %v233_v43, %v237_v44 }
 0x237   :  { %5204 = vmatpush1.bf16.msra.mxu1 %v7846_v47  ;;  %v8029_v47 = vcombine.high %v360_v42, %v364_v1  ;;  %v412_v42 = vld [vmem:[#allocation5 + $0x830] sm:$0xff]  ;;  %v281_v1 = vld [vmem:[#allocation5 + $0x418] sm:$0xff] }
 0x238   :  { %5205 = vmatprep.subr.bf16.mxu1 %v7855_v12  ;;  %v368_v12 = vld [vmem:[#allocation5 + $0x6d0] sm:$0xff] }
 0x239   :  { %5001 = vmatpush1.bf16.msra.mxu0 %v7980_v56  ;;  %v7902_v56 = vcombine.low %v233_v43, %v237_v44  ;;  %v8036_v5 = vcombine.low %v368_v12, %v372_v50  ;;  %v285_v43 = vld [vmem:[#allocation5 + $0x438] sm:$0xff] }
 0x23a   :  { %5002 = vmatprep.subr.bf16.mxu0 %v7989_v62  ;;  %v7911_v62 = vcombine.high %v241_v51, %v245_v52 }
 0x23b   :  { %5206 = vmatpush1.bf16.msra.mxu1 %v7854_v59  ;;  %v8037_v59 = vcombine.high %v368_v12, %v372_v50  ;;  %v420_v12 = vld [vmem:[#allocation5 + $0x870] sm:$0xff]  ;;  %v289_v50 = vld [vmem:[#allocation5 + $0x458] sm:$0xff] }
 0x23c   :  { %5207 = vmatprep.subr.bf16.mxu1 %v7863_v63  ;;  %v376_v63 = vld [vmem:[#allocation5 + $0x710] sm:$0xff] }
 0x23d   :  { %5003 = vmatpush1.bf16.msra.mxu0 %v7988_v6  ;;  %v7910_v6 = vcombine.low %v241_v51, %v245_v52  ;;  %v8044_v14 = vcombine.low %v376_v63, %v380_v2  ;;  %v293_v51 = vld [vmem:[#allocation5 + $0x478] sm:$0xff] }
 0x23e   :  { %5004 = vmatprep.subr.bf16.mxu0 %v7997_v8  ;;  %v7919_v8 = vcombine.high %v249_v3, %v253_v4 }
 0x23f   :  { %5208 = vmatpush1.bf16.msra.mxu1 %v7862_v7  ;;  %v8045_v7 = vcombine.high %v376_v63, %v380_v2  ;;  %v428_v63 = vld [vmem:[#allocation5 + $0x8b0] sm:$0xff]  ;;  %v297_v2 = vld [vmem:[#allocation5 + $0x498] sm:$0xff] }
 0x240   :  { %5209 = vmatprep.subr.bf16.mxu1 %v7871_v9  ;;  %v384_v9 = vld [vmem:[#allocation5 + $0x750] sm:$0xff] }
 0x241   :  { %5005 = vmatpush1.bf16.msra.mxu0 %v7996_v15  ;;  %v7918_v15 = vcombine.low %v249_v3, %v253_v4  ;;  %v8052_v26 = vcombine.low %v384_v9, %v388_v10  ;;  %v301_v3 = vld [vmem:[#allocation5 + $0x4b8] sm:$0xff] }
 0x242   :  { %5006 = vmatprep.subr.bf16.mxu0 %v8005_v18  ;;  %v7927_v18 = vcombine.high %v257_v11, %v261_v13 }
 0x243   :  { %5210 = vmatpush1.bf16.msra.mxu1 %v7870_v17  ;;  %v8053_v17 = vcombine.high %v384_v9, %v388_v10  ;;  %v436_v9 = vld [vmem:[#allocation5 + $0x8f0] sm:$0xff]  ;;  %v305_v10 = vld [vmem:[#allocation5 + $0x4d8] sm:$0xff] }
 0x244   :  { %5211 = vmatprep.subr.bf16.mxu1 %v7879_v20  ;;  %v392_v20 = vld [vmem:[#allocation5 + $0x790] sm:$0xff] }
 0x245   :  { %5007 = vmatpush1.bf16.msra.mxu0 %v8004_v27  ;;  %v7926_v27 = vcombine.low %v257_v11, %v261_v13  ;;  %v8060_v37 = vcombine.low %v392_v20, %v396_v21  ;;  %v309_v11 = vld [vmem:[#allocation5 + $0x4f8] sm:$0xff] }
 0x246   :  { %5008 = vmatprep.subr.bf16.mxu0 %v8013_v29  ;;  %v7935_v29 = vcombine.high %v265_v22, %v269_v25 }
 0x247   :  { %5212 = vmatpush1.bf16.msra.mxu1 %v7878_v28  ;;  %v8061_v28 = vcombine.high %v392_v20, %v396_v21  ;;  %v313_v20 = vld [vmem:[#allocation5 + $0x518] sm:$0xff] }
 0x248   :  { %5213 = vmatprep.subr.bf16.mxu1 %v7887_v30  ;;  %v400_v30 = vld [vmem:[#allocation5 + $0x7d0] sm:$0xff]  ;;  %v317_v21 = vld [vmem:[#allocation5 + $0x538] sm:$0xff] }
 0x249   :  { %5009 = vmatpush1.bf16.msra.mxu0 %v8012_v38  ;;  %v7934_v38 = vcombine.low %v265_v22, %v269_v25  ;;  %v8068_v44 = vcombine.low %v400_v30, %v404_v32  ;;  %v7974_v25 = vcombine.low %v305_v10, %v309_v11 }
 0x24a   :  { %5010 = vmatprep.subr.bf16.mxu0 %v8021_v41  ;;  %v7943_v41 = vcombine.high %v273_v34, %v277_v36 }
 0x24b   :  { %5214 = vmatpush1.bf16.msra.mxu1 %v7886_v40  ;;  %v8069_v40 = vcombine.high %v400_v30, %v404_v32  ;;  %v325_v30 = vld [vmem:[#allocation5 + $0x578] sm:$0xff] }
 0x24c   :  { %5215 = vmatprep.subr.bf16.mxu1 %v7895_v60  ;;  %v408_v60 = vld [vmem:[#allocation5 + $0x810] sm:$0xff] }
 0x24d   :  { %5011 = vmatpush1.bf16.msra.mxu0 %v8020_v45  ;;  %v7942_v45 = vcombine.low %v273_v34, %v277_v36  ;;  %v8076_v52 = vcombine.low %v408_v60, %v412_v42  ;;  %v7982_v34 = vcombine.low %v313_v20, %v317_v21 }
 0x24e   :  { %5012 = vmatprep.subr.bf16.mxu0 %v8029_v47  ;;  %v7951_v47 = vcombine.high %v281_v1, %v285_v43 }
 0x24f   :  { %5216 = vmatpush1.bf16.msra.mxu1 %v7894_v46  ;;  %v8077_v46 = vcombine.high %v408_v60, %v412_v42  ;;  %v333_v60 = vld [vmem:[#allocation5 + $0x5b8] sm:$0xff] }
 0x250   :  { %5217 = vmatprep.subr.bf16.mxu1 %v7903_v49  ;;  %v416_v49 = vld [vmem:[#allocation5 + $0x850] sm:$0xff] }
 0x251   :  { %5013 = vmatpush1.bf16.msra.mxu0 %v8028_v54  ;;  %v7950_v54 = vcombine.low %v281_v1, %v285_v43  ;;  %v8084_v4 = vcombine.low %v416_v49, %v420_v12 }
 0x252   :  { %5014 = vmatprep.subr.bf16.mxu0 %v8037_v59  ;;  %v7959_v59 = vcombine.high %v289_v50, %v293_v51 }
 0x253   :  { %5218 = vmatpush1.bf16.msra.mxu1 %v7902_v56  ;;  %v8085_v56 = vcombine.high %v416_v49, %v420_v12  ;;  %v341_v49 = vld [vmem:[#allocation5 + $0x5f8] sm:$0xff] }
 0x254   :  { %5219 = vmatprep.subr.bf16.mxu1 %v7911_v62  ;;  %v424_v62 = vld [vmem:[#allocation5 + $0x890] sm:$0xff] }
 0x255   :  { %5015 = vmatpush1.bf16.msra.mxu0 %v8036_v5  ;;  %v7958_v5 = vcombine.low %v289_v50, %v293_v51  ;;  %v8092_v13 = vcombine.low %v424_v62, %v428_v63 }
 0x256   :  { %5016 = vmatprep.subr.bf16.mxu0 %v8045_v7  ;;  %v7967_v7 = vcombine.high %v297_v2, %v301_v3 }
 0x257   :  { %5220 = vmatpush1.bf16.msra.mxu1 %v7910_v6  ;;  %v8093_v6 = vcombine.high %v424_v62, %v428_v63  ;;  %v349_v62 = vld [vmem:[#allocation5 + $0x638] sm:$0xff] }
 0x258   :  { %5221 = vmatprep.subr.bf16.mxu1 %v7919_v8  ;;  %v432_v8 = vld [vmem:[#allocation5 + $0x8d0] sm:$0xff] }
 0x259   :  { %5017 = vmatpush1.bf16.msra.mxu0 %v8044_v14  ;;  %v8101_v14 = vcombine.high %v432_v8, %v436_v9  ;;  %v8100_v22 = vcombine.low %v432_v8, %v436_v9  ;;  %v357_v8 = vld [vmem:[#allocation5 + $0x678] sm:$0xff] }
 0x25a   :  { %5018 = vmatprep.subr.bf16.mxu0 %v8053_v17  ;;  %v440_v17 = vld [vmem:[#allocation5 + $0x910] sm:$0xff] }
 0x25b   :  { %5222 = vmatpush1.bf16.msra.mxu1 %v7918_v15  ;;  %v7975_v15 = vcombine.high %v305_v10, %v309_v11 }
 0x25c   :  { %5223 = vmatprep.subr.bf16.mxu1 %v7927_v18  ;;  %v444_v18 = vld [vmem:[#allocation5 + $0x930] sm:$0xff] }
 0x25d   :  { %5019 = vmatpush1.bf16.msra.mxu0 %v8052_v26  ;;  %v8109_v26 = vcombine.high %v440_v17, %v444_v18  ;;  %v8108_v32 = vcombine.low %v440_v17, %v444_v18  ;;  %v365_v17 = vld [vmem:[#allocation5 + $0x6b8] sm:$0xff] }
 0x25e   :  { %5020 = vmatprep.subr.bf16.mxu0 %v8061_v28  ;;  %v452_v28 = vld [vmem:[#allocation5 + $0x970] sm:$0xff] }
 0x25f   :  { %5224 = vmatpush1.bf16.msra.mxu1 %v7926_v27  ;;  %v448_v27 = vld [vmem:[#allocation5 + $0x950] sm:$0xff] }
 0x260   :  { %5225 = vmatprep.subr.bf16.mxu1 %v7935_v29  ;;  %v321_v29 = vld [vmem:[#allocation5 + $0x558] sm:$0xff]  ;;  %v8117_v36 = vcombine.high %v448_v27, %v452_v28  ;;  %v8116_v42 = vcombine.low %v448_v27, %v452_v28 }
 0x261   :  { %5021 = vmatpush1.bf16.msra.mxu0 %v8060_v37  ;;  %v7991_v37 = vcombine.high %v321_v29, %v325_v30  ;;  %v7990_v1 = vcombine.low %v321_v29, %v325_v30  ;;  %v373_v27 = vld [vmem:[#allocation5 + $0x6f8] sm:$0xff] }
 0x262   :  { %5022 = vmatprep.subr.bf16.mxu0 %v8069_v40  ;;  %v460_v40 = vld [vmem:[#allocation5 + $0x9b0] sm:$0xff] }
 0x263   :  { %5226 = vmatpush1.bf16.msra.mxu1 %v7934_v38  ;;  %v456_v38 = vld [vmem:[#allocation5 + $0x990] sm:$0xff] }
 0x264   :  { %5227 = vmatprep.subr.bf16.mxu1 %v7943_v41  ;;  %v329_v41 = vld [vmem:[#allocation5 + $0x598] sm:$0xff]  ;;  %v8125_v43 = vcombine.high %v456_v38, %v460_v40  ;;  %v8124_v12 = vcombine.low %v456_v38, %v460_v40 }
 0x265   :  { %5023 = vmatpush1.bf16.msra.mxu0 %v8068_v44  ;;  %v7999_v44 = vcombine.high %v329_v41, %v333_v60  ;;  %v7998_v50 = vcombine.low %v329_v41, %v333_v60  ;;  %v381_v38 = vld [vmem:[#allocation5 + $0x738] sm:$0xff] }
 0x266   :  { %5033 = vmatprep.subr.bf16.mxu0 %v8077_v46  ;;  %v468_v46 = vld [vmem:[#allocation5 + $0x9f0] sm:$0xff] }
 0x267   :  { %5228 = vmatpush1.bf16.msra.mxu1 %v7942_v45  ;;  %v464_v45 = vld [vmem:[#allocation5 + $0x9d0] sm:$0xff] }
 0x268   :  { %5238 = vmatprep.subr.bf16.mxu1 %v7951_v47  ;;  %5025 = vmatmul.mubr.bf16.vlgmr.msra.gmra.mrb[4].mxu0 %v9695_v55  ;;  %v337_v47 = vld [vmem:[#allocation5 + $0x5d8] sm:$0xff]  ;;  %v8133_v51 = vcombine.high %v464_v45, %v468_v46  ;;  %v8132_v63 = vcombine.low %v464_v45, %v468_v46 }
 0x269   :  { %5034 = vmatpush1.bf16.msra.mxu0 %v8076_v52  ;;  %5065 = vmatprep.mubr.bf16.mxu0 %v9698_v58  ;;  %v8007_v52 = vcombine.high %v337_v47, %v341_v49  ;;  %v389_v45 = vld [vmem:[#allocation5 + $0x778] sm:$0xff] }
 0x26a   :  { %5230 = vmatmul.mubr.bf16.vlgmr.msra.gmra.mrb[8].mxu1 %v9676_v31  ;;  %5035 = vmatprep.subr.bf16.mxu0 %v8085_v56  ;;  %v7966_v31 = vcombine.low %v297_v2, %v301_v3  ;;  %v476_v56 = vld [vmem:[#allocation5 + $0xa30] sm:$0xff]  ;;  %v8006_v2 = vcombine.low %v337_v47, %v341_v49 }
 0x26b   :  { %5239 = vmatpush1.bf16.msra.mxu1 %v7950_v54  ;;  %5270 = vmatprep.mubr.bf16.mxu1 %v9680_v35  ;;  %v7983_v35 = vcombine.high %v313_v20, %v317_v21  ;;  %v472_v54 = vld [vmem:[#allocation5 + $0xa10] sm:$0xff] }
 0x26c   :  { %5240 = vmatprep.subr.bf16.mxu1 %v7959_v59  ;;  %v345_v59 = vld [vmem:[#allocation5 + $0x618] sm:$0xff]  ;;  %v8141_v3 = vcombine.high %v472_v54, %v476_v56  ;;  %v8140_v9 = vcombine.low %v472_v54, %v476_v56 }
 0x26d   :  { %5036 = vmatpush1.bf16.msra.mxu0 %v8084_v4  ;;  %v8015_v4 = vcombine.high %v345_v59, %v349_v62  ;;  %v8014_v10 = vcombine.low %v345_v59, %v349_v62  ;;  %v397_v54 = vld [vmem:[#allocation5 + $0x7b8] sm:$0xff] }
 0x26e   :  { %5037 = vmatprep.subr.bf16.mxu0 %v8093_v6  ;;  %v484_v6 = vld [vmem:[#allocation5 + $0xa70] sm:$0xff] }
 0x26f   :  { %5241 = vmatpush1.bf16.msra.mxu1 %v7958_v5  ;;  %v480_v5 = vld [vmem:[#allocation5 + $0xa50] sm:$0xff] }
 0x270   :  { %5242 = vmatprep.subr.bf16.mxu1 %v7967_v7  ;;  %v353_v7 = vld [vmem:[#allocation5 + $0x658] sm:$0xff]  ;;  %v8149_v11 = vcombine.high %v480_v5, %v484_v6  ;;  %v8148_v18 = vcombine.low %v480_v5, %v484_v6 }
 0x271   :  { %5038 = vmatpush1.bf16.msra.mxu0 %v8092_v13  ;;  %v8023_v13 = vcombine.high %v353_v7, %v357_v8  ;;  %v8022_v20 = vcombine.low %v353_v7, %v357_v8  ;;  %v405_v5 = vld [vmem:[#allocation5 + $0x7f8] sm:$0xff] }
 0x272   :  { %5039 = vmatprep.subr.bf16.mxu0 %v8101_v14  ;;  %v492_v14 = vld [vmem:[#allocation5 + $0xab0] sm:$0xff] }
 0x273   :  { %5243 = vmatpush1.bf16.msra.mxu1 %v7966_v31  ;;  %v488_v31 = vld [vmem:[#allocation5 + $0xa90] sm:$0xff] }
 0x274   :  { %5244 = vmatprep.subr.bf16.mxu1 %v7975_v15  ;;  %v361_v15 = vld [vmem:[#allocation5 + $0x698] sm:$0xff]  ;;  %v8157_v21 = vcombine.high %v488_v31, %v492_v14  ;;  %v8156_v28 = vcombine.low %v488_v31, %v492_v14 }
 0x275   :  { %5040 = vmatpush1.bf16.msra.mxu0 %v8100_v22  ;;  %v8031_v22 = vcombine.high %v361_v15, %v365_v17  ;;  %v8030_v29 = vcombine.low %v361_v15, %v365_v17  ;;  %v413_v31 = vld [vmem:[#allocation5 + $0x838] sm:$0xff] }
 0x276   :  { %5041 = vmatprep.subr.bf16.mxu0 %v8109_v26  ;;  %v500_v26 = vld [vmem:[#allocation5 + $0xaf0] sm:$0xff] }
 0x277   :  { %5245 = vmatpush1.bf16.msra.mxu1 %v7974_v25  ;;  %v496_v25 = vld [vmem:[#allocation5 + $0xad0] sm:$0xff] }
 0x278   :  { %5246 = vmatprep.subr.bf16.mxu1 %v7983_v35  ;;  %v369_v35 = vld [vmem:[#allocation5 + $0x6d8] sm:$0xff]  ;;  %v8165_v30 = vcombine.high %v496_v25, %v500_v26  ;;  %v8164_v40 = vcombine.low %v496_v25, %v500_v26 }
 0x279   :  { %5042 = vmatpush1.bf16.msra.mxu0 %v8108_v32  ;;  %v8039_v32 = vcombine.high %v369_v35, %v373_v27  ;;  %v8038_v41 = vcombine.low %v369_v35, %v373_v27  ;;  %v421_v25 = vld [vmem:[#allocation5 + $0x878] sm:$0xff] }
 0x27a   :  { %5043 = vmatprep.subr.bf16.mxu0 %v8117_v36  ;;  %v508_v36 = vld [vmem:[#allocation5 + $0xb30] sm:$0xff] }
 0x27b   :  { %5247 = vmatpush1.bf16.msra.mxu1 %v7982_v34  ;;  %v504_v34 = vld [vmem:[#allocation5 + $0xb10] sm:$0xff] }
 0x27c   :  { %5248 = vmatprep.subr.bf16.mxu1 %v7991_v37  ;;  %v377_v37 = vld [vmem:[#allocation5 + $0x718] sm:$0xff]  ;;  %v8173_v60 = vcombine.high %v504_v34, %v508_v36  ;;  %v8172_v46 = vcombine.low %v504_v34, %v508_v36 }
 0x27d   :  { %5044 = vmatpush1.bf16.msra.mxu0 %v8116_v42  ;;  %v8047_v42 = vcombine.high %v377_v37, %v381_v38  ;;  %v8046_v47 = vcombine.low %v377_v37, %v381_v38  ;;  %v429_v34 = vld [vmem:[#allocation5 + $0x8b8] sm:$0xff] }
 0x27e   :  { %5045 = vmatprep.subr.bf16.mxu0 %v8125_v43  ;;  %v516_v43 = vld [vmem:[#allocation5 + $0xb70] sm:$0xff] }
 0x27f   :  { %5249 = vmatpush1.bf16.msra.mxu1 %v7990_v1  ;;  %v512_v1 = vld [vmem:[#allocation5 + $0xb50] sm:$0xff] }
 0x280   :  { %5250 = vmatprep.subr.bf16.mxu1 %v7999_v44  ;;  %v385_v44 = vld [vmem:[#allocation5 + $0x758] sm:$0xff]  ;;  %v8181_v49 = vcombine.high %v512_v1, %v516_v43  ;;  %v8180_v56 = vcombine.low %v512_v1, %v516_v43 }
 0x281   :  { %5046 = vmatpush1.bf16.msra.mxu0 %v8124_v12  ;;  %v8055_v12 = vcombine.high %v385_v44, %v389_v45  ;;  %v8054_v59 = vcombine.low %v385_v44, %v389_v45  ;;  %v437_v1 = vld [vmem:[#allocation5 + $0x8f8] sm:$0xff] }
 0x282   :  { %5047 = vmatprep.subr.bf16.mxu0 %v8133_v51  ;;  %v524_v51 = vld [vmem:[#allocation5 + $0xbb0] sm:$0xff] }
 0x283   :  { %5251 = vmatpush1.bf16.msra.mxu1 %v7998_v50  ;;  %v520_v50 = vld [vmem:[#allocation5 + $0xb90] sm:$0xff] }
 0x284   :  { %5252 = vmatprep.subr.bf16.mxu1 %v8007_v52  ;;  %v393_v52 = vld [vmem:[#allocation5 + $0x798] sm:$0xff]  ;;  %v8189_v62 = vcombine.high %v520_v50, %v524_v51  ;;  %v8188_v6 = vcombine.low %v520_v50, %v524_v51 }
 0x285   :  { %5048 = vmatpush1.bf16.msra.mxu0 %v8132_v63  ;;  %v8063_v63 = vcombine.high %v393_v52, %v397_v54  ;;  %v8062_v7 = vcombine.low %v393_v52, %v397_v54  ;;  %v576_v54 = vld [vmem:[#allocation5 + $0xd50] sm:$0xff] }
 0x286   :  { %5049 = vmatprep.subr.bf16.mxu0 %v8141_v3  ;;  %v532_v3 = vld [vmem:[#allocation5 + $0xbf0] sm:$0xff] }
 0x287   :  { %5253 = vmatpush1.bf16.msra.mxu1 %v8006_v2  ;;  %v528_v2 = vld [vmem:[#allocation5 + $0xbd0] sm:$0xff] }
 0x288   :  { %5254 = vmatprep.subr.bf16.mxu1 %v8015_v4  ;;  %v401_v4 = vld [vmem:[#allocation5 + $0x7d8] sm:$0xff]  ;;  %v8197_v8 = vcombine.high %v528_v2, %v532_v3  ;;  %v8196_v14 = vcombine.low %v528_v2, %v532_v3 }
 0x289   :  { %5050 = vmatpush1.bf16.msra.mxu0 %v8140_v9  ;;  %v8071_v9 = vcombine.high %v401_v4, %v405_v5  ;;  %v8070_v15 = vcombine.low %v401_v4, %v405_v5  ;;  %v584_v5 = vld [vmem:[#allocation5 + $0xd90] sm:$0xff] }
 0x28a   :  { %5051 = vmatprep.subr.bf16.mxu0 %v8149_v11  ;;  %v540_v11 = vld [vmem:[#allocation5 + $0xc30] sm:$0xff] }
 0x28b   :  { %5255 = vmatpush1.bf16.msra.mxu1 %v8014_v10  ;;  %v536_v10 = vld [vmem:[#allocation5 + $0xc10] sm:$0xff] }
 0x28c   :  { %5256 = vmatprep.subr.bf16.mxu1 %v8023_v13  ;;  %v409_v13 = vld [vmem:[#allocation5 + $0x818] sm:$0xff]  ;;  %v8205_v17 = vcombine.high %v536_v10, %v540_v11  ;;  %v8204_v26 = vcombine.low %v536_v10, %v540_v11 }
 0x28d   :  { %5052 = vmatpush1.bf16.msra.mxu0 %v8148_v18  ;;  %v8079_v18 = vcombine.high %v409_v13, %v413_v31  ;;  %v8078_v35 = vcombine.low %v409_v13, %v413_v31 }
 0x28e   :  { %5053 = vmatprep.subr.bf16.mxu0 %v8157_v21  ;;  %v548_v21 = vld [vmem:[#allocation5 + $0xc70] sm:$0xff] }
 0x28f   :  { %5257 = vmatpush1.bf16.msra.mxu1 %v8022_v20  ;;  %v544_v20 = vld [vmem:[#allocation5 + $0xc50] sm:$0xff] }
 0x290   :  { %5258 = vmatprep.subr.bf16.mxu1 %v8031_v22  ;;  %v417_v22 = vld [vmem:[#allocation5 + $0x858] sm:$0xff]  ;;  %v8213_v27 = vcombine.high %v544_v20, %v548_v21  ;;  %v8212_v36 = vcombine.low %v544_v20, %v548_v21 }
 0x291   :  { %5054 = vmatpush1.bf16.msra.mxu0 %v8156_v28  ;;  %v8087_v28 = vcombine.high %v417_v22, %v421_v25  ;;  %v8086_v37 = vcombine.low %v417_v22, %v421_v25  ;;  %v465_v20 = vld [vmem:[#allocation5 + $0x9d8] sm:$0xff] }
 0x292   :  { %5055 = vmatprep.subr.bf16.mxu0 %v8165_v30  ;;  %v556_v30 = vld [vmem:[#allocation5 + $0xcb0] sm:$0xff]  ;;  %v469_v21 = vld [vmem:[#allocation5 + $0x9f8] sm:$0xff] }
 0x293   :  { %5259 = vmatpush1.bf16.msra.mxu1 %v8030_v29  ;;  %v552_v29 = vld [vmem:[#allocation5 + $0xc90] sm:$0xff] }
 0x294   :  { %5260 = vmatprep.subr.bf16.mxu1 %v8039_v32  ;;  %v425_v32 = vld [vmem:[#allocation5 + $0x898] sm:$0xff]  ;;  %v8221_v38 = vcombine.high %v552_v29, %v556_v30  ;;  %v8220_v43 = vcombine.low %v552_v29, %v556_v30  ;;  %v8135_v29 = vcombine.high %v465_v20, %v469_v21  ;;  %v600_v30 = vld [vmem:[#allocation5 + $0xe10] sm:$0xff] }
 0x295   :  { %5056 = vmatpush1.bf16.msra.mxu0 %v8164_v40  ;;  %v8095_v40 = vcombine.high %v425_v32, %v429_v34 }
 0x296   :  { %5057 = vmatprep.subr.bf16.mxu0 %v8173_v60  ;;  %v564_v60 = vld [vmem:[#allocation5 + $0xcf0] sm:$0xff] }
 0x297   :  { %5261 = vmatpush1.bf16.msra.mxu1 %v8038_v41  ;;  %v560_v41 = vld [vmem:[#allocation5 + $0xcd0] sm:$0xff] }
 0x298   :  { %5262 = vmatprep.subr.bf16.mxu1 %v8047_v42  ;;  %v433_v42 = vld [vmem:[#allocation5 + $0x8d8] sm:$0xff]  ;;  %v8229_v44 = vcombine.high %v560_v41, %v564_v60  ;;  %v8228_v50 = vcombine.low %v560_v41, %v564_v60  ;;  %v612_v41 = vld [vmem:[#allocation5 + $0xe70] sm:$0xff] }
 0x299   :  { %5058 = vmatpush1.bf16.msra.mxu0 %v8172_v46  ;;  %v8103_v45 = vcombine.high %v433_v42, %v437_v1  ;;  %v568_v46 = vld [vmem:[#allocation5 + $0xd10] sm:$0xff]  ;;  %v8102_v51 = vcombine.low %v433_v42, %v437_v1  ;;  %v481_v60 = vld [vmem:[#allocation5 + $0xa58] sm:$0xff] }
 0x29a   :  { %5059 = vmatprep.subr.bf16.mxu0 %v8181_v49  ;;  %v441_v49 = vld [vmem:[#allocation5 + $0x918] sm:$0xff] }
 0x29b   :  { %5263 = vmatpush1.bf16.msra.mxu1 %v8046_v47  ;;  %v572_v47 = vld [vmem:[#allocation5 + $0xd30] sm:$0xff]  ;;  %v485_v42 = vld [vmem:[#allocation5 + $0xa78] sm:$0xff] }
 0x29c   :  { %5264 = vmatprep.subr.bf16.mxu1 %v8055_v12  ;;  %v445_v12 = vld [vmem:[#allocation5 + $0x938] sm:$0xff]  ;;  %v8237_v52 = vcombine.high %v568_v46, %v572_v47 }
 0x29d   :  { %5060 = vmatpush1.bf16.msra.mxu0 %v8180_v56  ;;  %v580_v56 = vld [vmem:[#allocation5 + $0xd70] sm:$0xff]  ;;  %v8110_v2 = vcombine.low %v441_v49, %v445_v12 }
 0x29e   :  { %5061 = vmatprep.subr.bf16.mxu0 %v8189_v62  ;;  %v453_v62 = vld [vmem:[#allocation5 + $0x978] sm:$0xff]  ;;  %v8245_v3 = vcombine.high %v576_v54, %v580_v56 }
 0x29f   :  { %5265 = vmatpush1.bf16.msra.mxu1 %v8054_v59  ;;  %v449_v59 = vld [vmem:[#allocation5 + $0x958] sm:$0xff] }
 0x2a0   :  { %5266 = vmatprep.subr.bf16.mxu1 %v8063_v63  ;;  %v8236_v63 = vcombine.low %v568_v46, %v572_v47  ;;  %v8119_v4 = vcombine.high %v449_v59, %v453_v62  ;;  %v8118_v10 = vcombine.low %v449_v59, %v453_v62  ;;  %v620_v46 = vld [vmem:[#allocation5 + $0xeb0] sm:$0xff]  ;;  %v489_v47 = vld [vmem:[#allocation5 + $0xa98] sm:$0xff] }
 0x2a1   :  { %5062 = vmatpush1.bf16.msra.mxu0 %v8188_v6  ;;  %v588_v6 = vld [vmem:[#allocation5 + $0xdb0] sm:$0xff]  ;;  %v501_v59 = vld [vmem:[#allocation5 + $0xaf8] sm:$0xff] }
 0x2a2   :  { %5063 = vmatprep.subr.bf16.mxu0 %v8197_v8  ;;  %v461_v8 = vld [vmem:[#allocation5 + $0x9b8] sm:$0xff]  ;;  %v8253_v11 = vcombine.high %v584_v5, %v588_v6 }
 0x2a3   :  { %5267 = vmatpush1.bf16.msra.mxu1 %v8062_v7  ;;  %v457_v7 = vld [vmem:[#allocation5 + $0x998] sm:$0xff] }
 0x2a4   :  { %5268 = vmatprep.subr.bf16.mxu1 %v8071_v9  ;;  %v8244_v9 = vcombine.low %v576_v54, %v580_v56  ;;  %v8127_v31 = vcombine.high %v457_v7, %v461_v8  ;;  %v628_v54 = vld [vmem:[#allocation5 + $0xef0] sm:$0xff]  ;;  %v497_v56 = vld [vmem:[#allocation5 + $0xad8] sm:$0xff] }
 0x2a5   :  { %5064 = vmatpush1.bf16.msra.mxu0 %v8196_v14  ;;  %v592_v14 = vld [vmem:[#allocation5 + $0xdd0] sm:$0xff] }
 0x2a6   :  { %5074 = vmatprep.subr.bf16.mxu0 %v8205_v17 }
 0x2a7   :  { %5269 = vmatpush1.bf16.msra.mxu1 %v8070_v15  ;;  %v596_v15 = vld [vmem:[#allocation5 + $0xdf0] sm:$0xff] }
 0x2a8   :  { %5279 = vmatprep.subr.bf16.mxu1 %v8079_v18  ;;  %5066 = vmatmul.mubr.bf16.vlgmr.msra.gmra.mrb[4].mxu0 %v9706_v19 }
 0x2a9   :  { %5075 = vmatpush1.bf16.msra.mxu0 %v8204_v26  ;;  %5106 = vmatprep.mubr.bf16.mxu0 %v9710_v23  ;;  %v8252_v26 = vcombine.low %v584_v5, %v588_v6  ;;  %v636_v5 = vld [vmem:[#allocation5 + $0xf30] sm:$0xff]  ;;  %v505_v6 = vld [vmem:[#allocation5 + $0xb18] sm:$0xff] }
 0x2aa   :  { %5271 = vmatmul.mubr.bf16.vlgmr.msra.gmra.mrb[8].mxu1 %v9695_v55  ;;  %5076 = vmatprep.subr.bf16.mxu0 %v8213_v27  ;;  %v8094_v55 = vcombine.low %v425_v32, %v429_v34  ;;  %v8126_v27 = vcombine.low %v457_v7, %v461_v8  ;;  %v604_v32 = vld [vmem:[#allocation5 + $0xe30] sm:$0xff]  ;;  %v477_v34 = vld [vmem:[#allocation5 + $0xa38] sm:$0xff] }
 0x2ab   :  { %5280 = vmatpush1.bf16.msra.mxu1 %v8078_v35  ;;  %5311 = vmatprep.mubr.bf16.mxu1 %v9698_v58  ;;  %v8111_v58 = vcombine.high %v441_v49, %v445_v12  ;;  %v8268_v1 = vcombine.low %v600_v30, %v604_v32  ;;  %v493_v49 = vld [vmem:[#allocation5 + $0xab8] sm:$0xff] }
 0x2ac   :  { %5281 = vmatprep.subr.bf16.mxu1 %v8087_v28  ;;  %v8261_v28 = vcombine.high %v592_v14, %v596_v15  ;;  %v509_v7 = vld [vmem:[#allocation5 + $0xb38] sm:$0xff] }
 0x2ad   :  { %5077 = vmatpush1.bf16.msra.mxu0 %v8212_v36  ;;  %v8260_v36 = vcombine.low %v592_v14, %v596_v15  ;;  %v513_v14 = vld [vmem:[#allocation5 + $0xb58] sm:$0xff] }
 0x2ae   :  { %5078 = vmatprep.subr.bf16.mxu0 %v8221_v38  ;;  %v517_v15 = vld [vmem:[#allocation5 + $0xb78] sm:$0xff] }
 0x2af   :  { %5282 = vmatpush1.bf16.msra.mxu1 %v8086_v37  ;;  %v8269_v37 = vcombine.high %v600_v30, %v604_v32  ;;  %v8182_v30 = vcombine.low %v513_v14, %v517_v15 }
 0x2b0   :  { %5283 = vmatprep.subr.bf16.mxu1 %v8095_v40  ;;  %v608_v40 = vld [vmem:[#allocation5 + $0xe50] sm:$0xff] }
 0x2b1   :  { %5079 = vmatpush1.bf16.msra.mxu0 %v8220_v43  ;;  %v8276_v12 = vcombine.low %v608_v40, %v612_v41 }
 0x2b2   :  { %5080 = vmatprep.subr.bf16.mxu0 %v8229_v44  ;;  %v8151_v44 = vcombine.high %v481_v60, %v485_v42 }
 0x2b3   :  { %5284 = vmatpush1.bf16.msra.mxu1 %v8094_v55  ;;  %v8277_v55 = vcombine.high %v608_v40, %v612_v41 }
 0x2b4   :  { %5285 = vmatprep.subr.bf16.mxu1 %v8103_v45  ;;  %v616_v45 = vld [vmem:[#allocation5 + $0xe90] sm:$0xff] }
 0x2b5   :  { %5081 = vmatpush1.bf16.msra.mxu0 %v8228_v50  ;;  %v8150_v50 = vcombine.low %v481_v60, %v485_v42  ;;  %v8284_v62 = vcombine.low %v616_v45, %v620_v46  ;;  %v664_v42 = vld [vmem:[#allocation5 + $0x1010] sm:$0xff] }
 0x2b6   :  { %5082 = vmatprep.subr.bf16.mxu0 %v8237_v52  ;;  %v8159_v52 = vcombine.high %v489_v47, %v493_v49 }
 0x2b7   :  { %5286 = vmatpush1.bf16.msra.mxu1 %v8102_v51  ;;  %v8285_v51 = vcombine.high %v616_v45, %v620_v46 }
 0x2b8   :  { %5287 = vmatprep.subr.bf16.mxu1 %v8111_v58  ;;  %v624_v58 = vld [vmem:[#allocation5 + $0xed0] sm:$0xff] }
 0x2b9   :  { %5083 = vmatpush1.bf16.msra.mxu0 %v8236_v63  ;;  %v8158_v63 = vcombine.low %v489_v47, %v493_v49  ;;  %v8292_v8 = vcombine.low %v624_v58, %v628_v54 }
 0x2ba   :  { %5084 = vmatprep.subr.bf16.mxu0 %v8245_v3  ;;  %v8167_v3 = vcombine.high %v497_v56, %v501_v59 }
 0x2bb   :  { %5288 = vmatpush1.bf16.msra.mxu1 %v8110_v2  ;;  %v4657_v13 = vpop.f32.mrb[0].mxu0  ;;  %v8293_v2 = vcombine.high %v624_v58, %v628_v54  ;;  %v545_v54 = vld [vmem:[#allocation5 + $0xc58] sm:$0xff] }
 0x2bc   :  { %5289 = vmatprep.subr.bf16.mxu1 %v8119_v4  ;;  %v9748_v17 = vadd.f32 %v9716_v39, %v4657_v13  ;;  %v4659_v18 = vpop.f32.mrb[1].mxu0  ;;  %v473_v39 = vld [vmem:[#allocation5 + $0xa18] sm:$0xff]  ;;  %v632_v4 = vld [vmem:[#allocation5 + $0xf10] sm:$0xff] }
 0x2bd   :  { %v9751_v22 = vadd.f32 %v9718_v33, %v4659_v18  ;;  %v4661_v25 = vpop.f32.mrb[2].mxu0  ;;  %5085 = vmatpush1.bf16.msra.mxu0 %v8244_v9  ;;  %v8134_v33 = vcombine.low %v465_v20, %v469_v21  ;;  %v8143_v38 = vcombine.high %v473_v39, %v477_v34  ;;  %v8142_v43 = vcombine.low %v473_v39, %v477_v34  ;;  %v640_v13 = vld [vmem:[#allocation5 + $0xf50] sm:$0xff] }
 0x2be   :  { %v4662_v35 = vpop.f32.mrb[3].mxu0  ;;  %5086 = vmatprep.subr.bf16.mxu0 %v8253_v11  ;;  %v8166_v9 = vcombine.low %v497_v56, %v501_v59  ;;  %v8175_v11 = vcombine.high %v505_v6, %v509_v7  ;;  %v8300_v18 = vcombine.low %v632_v4, %v636_v5  ;;  %v8174_v20 = vcombine.low %v505_v6, %v509_v7  ;;  %v656_v34 = vld [vmem:[#allocation5 + $0xfd0] sm:$0xff]  ;;  %v549_v56 = vld [vmem:[#allocation5 + $0xc78] sm:$0xff] }
 0x2bf   :  { %5290 = vmatpush1.bf16.msra.mxu1 %v8118_v10  ;;  %v8301_v10 = vcombine.high %v632_v4, %v636_v5  ;;  %v8183_v25 = vcombine.high %v513_v14, %v517_v15  ;;  %v652_v35 = vld [vmem:[#allocation5 + $0xfb0] sm:$0xff]  ;;  %v5653_v45 = vsel %vm5454_vm0, %v9748_v17, 0.0  ;;  %v5685_v49 = vmul.f32 %v9748_v17, %v9748_v17 }
 0x2c0   :  { %5291 = vmatprep.subr.bf16.mxu1 %v8127_v31  ;;  %v644_v31 = vld [vmem:[#allocation5 + $0xf70] sm:$0xff]  ;;  %v5686_v58 = vmul.f32 %v9751_v22, %v9751_v22  ;;  %v5654_v59 = vrot.slane %v5653_v45, 4  ;;  %v8215_v5 = vcombine.high %v545_v54, %v549_v56  ;;  %v8214_v14 = vcombine.low %v545_v54, %v549_v56 }
 0x2c1   :  { %5087 = vmatpush1.bf16.msra.mxu0 %v8252_v26  ;;  %v8309_v21 = vcombine.high %v640_v13, %v644_v31  ;;  %v648_v26 = vld [vmem:[#allocation5 + $0xf90] sm:$0xff] }
 0x2c2   :  { %5088 = vmatprep.subr.bf16.mxu0 %v8261_v28  ;;  %v525_v28 = vld [vmem:[#allocation5 + $0xbb8] sm:$0xff]  ;;  %v8317_v32 = vcombine.high %v648_v26, %v652_v35  ;;  %v680_v6 = vld [vmem:[#allocation5 + $0x1090] sm:$0xff] }
 0x2c3   :  { %5292 = vmatpush1.bf16.msra.mxu1 %v8126_v27  ;;  %v521_v27 = vld [vmem:[#allocation5 + $0xb98] sm:$0xff]  ;;  %v684_v7 = vld [vmem:[#allocation5 + $0x10b0] sm:$0xff] }
 0x2c4   :  { %5293 = vmatprep.subr.bf16.mxu1 %v8135_v29  ;;  %v8308_v29 = vcombine.low %v640_v13, %v644_v31  ;;  %v8191_v39 = vcombine.high %v521_v27, %v525_v28  ;;  %v8190_v40 = vcombine.low %v521_v27, %v525_v28  ;;  %v8349_v15 = vcombine.high %v680_v6, %v684_v7  ;;  %v565_v27 = vld [vmem:[#allocation5 + $0xcf8] sm:$0xff] }
 0x2c5   :  { %5089 = vmatpush1.bf16.msra.mxu0 %v8260_v36  ;;  %v660_v36 = vld [vmem:[#allocation5 + $0xff0] sm:$0xff] }
 0x2c6   :  { %5090 = vmatprep.subr.bf16.mxu0 %v8269_v37  ;;  %v533_v37 = vld [vmem:[#allocation5 + $0xbf8] sm:$0xff]  ;;  %v8325_v41 = vcombine.high %v656_v34, %v660_v36 }
 0x2c7   :  { %5294 = vmatpush1.bf16.msra.mxu1 %v8134_v33  ;;  %v529_v33 = vld [vmem:[#allocation5 + $0xbd8] sm:$0xff] }
 0x2c8   :  { %5295 = vmatprep.subr.bf16.mxu1 %v8143_v38  ;;  %v8316_v38 = vcombine.low %v648_v26, %v652_v35  ;;  %v8199_v60 = vcombine.high %v529_v33, %v533_v37  ;;  %v8198_v46 = vcombine.low %v529_v33, %v533_v37  ;;  %v692_v26 = vld [vmem:[#allocation5 + $0x10f0] sm:$0xff]  ;;  %v561_v35 = vld [vmem:[#allocation5 + $0xcd8] sm:$0xff] }
 0x2c9   :  { %5091 = vmatpush1.bf16.msra.mxu0 %v8268_v1  ;;  %v668_v1 = vld [vmem:[#allocation5 + $0x1030] sm:$0xff] }
 0x2ca   :  { %5092 = vmatprep.subr.bf16.mxu0 %v8277_v55  ;;  %v541_v55 = vld [vmem:[#allocation5 + $0xc38] sm:$0xff]  ;;  %v8333_v47 = vcombine.high %v664_v42, %v668_v1  ;;  %v696_v33 = vld [vmem:[#allocation5 + $0x1110] sm:$0xff] }
 0x2cb   :  { %5296 = vmatpush1.bf16.msra.mxu1 %v8142_v43  ;;  %v537_v43 = vld [vmem:[#allocation5 + $0xc18] sm:$0xff]  ;;  %v700_v37 = vld [vmem:[#allocation5 + $0x1130] sm:$0xff] }
 0x2cc   :  { %5297 = vmatprep.subr.bf16.mxu1 %v8151_v44  ;;  %v8324_v44 = vcombine.low %v656_v34, %v660_v36  ;;  %v8231_v36 = vcombine.high %v561_v35, %v565_v27 }
 0x2cd   :  { %5093 = vmatpush1.bf16.msra.mxu0 %v8276_v12  ;;  %v8207_v12 = vcombine.high %v537_v43, %v541_v55 }
 0x2ce   :  { %5094 = vmatprep.subr.bf16.mxu0 %v8285_v51  ;;  %v676_v51 = vld [vmem:[#allocation5 + $0x1070] sm:$0xff] }
 0x2cf   :  { %5298 = vmatpush1.bf16.msra.mxu1 %v8150_v50  ;;  %v672_v50 = vld [vmem:[#allocation5 + $0x1050] sm:$0xff] }
 0x2d0   :  { %5299 = vmatprep.subr.bf16.mxu1 %v8159_v52  ;;  %v5660_v52 = vsel %vm5454_vm0, %v9751_v22, 0.0  ;;  %v8340_v13 = vcombine.low %v672_v50, %v676_v51 }
 0x2d1   :  { %5095 = vmatpush1.bf16.msra.mxu0 %v8284_v62  ;;  %v8332_v62 = vcombine.low %v664_v42, %v668_v1  ;;  %v5661_v4 = vrot.slane %v5660_v52, 4  ;;  %v8230_v42 = vcombine.low %v561_v35, %v565_v27  ;;  %v8365_v1 = vcombine.high %v696_v33, %v700_v37 }
 0x2d2   :  { %5096 = vmatprep.subr.bf16.mxu0 %v8293_v2  ;;  %v8341_v2 = vcombine.high %v672_v50, %v676_v51  ;;  %v8364_v50 = vcombine.low %v696_v33, %v700_v37  ;;  %v732_v37 = vld [vmem:[#allocation5 + $0x1230] sm:$0xff] }
 0x2d3   :  { %5300 = vmatpush1.bf16.msra.mxu1 %v8158_v63  ;;  %v8206_v63 = vcombine.low %v537_v43, %v541_v55 }
 0x2d4   :  { %5301 = vmatprep.subr.bf16.mxu1 %v8167_v3  ;;  %v5689_v3 = vsel %vm5454_vm0, %v5685_v49, 0.0  ;;  %v581_v49 = vld [vmem:[#allocation5 + $0xd78] sm:$0xff] }
 0x2d5   :  { %5097 = vmatpush1.bf16.msra.mxu0 %v8292_v8  ;;  %v5696_v8 = vsel %vm5454_vm0, %v5686_v58, 0.0  ;;  %v5690_v31 = vrot.slane %v5689_v3, 4 }
 0x2d6   :  { %5098 = vmatprep.subr.bf16.mxu0 %v8301_v10  ;;  %v557_v10 = vld [vmem:[#allocation5 + $0xcb8] sm:$0xff] }
 0x2d7   :  { %5302 = vmatpush1.bf16.msra.mxu1 %v8166_v9  ;;  %v553_v9 = vld [vmem:[#allocation5 + $0xc98] sm:$0xff] }
 0x2d8   :  { %5303 = vmatprep.subr.bf16.mxu1 %v8175_v11  ;;  %v5655_v11 = vadd.f32 %v5654_v59, %v5653_v45  ;;  %v704_v45 = vld [vmem:[#allocation5 + $0x1150] sm:$0xff] }
 0x2d9   :  { %5099 = vmatpush1.bf16.msra.mxu0 %v8300_v18  ;;  %v5662_v18 = vadd.f32 %v5661_v4, %v5660_v52 }
 0x2da   :  { %5100 = vmatprep.subr.bf16.mxu0 %v8309_v21  ;;  %v8223_v21 = vcombine.high %v553_v9, %v557_v10  ;;  %v5656_v28 = vrot.slane %v5655_v11, 2 }
 0x2db   :  { %5304 = vmatpush1.bf16.msra.mxu1 %v8174_v20  ;;  %v5697_v20 = vrot.slane %v5696_v8, 4 }
 0x2dc   :  { %5305 = vmatprep.subr.bf16.mxu1 %v8183_v25  ;;  %v688_v25 = vld [vmem:[#allocation5 + $0x10d0] sm:$0xff] }
 0x2dd   :  { %5101 = vmatpush1.bf16.msra.mxu0 %v8308_v29  ;;  %v5691_v29 = vadd.f32 %v5690_v31, %v5689_v3  ;;  %v5698_v34 = vadd.f32 %v5697_v20, %v5696_v8  ;;  %v589_v3 = vld [vmem:[#allocation5 + $0xdb8] sm:$0xff] }
 0x2de   :  { %5102 = vmatprep.subr.bf16.mxu0 %v8317_v32  ;;  %v8357_v32 = vcombine.high %v688_v25, %v692_v26 }
 0x2df   :  { %5306 = vmatpush1.bf16.msra.mxu1 %v8182_v30  ;;  %v8222_v30 = vcombine.low %v553_v9, %v557_v10  ;;  %v5699_v55 = vrot.slane %v5698_v34, 2 }
 0x2e0   :  { %5307 = vmatprep.subr.bf16.mxu1 %v8191_v39  ;;  %v5663_v39 = vrot.slane %v5662_v18, 2 }
 0x2e1   :  { %5103 = vmatpush1.bf16.msra.mxu0 %v8316_v38  ;;  %v569_v38 = vld [vmem:[#allocation5 + $0xd18] sm:$0xff]  ;;  %v5700_v56 = vadd.f32 %v5699_v55, %v5698_v34 }
 0x2e2   :  { %5104 = vmatprep.subr.bf16.mxu0 %v8325_v41  ;;  %v5657_v41 = vadd.f32 %v5656_v28, %v5655_v11  ;;  %v5664_v43 = vadd.f32 %v5663_v39, %v5662_v18  ;;  %v9771_v11 = vld [vmem:[#allocation5 + $0xdd8] sm:$0xff] }
 0x2e3   :  { %5308 = vmatpush1.bf16.msra.mxu1 %v8190_v40  ;;  %v573_v40 = vld [vmem:[#allocation5 + $0xd38] sm:$0xff] }
 0x2e4   :  { %5309 = vmatprep.subr.bf16.mxu1 %v8199_v60  ;;  %v8356_v60 = vcombine.low %v688_v25, %v692_v26  ;;  %v8238_v52 = vcombine.low %v569_v38, %v573_v40  ;;  %v5665_v54 = vrot.slane %v5664_v43, 1 }
 0x2e5   :  { %5105 = vmatpush1.bf16.msra.mxu0 %v8324_v44  ;;  %v8239_v44 = vcombine.high %v569_v38, %v573_v40  ;;  %v9797_v38 = vld [vmem:[#allocation5 + $0xe18] sm:$0xff] }
 0x2e6   :  { %5115 = vmatprep.subr.bf16.mxu0 %v8333_v47  ;;  %v577_v47 = vld [vmem:[#allocation5 + $0xd58] sm:$0xff]  ;;  %v5666_v31 = vadd.f32 %v5665_v54, %v5664_v43 }
 0x2e7   :  { %5310 = vmatpush1.bf16.msra.mxu1 %v8198_v46  ;;  %v708_v46 = vld [vmem:[#allocation5 + $0x1170] sm:$0xff]  ;;  %v8247_v59 = vcombine.high %v577_v47, %v581_v49  ;;  %v8246_v9 = vcombine.low %v577_v47, %v581_v49  ;;  %v9799_v40 = vld [vmem:[#allocation5 + $0xe38] sm:$0xff] }
 0x2e8   :  { %5320 = vmatprep.subr.bf16.mxu1 %v8207_v12  ;;  %5107 = vmatmul.mubr.bf16.vlgmr.msra.gmra.mrb[4].mxu0 %v9722_v53  ;;  %v5658_v12 = vrot.slane %v5657_v41, 1  ;;  %v8373_v58 = vcombine.high %v704_v45, %v708_v46 }
 0x2e9   :  { %5116 = vmatpush1.bf16.msra.mxu0 %v8332_v62  ;;  %5147 = vmatprep.mubr.bf16.mxu0 %v9725_v61  ;;  %v712_v62 = vld [vmem:[#allocation5 + $0x1190] sm:$0xff] }
 0x2ea   :  { %5312 = vmatmul.mubr.bf16.vlgmr.msra.gmra.mrb[8].mxu1 %v9706_v19  ;;  %5117 = vmatprep.subr.bf16.mxu0 %v8341_v2  ;;  %v8348_v19 = vcombine.low %v680_v6, %v684_v7  ;;  %v585_v2 = vld [vmem:[#allocation5 + $0xd98] sm:$0xff]  ;;  %v5659_v4 = vadd.f32 %v5658_v12, %v5657_v41  ;;  %v9767_v6 = vld [vmem:[#allocation5 + $0x11d0] sm:$0xff]  ;;  %v9801_v41 = vmul.f32 0.5, %v5666_v31  ;;  %v8271_v12 = vcombine.high %v9797_v38, %v9799_v40 }
 0x2eb   :  { %5321 = vmatpush1.bf16.msra.mxu1 %v8206_v63  ;;  %5352 = vmatprep.mubr.bf16.mxu1 %v9710_v23  ;;  %v5692_v23 = vrot.slane %v5691_v29, 2  ;;  %v716_v63 = vld [vmem:[#allocation5 + $0x11b0] sm:$0xff] }
 0x2ec   :  { %5322 = vmatprep.subr.bf16.mxu1 %v8215_v5  ;;  %v8372_v5 = vcombine.low %v704_v45, %v708_v46  ;;  %v9769_v7 = vld [vmem:[#allocation5 + $0x11f0] sm:$0xff]  ;;  %v8381_v10 = vcombine.high %v712_v62, %v716_v63  ;;  %v8380_v20 = vcombine.low %v712_v62, %v716_v63  ;;  %v9781_v35 = vmul.f32 0.5, %v5659_v4 }
 0x2ed   :  { %5118 = vmatpush1.bf16.msra.mxu0 %v8340_v13  ;;  %v5693_v51 = vadd.f32 %v5692_v23, %v5691_v29  ;;  %v9773_v13 = vld [vmem:[#allocation5 + $0xdf8] sm:$0xff]  ;;  %v8388_v25 = vcombine.low %v9767_v6, %v9769_v7  ;;  %v8389_v26 = vcombine.high %v9767_v6, %v9769_v7  ;;  %v736_v63 = vld [vmem:[#allocation5 + $0x1250] sm:$0xff] }
 0x2ee   :  { %5119 = vmatprep.subr.bf16.mxu0 %v8349_v15  ;;  %v8255_v15 = vcombine.high %v585_v2, %v589_v3  ;;  %v8263_v29 = vcombine.high %v9771_v11, %v9773_v13  ;;  %v8262_v45 = vcombine.low %v9771_v11, %v9773_v13  ;;  %v613_v6 = vld [vmem:[#allocation5 + $0xe78] sm:$0xff] }
 0x2ef   :  { %5323 = vmatpush1.bf16.msra.mxu1 %v8214_v14  ;;  %v5694_v8 = vrot.slane %v5693_v51, 1  ;;  %v5701_v14 = vrot.slane %v5700_v56, 1 }
 0x2f0   :  { %5324 = vmatprep.subr.bf16.mxu1 %v8223_v21  ;;  %v8254_v21 = vcombine.low %v585_v2, %v589_v3  ;;  %v740_v2 = vld [vmem:[#allocation5 + $0x1270] sm:$0xff] }
 0x2f1   :  { %5120 = vmatpush1.bf16.msra.mxu0 %v8348_v19 }
 0x2f2   :  { %5121 = vmatprep.subr.bf16.mxu0 %v8357_v32  ;;  %v5695_v32 = vadd.f32 %v5694_v8, %v5693_v51  ;;  %v5721_v51 = vmul.f32 %v9781_v35, %v9781_v35 }
 0x2f3   :  { %5325 = vmatpush1.bf16.msra.mxu1 %v8222_v30  ;;  %v9791_v30 = vld [vmem:[#allocation5 + $0x1210] sm:$0xff] }
 0x2f4   :  { %5326 = vmatprep.subr.bf16.mxu1 %v8231_v36  ;;  %v8397_v49 = vcombine.high %v9791_v30, %v732_v37 }
 0x2f5   :  { %5122 = vmatpush1.bf16.msra.mxu0 %v8356_v60  ;;  %v5702_v60 = vadd.f32 %v5701_v14, %v5700_v56  ;;  %v5722_v56 = vmul.f32 %v9801_v41, %v9801_v41  ;;  %v8405_v14 = vcombine.high %v736_v63, %v740_v2 }
 0x2f6   :  { %5123 = vmatprep.subr.bf16.mxu0 %v8365_v1 }
 0x2f7   :  { %5327 = vmatpush1.bf16.msra.mxu1 %v8230_v42  ;;  %v5718_v54 = vmul.f32 0.5, %v5702_v60 }
 0x2f8   :  { %5328 = vmatprep.subr.bf16.mxu1 %v8239_v44 }
 0x2f9   :  { %5124 = vmatpush1.bf16.msra.mxu0 %v8364_v50  ;;  %v5717_v50 = vmul.f32 0.5, %v5695_v32  ;;  %v617_v32 = vld [vmem:[#allocation5 + $0xe98] sm:$0xff] }
 0x2fa   :  { %5125 = vmatprep.subr.bf16.mxu0 %v8373_v58 }
 0x2fb   :  { %5329 = vmatpush1.bf16.msra.mxu1 %v8238_v52  ;;  %v5725_v11 = vsub.f32 %v5717_v50, %v5721_v51 }
 0x2fc   :  { %5330 = vmatprep.subr.bf16.mxu1 %v8247_v59 }
 0x2fd   :  { %v9775_v18 = vpop.f32.mrb[4].mxu1  ;;  %5126 = vmatpush1.bf16.msra.mxu0 %v8372_v5  ;;  %v609_v5 = vld [vmem:[#allocation5 + $0xe58] sm:$0xff] }
 0x2fe   :  { %v5667_v27 = vsel %vm5454_vm0, %v9775_v18, 0.0  ;;  %v5687_v28 = vmul.f32 %v9775_v18, %v9775_v18  ;;  %v9787_v19 = vpop.f32.mrb[5].mxu1  ;;  %5127 = vmatprep.subr.bf16.mxu0 %v8381_v10  ;;  %v8270_v10 = vcombine.low %v9797_v38, %v9799_v40 }
 0x2ff   :  { %v5668_v39 = vrot.slane %v5667_v27, 4  ;;  %v5674_v34 = vsel %vm5454_vm0, %v9787_v19, 0.0  ;;  %v5688_v36 = vmul.f32 %v9787_v19, %v9787_v19  ;;  %v4948_v33 = vpop.f32.mrb[6].mxu1  ;;  %5331 = vmatpush1.bf16.msra.mxu1 %v8246_v9  ;;  %v8396_v9 = vcombine.low %v9791_v30, %v732_v37  ;;  %v621_v30 = vld [vmem:[#allocation5 + $0xeb8] sm:$0xff] }
 0x300   :  { %v5703_v23 = vsel %vm5454_vm0, %v5687_v28, 0.0  ;;  %v5675_v42 = vrot.slane %v5674_v34, 4  ;;  %v4949_v1 = vpop.f32.mrb[7].mxu1  ;;  %5332 = vmatprep.subr.bf16.mxu1 %v8255_v15  ;;  %v5726_v15 = vsub.f32 %v5718_v54, %v5722_v56  ;;  %v748_v28 = vld [vmem:[#allocation5 + $0x12b0] sm:$0xff]  ;;  %v8278_v33 = vcombine.low %v609_v5, %v613_v6 }
 0x301   :  { %v5669_v43 = vadd.f32 %v5668_v39, %v5667_v27  ;;  %v5704_v55 = vrot.slane %v5703_v23, 4  ;;  %v5710_v44 = vsel %vm5454_vm0, %v5688_v36, 0.0  ;;  %5128 = vmatpush1.bf16.msra.mxu0 %v8380_v20  ;;  %v744_v27 = vld [vmem:[#allocation5 + $0x1290] sm:$0xff]  ;;  %v8404_v36 = vcombine.low %v736_v63, %v740_v2 }
 0x302   :  { %v5676_v46 = vadd.f32 %v5675_v42, %v5674_v34  ;;  %v5711_v47 = vrot.slane %v5710_v44, 4  ;;  %5129 = vmatprep.subr.bf16.mxu0 %v8389_v26  ;;  %v8279_v26 = vcombine.high %v609_v5, %v613_v6  ;;  %v5729_v37 = vadd.f32 1e-05, %v5725_v11  ;;  %v764_v63 = vld [vmem:[#allocation5 + $0x1330] sm:$0xff] }
 0x303   :  { %v5670_v52 = vrot.slane %v5669_v43, 2  ;;  %v5705_v58 = vadd.f32 %v5704_v55, %v5703_v23  ;;  %5333 = vmatpush1.bf16.msra.mxu1 %v8254_v21  ;;  %v8413_v60 = vcombine.high %v744_v27, %v748_v28  ;;  %v5730_v23 = vadd.f32 1e-05, %v5726_v15  ;;  %v752_v55 = vld [vmem:[#allocation5 + $0x12d0] sm:$0xff] }
 0x304   :  { %v5677_v59 = vrot.slane %v5676_v46, 2  ;;  %v5712_v62 = vadd.f32 %v5711_v47, %v5710_v44  ;;  %5334 = vmatprep.subr.bf16.mxu1 %v8263_v29  ;;  %v756_v44 = vld [vmem:[#allocation5 + $0x12f0] sm:$0xff]  ;;  %v625_v47 = vld [vmem:[#allocation5 + $0xed8] sm:$0xff]  ;;  %v8412_v51 = vcombine.low %v744_v27, %v748_v28  ;;  %9204 = vrsqrt.f32 %v5729_v37 }
 0x305   :  { %v5671_v3 = vadd.f32 %v5670_v52, %v5669_v43  ;;  %v5706_v4 = vrot.slane %v5705_v58, 2  ;;  %5130 = vmatpush1.bf16.msra.mxu0 %v8388_v25  ;;  %v8287_v43 = vcombine.high %v617_v32, %v621_v30  ;;  %v8421_v54 = vcombine.high %v752_v55, %v756_v44  ;;  %v772_v11 = vld [vmem:[#allocation5 + $0x1370] sm:$0xff] }
 0x306   :  { %v5678_v7 = vadd.f32 %v5677_v59, %v5676_v46  ;;  %v5713_v8 = vrot.slane %v5712_v62, 2  ;;  %5131 = vmatprep.subr.bf16.mxu0 %v8397_v49  ;;  %v629_v49 = vld [vmem:[#allocation5 + $0xef8] sm:$0xff]  ;;  %9206 = vrsqrt.f32 %v5730_v23  ;;  %v8420_v6 = vcombine.low %v752_v55, %v756_v44  ;;  %v780_v27 = vld [vmem:[#allocation5 + $0x13b0] sm:$0xff] }
 0x307   :  { %v5672_v13 = vrot.slane %v5671_v3, 1  ;;  %v5707_v31 = vadd.f32 %v5706_v4, %v5705_v58  ;;  %5335 = vmatpush1.bf16.msra.mxu1 %v8262_v45  ;;  %v8286_v58 = vcombine.low %v617_v32, %v621_v30  ;;  %v8295_v59 = vcombine.high %v625_v47, %v629_v49  ;;  %v637_v4 = vld [vmem:[#allocation5 + $0xf38] sm:$0xff]  ;;  %v788_v37 = vld [vmem:[#allocation5 + $0x13f0] sm:$0xff] }
 0x308   :  { %v5679_v20 = vrot.slane %v5678_v7, 1  ;;  %v5714_v21 = vadd.f32 %v5713_v8, %v5712_v62  ;;  %5336 = vmatprep.subr.bf16.mxu1 %v8271_v12  ;;  %v760_v62 = vld [vmem:[#allocation5 + $0x1310] sm:$0xff]  ;;  %v657_v23 = vld [vmem:[#allocation5 + $0xfd8] sm:$0xff] }
 0x309   :  { %v5673_v29 = vadd.f32 %v5672_v13, %v5671_v3  ;;  %v5708_v25 = vrot.slane %v5707_v31, 1  ;;  %5132 = vmatpush1.bf16.msra.mxu0 %v8396_v9  ;;  %v633_v3 = vld [vmem:[#allocation5 + $0xf18] sm:$0xff]  ;;  %v8429_v8 = vcombine.high %v760_v62, %v764_v63 }
 0x30a   :  { %v5680_v39 = vadd.f32 %v5679_v20, %v5678_v7  ;;  %v5715_v34 = vrot.slane %v5714_v21, 1  ;;  %5133 = vmatprep.subr.bf16.mxu0 %v8405_v14  ;;  %v8294_v7 = vcombine.low %v625_v47, %v629_v49  ;;  %v8303_v9 = vcombine.high %v633_v3, %v637_v4  ;;  %v641_v13 = vld [vmem:[#allocation5 + $0xf58] sm:$0xff]  ;;  %v792_v49 = vld [vmem:[#allocation5 + $0x1410] sm:$0xff] }
 0x30b   :  { %v9817_v38 = vmul.f32 0.5, %v5673_v29  ;;  %v5709_v40 = vadd.f32 %v5708_v25, %v5707_v31  ;;  %5337 = vmatpush1.bf16.msra.mxu1 %v8270_v10  ;;  %v768_v10 = vld [vmem:[#allocation5 + $0x1350] sm:$0xff]  ;;  %v645_v31 = vld [vmem:[#allocation5 + $0xf78] sm:$0xff]  ;;  %v8428_v14 = vcombine.low %v760_v62, %v764_v63  ;;  %v8302_v15 = vcombine.low %v633_v3, %v637_v4 }
 0x30c   :  { %v9819_v42 = vmul.f32 0.5, %v5680_v39  ;;  %v5716_v1 = vadd.f32 %v5715_v34, %v5714_v21  ;;  %5338 = vmatprep.subr.bf16.mxu1 %v8279_v26  ;;  %v8437_v20 = vcombine.high %v768_v10, %v772_v11  ;;  %v8311_v21 = vcombine.high %v641_v13, %v645_v31  ;;  %v776_v26 = vld [vmem:[#allocation5 + $0x1390] sm:$0xff]  ;;  %v649_v29 = vld [vmem:[#allocation5 + $0xf98] sm:$0xff] }
 0x30d   :  { %v5719_v45 = vmul.f32 0.5, %v5709_v40  ;;  %v5723_v46 = vmul.f32 %v9817_v38, %v9817_v38  ;;  %5134 = vmatpush1.bf16.msra.mxu0 %v8404_v36  ;;  %v653_v25 = vld [vmem:[#allocation5 + $0xfb8] sm:$0xff]  ;;  %v8436_v30 = vcombine.low %v768_v10, %v772_v11  ;;  %v8310_v39 = vcombine.low %v641_v13, %v645_v31  ;;  %v800_v4 = vld [vmem:[#allocation5 + $0x1450] sm:$0xff] }
 0x30e   :  { %v5720_v12 = vmul.f32 0.5, %v5716_v1  ;;  %v5724_v50 = vmul.f32 %v9819_v42, %v9819_v42  ;;  %5135 = vmatprep.subr.bf16.mxu0 %v8413_v60  ;;  %v9205_v28 = vpop.eup %9204  ;;  %v8445_v34 = vcombine.high %v776_v26, %v780_v27  ;;  %v8319_v36 = vcombine.high %v649_v29, %v653_v25  ;;  %v661_v1 = vld [vmem:[#allocation5 + $0xff8] sm:$0xff]  ;;  %v808_v31 = vld [vmem:[#allocation5 + $0x1490] sm:$0xff] }
 0x30f   :  { %v5727_v52 = vsub.f32 %v5719_v45, %v5723_v46  ;;  %5339 = vmatpush1.bf16.msra.mxu1 %v8278_v33  ;;  %v784_v33 = vld [vmem:[#allocation5 + $0x13d0] sm:$0xff]  ;;  %v8444_v55 = vcombine.low %v776_v26, %v780_v27  ;;  %v8318_v45 = vcombine.low %v649_v29, %v653_v25  ;;  %v8327_v47 = vcombine.high %v657_v23, %v661_v1  ;;  %v681_v26 = vld [vmem:[#allocation5 + $0x1098] sm:$0xff] }
 0x310   :  { %v5728_v56 = vsub.f32 %v5720_v12, %v5724_v50  ;;  %5340 = vmatprep.subr.bf16.mxu1 %v8287_v43  ;;  %v9207_v32 = vpop.eup %9206  ;;  %v8453_v46 = vcombine.high %v784_v33, %v788_v37  ;;  %v796_v12 = vld [vmem:[#allocation5 + $0x1430] sm:$0xff]  ;;  %v9835_v10 = vsub.s32 0, %v9648_v48  ;;  %v9838_v11 = vsub.s32 1, %v9648_v48  ;;  %v685_v27 = vld [vmem:[#allocation5 + $0x10b8] sm:$0xff] }
 0x311   :  { %v5731_v2 = vadd.f32 1e-05, %v5727_v52  ;;  %5136 = vmatpush1.bf16.msra.mxu0 %v8412_v51  ;;  %v5741_v60 = vcombine.low %v9205_v28, %v9207_v32  ;;  %v665_v52 = vld [vmem:[#allocation5 + $0x1018] sm:$0xff]  ;;  %v8461_v62 = vcombine.high %v792_v49, %v796_v12  ;;  %v8460_v13 = vcombine.low %v792_v49, %v796_v12  ;;  %v824_v49 = vld [vmem:[#allocation5 + $0x1510] sm:$0xff] }
 0x312   :  { %v5732_v5 = vadd.f32 1e-05, %v5728_v56  ;;  %5137 = vmatprep.subr.bf16.mxu0 %v8421_v54  ;;  %v8452_v54 = vcombine.low %v784_v33, %v788_v37  ;;  %v5443_v63 = vld [vmem:[#allocation8] ss:$8 sm:$0xf] }
 0x313   :  { %9208 = vrsqrt.f32 %v5731_v2  ;;  %5341 = vmatpush1.bf16.msra.mxu1 %v8286_v58  ;;  %v5749_v50 = vrot.slane %v5741_v60, %v9651_v57  ;;  %v669_v58 = vld [vmem:[#allocation5 + $0x1038] sm:$0xff]  ;;  %v9828_v2 = vsub.s32 2, %v9648_v48  ;;  %v816_v60 = vld [vmem:[#allocation5 + $0x14d0] sm:$0xff] }
 0x314   :  { %9210 = vrsqrt.f32 %v5732_v5  ;;  %5342 = vmatprep.subr.bf16.mxu1 %v8295_v59  ;;  %v8326_v59 = vcombine.low %v657_v23, %v661_v1  ;;  %v8335_v3 = vcombine.high %v665_v52, %v669_v58  ;;  %v804_v5 = vld [vmem:[#allocation5 + $0x1470] sm:$0xff] }
 0x315   :  { %5138 = vmatpush1.bf16.msra.mxu0 %v8420_v6  ;;  %v9831_v6 = vsub.s32 3, %v9648_v48  ;;  %v8468_v28 = vcombine.low %v800_v4, %v804_v5  ;;  %v820_v23 = vld [vmem:[#allocation5 + $0x14f0] sm:$0xff] }
 0x316   :  { %5139 = vmatprep.subr.bf16.mxu0 %v8429_v8  ;;  %v673_v8 = vld [vmem:[#allocation5 + $0x1058] sm:$0xff] }
 0x317   :  { %5343 = vmatpush1.bf16.msra.mxu1 %v8294_v7 }
 0x318   :  { %5344 = vmatprep.subr.bf16.mxu1 %v8303_v9  ;;  %v677_v9 = vld [vmem:[#allocation5 + $0x1078] sm:$0xff] }
 0x319   :  { %5140 = vmatpush1.bf16.msra.mxu0 %v8428_v14  ;;  %v8343_v29 = vcombine.high %v673_v8, %v677_v9 }
 0x31a   :  { %5141 = vmatprep.subr.bf16.mxu0 %v8437_v20  ;;  %v8469_v20 = vcombine.high %v800_v4, %v804_v5 }
 0x31b   :  { %5345 = vmatpush1.bf16.msra.mxu1 %v8302_v15  ;;  %v8334_v15 = vcombine.low %v665_v52, %v669_v58 }
 0x31c   :  { %5346 = vmatprep.subr.bf16.mxu1 %v8311_v21  ;;  %v812_v21 = vld [vmem:[#allocation5 + $0x14b0] sm:$0xff] }
 0x31d   :  { %v9209_v40 = vpop.eup %9208  ;;  %5142 = vmatpush1.bf16.msra.mxu0 %v8436_v30 }
 0x31e   :  { %v9211_v43 = vpop.eup %9210  ;;  %5143 = vmatprep.subr.bf16.mxu0 %v8445_v34  ;;  %v8477_v34 = vcombine.high %v808_v31, %v812_v21 }
 0x31f   :  { %v5742_v44 = vcombine.low %v9209_v40, %v9211_v43  ;;  %5347 = vmatpush1.bf16.msra.mxu1 %v8310_v39  ;;  %v8342_v39 = vcombine.low %v673_v8, %v677_v9 }
 0x320   :  { %5348 = vmatprep.subr.bf16.mxu1 %v8319_v36  ;;  %v8351_v36 = vcombine.high %v681_v26, %v685_v27 }
 0x321   :  { %v5756_v51 = vrot.slane %v5742_v44, %v9651_v57  ;;  %5144 = vmatpush1.bf16.msra.mxu0 %v8444_v55  ;;  %v693_v44 = vld [vmem:[#allocation5 + $0x10f8] sm:$0xff] }
 0x322   :  { %5145 = vmatprep.subr.bf16.mxu0 %v8453_v46 }
 0x323   :  { %v5757_v56 = vcombine.low %v5749_v50, %v5756_v51  ;;  %5349 = vmatpush1.bf16.msra.mxu1 %v8318_v45  ;;  %v697_v50 = vld [vmem:[#allocation5 + $0x1118] sm:$0xff] }
 0x324   :  { %5350 = vmatprep.subr.bf16.mxu1 %v8327_v47  ;;  %v8350_v47 = vcombine.low %v681_v26, %v685_v27  ;;  %v701_v51 = vld [vmem:[#allocation5 + $0x1138] sm:$0xff] }
 0x325   :  { %v5764_v7 = vrot.slane %v5757_v56, %v9651_v57  ;;  %5146 = vmatpush1.bf16.msra.mxu0 %v8452_v54  ;;  %v832_v54 = vld [vmem:[#allocation5 + $0x1550] sm:$0xff] }
 0x326   :  { %5156 = vmatprep.subr.bf16.mxu0 %v8461_v62  ;;  %v5445_v56 = vld [vmem:[#allocation8 + $0x1] ss:$8 sm:$0xf] }
 0x327   :  { %v5766_v14 = vmul.f32 %v5764_v7, %v5443_v63  ;;  %5351 = vmatpush1.bf16.msra.mxu1 %v8326_v59  ;;  %v8367_v59 = vcombine.high %v697_v50, %v701_v51  ;;  %v836_v62 = vld [vmem:[#allocation5 + $0x1570] sm:$0xff]  ;;  %v705_v63 = vld [vmem:[#allocation5 + $0x1158] sm:$0xff]  ;;  %v8366_v7 = vcombine.low %v697_v50, %v701_v51 }
 0x328   :  { %5361 = vmatprep.subr.bf16.mxu1 %v8335_v3  ;;  %5148 = vmatmul.mubr.bf16.vlgmr.msra.gmra.mrb[4].mxu0 %v9665_v16  ;;  %v709_v3 = vld [vmem:[#allocation5 + $0x1178] sm:$0xff]  ;;  %v8501_v9 = vcombine.high %v832_v54, %v836_v62 }
 0x329   :  { %v5779_v25 = vrot.slane %v5766_v14, %v9828_v2  ;;  %v5783_v32 = vrot.slane %v5766_v14, %v9831_v6  ;;  %v5771_v48 = vrot.slane %v5766_v14, %v9835_v10  ;;  %v5775_v30 = vrot.slane %v5766_v14, %v9838_v11  ;;  %5157 = vmatpush1.bf16.msra.mxu0 %v8460_v13  ;;  %v840_v14 = vld [vmem:[#allocation5 + $0x1590] sm:$0xff]  ;;  %v745_v51 = vld [vmem:[#allocation5 + $0x1298] sm:$0xff] }
 0x32a   :  { %5353 = vmatmul.mubr.bf16.vlgmr.msra.gmra.mrb[8].mxu1 %v9722_v53  ;;  %5158 = vmatprep.subr.bf16.mxu0 %v8469_v20  ;;  %v8375_v13 = vcombine.high %v705_v63, %v709_v3 }
 0x32b   :  { %v5790_v33 = vmul.f32 %v5779_v25, %v9817_v38  ;;  %v5791_v37 = vmul.f32 %v5783_v32, %v9819_v42  ;;  %v9849_v40 = vmul.f32 %v5783_v32, %v9787_v19  ;;  %5362 = vmatpush1.bf16.msra.mxu1 %v8334_v15  ;;  %5188 = vmatprep.mubr.bf16.mxu0 %v9484_v0  ;;  %v689_v38 = vld [vmem:[#allocation5 + $0x10d8] sm:$0xff]  ;;  %v844_v15 = vld [vmem:[#allocation5 + $0x15b0] sm:$0xff] }
 0x32c   :  { %5363 = vmatprep.subr.bf16.mxu1 %v8343_v29  ;;  %v5788_v1 = vmul.f32 %v5771_v48, %v9781_v35  ;;  %v5789_v53 = vmul.f32 %v5775_v30, %v9801_v41  ;;  %v5823_v43 = vmul.f32 %v9751_v22, %v5775_v30  ;;  %5393 = vmatprep.mubr.bf16.mxu1 %v9725_v61  ;;  %v828_v22 = vld [vmem:[#allocation5 + $0x1530] sm:$0xff]  ;;  %v713_v29 = vld [vmem:[#allocation5 + $0x1198] sm:$0xff] }
 0x32d   :  { %v5797_v55 = vcombine.low %v5790_v33, %v5791_v37  ;;  %v5824_v19 = vmul.f32 %v5779_v25, %v9775_v18  ;;  %5159 = vmatpush1.bf16.msra.mxu0 %v8468_v28  ;;  %v8476_v42 = vcombine.low %v808_v31, %v812_v21  ;;  %v8485_v35 = vcombine.high %v816_v60, %v820_v23  ;;  %v717_v25 = vld [vmem:[#allocation5 + $0x11b8] sm:$0xff]  ;;  %v848_v33 = vld [vmem:[#allocation5 + $0x15d0] sm:$0xff] }
 0x32e   :  { %v5796_v45 = vcombine.low %v5788_v1, %v5789_v53  ;;  %5160 = vmatprep.subr.bf16.mxu0 %v8477_v34  ;;  %v8359_v41 = vcombine.high %v689_v38, %v693_v44  ;;  %v8484_v61 = vcombine.low %v816_v60, %v820_v23  ;;  %v8358_v52 = vcombine.low %v689_v38, %v693_v44  ;;  %v852_v37 = vld [vmem:[#allocation5 + $0x15f0] sm:$0xff]  ;;  %v721_v60 = vld [vmem:[#allocation5 + $0x11d8] sm:$0xff] }
 0x32f   :  { %v5811_v46 = vrot.slane %v5797_v55, %v9651_v57  ;;  %5364 = vmatpush1.bf16.msra.mxu1 %v8342_v39  ;;  %v8493_v58 = vcombine.high %v824_v49, %v828_v22  ;;  %v8492_v5 = vcombine.low %v824_v49, %v828_v22  ;;  %v5822_v31 = vmul.f32 %v9748_v17, %v5771_v48  ;;  %v725_v23 = vld [vmem:[#allocation5 + $0x11f8] sm:$0xff]  ;;  %v8905_v22 = vld [vmem:[#allocation7 + $0x24] ss:$16 sps:$4 sm:$0xff]  }
 0x330   :  { %5365 = vmatprep.subr.bf16.mxu1 %v8351_v36  ;;  %v5804_v12 = vrot.slane %v5796_v45, %v9651_v57  ;;  %v8500_v28 = vcombine.low %v832_v54, %v836_v62  ;;  %v8374_v39 = vcombine.low %v705_v63, %v709_v3  ;;  %v8509_v34 = vcombine.high %v840_v14, %v844_v15  ;;  %v729_v55 = vld [vmem:[#allocation5 + $0x1218] sm:$0xff]  ;;  %v8906_v62 = vld [vmem:[#allocation7 + $0x40] ss:$16 sps:$4 sm:$0xff]   ;;  %v8911_v3 = vld [vmem:[#allocation7 + $0x64] ss:$16 sps:$4 sm:$0xff]  }
 0x331   :  { %5161 = vmatpush1.bf16.msra.mxu0 %v8476_v42  ;;  %v8383_v36 = vcombine.high %v713_v29, %v717_v25  ;;  %v8508_v1 = vcombine.low %v840_v14, %v844_v15  ;;  %v8382_v53 = vcombine.low %v713_v29, %v717_v25  ;;  %v733_v38 = vld [vmem:[#allocation5 + $0x1238] sm:$0xff]  ;;  %v8516_v44 = vcombine.low %v848_v33, %v852_v37  ;;  %v8902_v42 = vld [vmem:[#allocation7 + $0x4] ss:$16 sps:$4 sm:$0xff]   ;;  %v8915_v25 = vld [vmem:[#allocation7 + $0xa0] ss:$16 sps:$4 sm:$0xff]  }
 0x332   :  { %v5812_v18 = vcombine.low %v5804_v12, %v5811_v46  ;;  %5162 = vmatprep.subr.bf16.mxu0 %v8485_v35  ;;  %v8399_v45 = vcombine.high %v729_v55, %v733_v38  ;;  %v741_v35 = vld [vmem:[#allocation5 + $0x1278] sm:$0xff]  ;;  %v8398_v49 = vcombine.low %v729_v55, %v733_v38  ;;  %v8926_v38 = vld [vmem:[#allocation7 + $0x104] ss:$16 sps:$4 sm:$0xff]  }
 0x333   :  { %5366 = vmatpush1.bf16.msra.mxu1 %v8350_v47  ;;  %v737_v47 = vld [vmem:[#allocation5 + $0x1258] sm:$0xff] }
 0x334   :  { %5367 = vmatprep.subr.bf16.mxu1 %v8359_v41  ;;  %v5819_v4 = vrot.slane %v5812_v18, %v9651_v57  ;;  %v8900_v41 = vld [vmem:[#allocation7] ss:$16 sps:$4 sm:$0xff]   ;;  %v8407_v50 = vcombine.high %v737_v47, %v741_v35  ;;  %v769_v14 = vld [vmem:[#allocation5 + $0x1358] sm:$0xff] }
 0x335   :  { %5163 = vmatpush1.bf16.msra.mxu0 %v8484_v61  ;;  %v749_v61 = vld [vmem:[#allocation5 + $0x12b8] sm:$0xff]  ;;  %v8903_v18 = vld [vmem:[#allocation7 + $0x20] ss:$16 sps:$4 sm:$0xff]  }
 0x336   :  { %v5821_v8 = vsub.f32 %v5445_v56, %v5819_v4  ;;  %5164 = vmatprep.subr.bf16.mxu0 %v8493_v58  ;;  %v8908_v58 = vld [vmem:[#allocation7 + $0x44] ss:$16 sps:$4 sm:$0xff]   ;;  %v8415_v54 = vcombine.high %v745_v51, %v749_v61  ;;  %v753_v56 = vld [vmem:[#allocation5 + $0x12d8] sm:$0xff]  ;;  %v8414_v63 = vcombine.low %v745_v51, %v749_v61 }
 0x337   :  { %5368 = vmatpush1.bf16.msra.mxu1 %v8358_v52  ;;  %v8406_v52 = vcombine.low %v737_v47, %v741_v35  ;;  %v773_v15 = vld [vmem:[#allocation5 + $0x1378] sm:$0xff]  ;;  %v8929_v47 = vld [vmem:[#allocation7 + $0x124] ss:$16 sps:$4 sm:$0xff]  }
 0x338   :  { %5369 = vmatprep.subr.bf16.mxu1 %v8367_v59  ;;  %v5834_v20 = vrot.slane %v5821_v8, %v9838_v11  ;;  %v5830_v21 = vrot.slane %v5821_v8, %v9835_v10  ;;  %v5842_v26 = vrot.slane %v5821_v8, %v9831_v6  ;;  %v5838_v27 = vrot.slane %v5821_v8, %v9828_v2  ;;  %v757_v59 = vld [vmem:[#allocation5 + $0x12f8] sm:$0xff]  ;;  %v8909_v8 = vld [vmem:[#allocation7 + $0x60] ss:$16 sps:$4 sm:$0xff]   ;;  %v8932_v51 = vld [vmem:[#allocation7 + $0x144] ss:$16 sps:$4 sm:$0xff]  }
 0x339   :  { %5165 = vmatpush1.bf16.msra.mxu0 %v8492_v5  ;;  %v8423_v4 = vcombine.high %v753_v56, %v757_v59  ;;  %v761_v5 = vld [vmem:[#allocation5 + $0x1318] sm:$0xff] }
 0x33a   :  { %v5848_v32 = vadd.f32 %v5834_v20, %v5823_v43  ;;  %v9865_v30 = vadd.f32 %v5830_v21, %v5822_v31  ;;  %v9868_v17 = vadd.f32 %v5842_v26, %v9849_v40  ;;  %v9870_v48 = vadd.f32 %v5838_v27, %v5824_v19  ;;  %5166 = vmatprep.subr.bf16.mxu0 %v8501_v9  ;;  %v8912_v20 = vld [vmem:[#allocation7 + $0x80] ss:$16 sps:$4 sm:$0xff]   ;;  %v8917_v26 = vld [vmem:[#allocation7 + $0xa4] ss:$16 sps:$4 sm:$0xff]   ;;  %v781_v29 = vld [vmem:[#allocation5 + $0x13b8] sm:$0xff] }
 0x33b   :  { %5370 = vmatpush1.bf16.msra.mxu1 %v8366_v7  ;;  %v8517_v43 = vcombine.high %v848_v33, %v852_v37  ;;  %v8391_v40 = vcombine.high %v721_v60, %v725_v23  ;;  %v8390_v19 = vcombine.low %v721_v60, %v725_v23  ;;  %v765_v7 = vld [vmem:[#allocation5 + $0x1338] sm:$0xff]  ;;  %v8422_v9 = vcombine.low %v753_v56, %v757_v59  ;;  %v8918_v37 = vld [vmem:[#allocation7 + $0xc0] ss:$16 sps:$4 sm:$0xff]   ;;  %v8923_v23 = vld [vmem:[#allocation7 + $0xe4] ss:$16 sps:$4 sm:$0xff]  }
 0x33c   :  { %5371 = vmatprep.subr.bf16.mxu1 %v8375_v13  ;;  %v5852_v46 = vmax.f32 %v5848_v32, 0.0  ;;  %v8914_v13 = vld [vmem:[#allocation7 + $0x84] ss:$16 sps:$4 sm:$0xff]   ;;  %v8431_v31 = vcombine.high %v761_v5, %v765_v7  ;;  %v8430_v21 = vcombine.low %v761_v5, %v765_v7  ;;  %v8439_v27 = vcombine.high %v769_v14, %v773_v15  ;;  %v789_v33 = vld [vmem:[#allocation5 + $0x13f8] sm:$0xff] }
 0x33d   :  { %5167 = vmatpush1.bf16.msra.mxu0 %v8500_v28  ;;  %v777_v28 = vld [vmem:[#allocation5 + $0x1398] sm:$0xff]  ;;  %v8438_v32 = vcombine.low %v769_v14, %v773_v15  ;;  %v8935_v56 = vld [vmem:[#allocation7 + $0x164] ss:$16 sps:$4 sm:$0xff]  }
 0x33e   :  { %5168 = vmatprep.subr.bf16.mxu0 %v8509_v34  ;;  %v9872_v12 = vpack.c.bf16 %v5852_v46, %v5852_v46  ;;  %v8447_v34 = vcombine.high %v777_v28, %v781_v29  ;;  %v8446_v60 = vcombine.low %v777_v28, %v781_v29  ;;  %v825_v59 = vld [vmem:[#allocation5 + $0x1518] sm:$0xff] }
 0x33f   :  { %5372 = vmatpush1.bf16.msra.mxu1 %v8374_v39  ;;  %v8920_v39 = vld [vmem:[#allocation7 + $0xc4] ss:$16 sps:$4 sm:$0xff]   ;;  %v833_v5 = vld [vmem:[#allocation5 + $0x1558] sm:$0xff] }
 0x340   :  { %5373 = vmatprep.subr.bf16.mxu1 %v8383_v36  ;;  %v785_v36 = vld [vmem:[#allocation5 + $0x13d8] sm:$0xff] }
 0x341   :  { %5169 = vmatpush1.bf16.msra.mxu0 %v8508_v1  ;;  %v8455_v1 = vcombine.high %v785_v36, %v789_v33  ;;  %v8454_v55 = vcombine.low %v785_v36, %v789_v33  ;;  %v837_v7 = vld [vmem:[#allocation5 + $0x1578] sm:$0xff]  ;;  %v8945_v36 = vld [vmem:[#allocation7 + $0x1e0] ss:$16 sps:$4 sm:$0xff]  }
 0x342   :  { %5170 = vmatprep.subr.bf16.mxu0 %v8517_v43  ;;  %v797_v43 = vld [vmem:[#allocation5 + $0x1438] sm:$0xff] }
 0x343   :  { %5374 = vmatpush1.bf16.msra.mxu1 %v8382_v53  ;;  %v793_v53 = vld [vmem:[#allocation5 + $0x1418] sm:$0xff] }
 0x344   :  { %5375 = vmatprep.subr.bf16.mxu1 %v8391_v40  ;;  %v8921_v40 = vld [vmem:[#allocation7 + $0xe0] ss:$16 sps:$4 sm:$0xff]   ;;  %v8462_v46 = vcombine.low %v793_v53, %v797_v43  ;;  %v841_v14 = vld [vmem:[#allocation5 + $0x1598] sm:$0xff] }
 0x345   :  { %5171 = vmatpush1.bf16.msra.mxu0 %v8516_v44  ;;  %v8463_v44 = vcombine.high %v793_v53, %v797_v43  ;;  %v845_v15 = vld [vmem:[#allocation5 + $0x15b8] sm:$0xff]  ;;  %v8948_v53 = vld [vmem:[#allocation7 + $0x200] ss:$16 sps:$4 sm:$0xff]  }
 0x346   :  { %6627 = vmatprep.subr.bf16.mxu0 %v8902_v42  ;;  %v805_v42 = vld [vmem:[#allocation5 + $0x1478] sm:$0xff] }
 0x347   :  { %5376 = vmatpush1.bf16.msra.mxu1 %v8390_v19  ;;  %v801_v19 = vld [vmem:[#allocation5 + $0x1458] sm:$0xff] }
 0x348   :  { %5377 = vmatprep.subr.bf16.mxu1 %v8399_v45  ;;  %5189 = vmatmul.mubr.bf16.vlgmr.msra.gmra.mrb[4].mxu0 %v9670_v24  ;;  %v8924_v45 = vld [vmem:[#allocation7 + $0x100] ss:$16 sps:$4 sm:$0xff]   ;;  %v8471_v35 = vcombine.high %v801_v19, %v805_v42  ;;  %v849_v28 = vld [vmem:[#allocation5 + $0x15d8] sm:$0xff] }
 0x349   :  { %6628 = vmatpush1.bf16.msra.mxu0 %v8900_v41  ;;  %6659 = vmatprep.mubr.bf16.mxu0 %v9872_v12  ;;  %v809_v41 = vld [vmem:[#allocation5 + $0x1498] sm:$0xff] }
 0x34a   :  { %6629 = vmatprep.subr.bf16.mxu0 %v8905_v22  ;;  %v8927_v22 = vld [vmem:[#allocation7 + $0x120] ss:$16 sps:$4 sm:$0xff]   ;;  %v853_v29 = vld [vmem:[#allocation5 + $0x15f8] sm:$0xff] }
 0x34b   :  { %5378 = vmatpush1.bf16.msra.mxu1 %v8398_v49  ;;  %v813_v49 = vld [vmem:[#allocation5 + $0x14b8] sm:$0xff]  ;;  %v8518_v33 = vcombine.low %v849_v28, %v853_v29 }
 0x34c   :  { %5379 = vmatprep.subr.bf16.mxu1 %v8407_v50  ;;  %v8470_v50 = vcombine.low %v801_v19, %v805_v42  ;;  %v8479_v61 = vcombine.high %v809_v41, %v813_v49  ;;  %v8962_v19 = vld [vmem:[#allocation7 + $0x244] ss:$16 sps:$4 sm:$0xff]   ;;  %v8965_v42 = vld [vmem:[#allocation7 + $0x4c] ss:$16 sps:$4 sm:$0xff]  }
 0x34d   :  { %6630 = vmatpush1.bf16.msra.mxu0 %v8903_v18  ;;  %v817_v18 = vld [vmem:[#allocation5 + $0x14d8] sm:$0xff] }
 0x34e   :  { %6631 = vmatprep.subr.bf16.mxu0 %v8908_v58  ;;  %v8930_v58 = vld [vmem:[#allocation7 + $0x140] ss:$16 sps:$4 sm:$0xff]  }
 0x34f   :  { %5380 = vmatpush1.bf16.msra.mxu1 %v8406_v52  ;;  %v821_v52 = vld [vmem:[#allocation5 + $0x14f8] sm:$0xff] }
 0x350   :  { %5381 = vmatprep.subr.bf16.mxu1 %v8415_v54  ;;  %v8478_v54 = vcombine.low %v809_v41, %v813_v49  ;;  %v8969_v41 = vld [vmem:[#allocation7 + $0x68] ss:$16 sps:$4 sm:$0xff]   ;;  %v8974_v49 = vld [vmem:[#allocation7 + $0x284] ss:$16 sps:$4 sm:$0xff]  }
 0x351   :  { %6632 = vmatpush1.bf16.msra.mxu0 %v8906_v62  ;;  %v829_v62 = vld [vmem:[#allocation5 + $0x1538] sm:$0xff] }
 0x352   :  { %6633 = vmatprep.subr.bf16.mxu0 %v8911_v3  ;;  %v8486_v3 = vcombine.low %v817_v18, %v821_v52 }
 0x353   :  { %5382 = vmatpush1.bf16.msra.mxu1 %v8414_v63  ;;  %v8933_v63 = vld [vmem:[#allocation7 + $0x160] ss:$16 sps:$4 sm:$0xff]  }
 0x354   :  { %5383 = vmatprep.subr.bf16.mxu1 %v8423_v4  ;;  %v8938_v4 = vld [vmem:[#allocation7 + $0x184] ss:$16 sps:$4 sm:$0xff]  }
 0x355   :  { %6634 = vmatpush1.bf16.msra.mxu0 %v8909_v8  ;;  %v8936_v8 = vld [vmem:[#allocation7 + $0x180] ss:$16 sps:$4 sm:$0xff]  }
 0x356   :  { %6635 = vmatprep.subr.bf16.mxu0 %v8914_v13  ;;  %v8941_v13 = vld [vmem:[#allocation7 + $0x1a4] ss:$16 sps:$4 sm:$0xff]  }
 0x357   :  { %5384 = vmatpush1.bf16.msra.mxu1 %v8422_v9  ;;  %v8494_v9 = vcombine.low %v825_v59, %v829_v62 }
 0x358   :  { %5385 = vmatprep.subr.bf16.mxu1 %v8431_v31  ;;  %v8503_v31 = vcombine.high %v833_v5, %v837_v7 }
 0x359   :  { %6636 = vmatpush1.bf16.msra.mxu0 %v8912_v20  ;;  %v8939_v20 = vld [vmem:[#allocation7 + $0x1a0] ss:$16 sps:$4 sm:$0xff]  }
 0x35a   :  { %6637 = vmatprep.subr.bf16.mxu0 %v8917_v26  ;;  %v8944_v26 = vld [vmem:[#allocation7 + $0x1c4] ss:$16 sps:$4 sm:$0xff]  }
 0x35b   :  { %5386 = vmatpush1.bf16.msra.mxu1 %v8430_v21  ;;  %v8502_v21 = vcombine.low %v833_v5, %v837_v7  ;;  %v8996_v5 = vld [vmem:[#allocation7 + $0x300] ss:$16 sps:$4 sm:$0xff]   ;;  %v8999_v7 = vld [vmem:[#allocation7 + $0x108] ss:$16 sps:$4 sm:$0xff]  }
 0x35c   :  { %5387 = vmatprep.subr.bf16.mxu1 %v8439_v27  ;;  %v8511_v27 = vcombine.high %v841_v14, %v845_v15 }
 0x35d   :  { %6638 = vmatpush1.bf16.msra.mxu0 %v8915_v25  ;;  %v8942_v25 = vld [vmem:[#allocation7 + $0x1c0] ss:$16 sps:$4 sm:$0xff]  }
 0x35e   :  { %6639 = vmatprep.subr.bf16.mxu0 %v8920_v39  ;;  %v8947_v39 = vld [vmem:[#allocation7 + $0x1e4] ss:$16 sps:$4 sm:$0xff]  }
 0x35f   :  { %5388 = vmatpush1.bf16.msra.mxu1 %v8438_v32  ;;  %v8510_v32 = vcombine.low %v841_v14, %v845_v15  ;;  %v9010_v14 = vld [vmem:[#allocation7 + $0x344] ss:$16 sps:$4 sm:$0xff]   ;;  %v9013_v15 = vld [vmem:[#allocation7 + $0x14c] ss:$16 sps:$4 sm:$0xff]  }
 0x360   :  { %5389 = vmatprep.subr.bf16.mxu1 %v8447_v34  ;;  %v8519_v34 = vcombine.high %v849_v28, %v853_v29  ;;  %v9014_v28 = vld [vmem:[#allocation7 + $0x360] ss:$16 sps:$4 sm:$0xff]   ;;  %v9017_v29 = vld [vmem:[#allocation7 + $0x168] ss:$16 sps:$4 sm:$0xff]  }
 0x361   :  { %6640 = vmatpush1.bf16.msra.mxu0 %v8918_v37  ;;  %v5851_v37 = vmax.f32 %v9865_v30, 0.0  ;;  %v8954_v30 = vld [vmem:[#allocation7 + $0x220] ss:$16 sps:$4 sm:$0xff]  }
 0x362   :  { %6641 = vmatprep.subr.bf16.mxu0 %v8923_v23  ;;  %v8953_v23 = vld [vmem:[#allocation7 + $0xc] ss:$16 sps:$4 sm:$0xff]  }
 0x363   :  { %5390 = vmatpush1.bf16.msra.mxu1 %v8446_v60  ;;  %v8950_v60 = vld [vmem:[#allocation7 + $0x204] ss:$16 sps:$4 sm:$0xff]   ;;  %v9880_v43 = vpack.c.bf16 %v5851_v37, %v5851_v37  ;;  %v9026_v37 = vld [vmem:[#allocation7 + $0x3a0] ss:$16 sps:$4 sm:$0xff]  }
 0x364   :  { %5391 = vmatprep.subr.bf16.mxu1 %v8455_v1  ;;  %v5854_v1 = vmax.f32 %v9868_v17, 0.0  ;;  %v8957_v17 = vld [vmem:[#allocation7 + $0x28] ss:$16 sps:$4 sm:$0xff]  }
 0x365   :  { %6642 = vmatpush1.bf16.msra.mxu0 %v8921_v40  ;;  %v8951_v40 = vld [vmem:[#allocation7 + $0x8] ss:$16 sps:$4 sm:$0xff]  }
 0x366   :  { %6643 = vmatprep.subr.bf16.mxu0 %v8926_v38  ;;  %v9883_v38 = vpack.c.bf16 %v5854_v1, %v5854_v1  ;;  %v9037_v1 = vld [vmem:[#allocation7 + $0x1cc] ss:$16 sps:$4 sm:$0xff]  }
 0x367   :  { %5392 = vmatpush1.bf16.msra.mxu1 %v8454_v55  ;;  %v8956_v55 = vld [vmem:[#allocation7 + $0x224] ss:$16 sps:$4 sm:$0xff]  }
 0x368   :  { %5402 = vmatprep.subr.bf16.mxu1 %v8463_v44  ;;  %v8959_v44 = vld [vmem:[#allocation7 + $0x2c] ss:$16 sps:$4 sm:$0xff]  }
 0x369   :  { %6644 = vmatpush1.bf16.msra.mxu0 %v8924_v45  ;;  %v8960_v45 = vld [vmem:[#allocation7 + $0x240] ss:$16 sps:$4 sm:$0xff]  }
 0x36a   :  { %5394 = vmatmul.mubr.bf16.vlgmr.msra.gmra.mrb[8].mxu1 %v9665_v16  ;;  %6645 = vmatprep.subr.bf16.mxu0 %v8929_v47  ;;  %v8487_v16 = vcombine.high %v817_v18, %v821_v52  ;;  %v8968_v47 = vld [vmem:[#allocation7 + $0x264] ss:$16 sps:$4 sm:$0xff]   ;;  %v8978_v18 = vld [vmem:[#allocation7 + $0x2a0] ss:$16 sps:$4 sm:$0xff]   ;;  %v8981_v52 = vld [vmem:[#allocation7 + $0xa8] ss:$16 sps:$4 sm:$0xff]  }
 0x36b   :  { %5403 = vmatpush1.bf16.msra.mxu1 %v8462_v46  ;;  %5434 = vmatprep.mubr.bf16.mxu1 %v9484_v0  ;;  %v8495_v0 = vcombine.high %v825_v59, %v829_v62  ;;  %v8963_v46 = vld [vmem:[#allocation7 + $0x48] ss:$16 sps:$4 sm:$0xff]   ;;  %v8992_v59 = vld [vmem:[#allocation7 + $0x2e4] ss:$16 sps:$4 sm:$0xff]   ;;  %v8995_v62 = vld [vmem:[#allocation7 + $0xec] ss:$16 sps:$4 sm:$0xff]  }
 0x36c   :  { %5404 = vmatprep.subr.bf16.mxu1 %v8471_v35  ;;  %v8966_v35 = vld [vmem:[#allocation7 + $0x260] ss:$16 sps:$4 sm:$0xff]  }
 0x36d   :  { %6646 = vmatpush1.bf16.msra.mxu0 %v8927_v22  ;;  %v8977_v22 = vld [vmem:[#allocation7 + $0x8c] ss:$16 sps:$4 sm:$0xff]  }
 0x36e   :  { %6647 = vmatprep.subr.bf16.mxu0 %v8932_v51  ;;  %v8980_v51 = vld [vmem:[#allocation7 + $0x2a4] ss:$16 sps:$4 sm:$0xff]  }
 0x36f   :  { %5405 = vmatpush1.bf16.msra.mxu1 %v8470_v50  ;;  %v8975_v50 = vld [vmem:[#allocation7 + $0x88] ss:$16 sps:$4 sm:$0xff]  }
 0x370   :  { %5406 = vmatprep.subr.bf16.mxu1 %v8479_v61  ;;  %v8983_v61 = vld [vmem:[#allocation7 + $0xac] ss:$16 sps:$4 sm:$0xff]  }
 0x371   :  { %6648 = vmatpush1.bf16.msra.mxu0 %v8930_v58  ;;  %v8986_v58 = vld [vmem:[#allocation7 + $0x2c4] ss:$16 sps:$4 sm:$0xff]  }
 0x372   :  { %6649 = vmatprep.subr.bf16.mxu0 %v8935_v56  ;;  %v8984_v56 = vld [vmem:[#allocation7 + $0x2c0] ss:$16 sps:$4 sm:$0xff]  }
 0x373   :  { %5407 = vmatpush1.bf16.msra.mxu1 %v8478_v54  ;;  %v8989_v54 = vld [vmem:[#allocation7 + $0xcc] ss:$16 sps:$4 sm:$0xff]  }
 0x374   :  { %5408 = vmatprep.subr.bf16.mxu1 %v8487_v16  ;;  %v8987_v16 = vld [vmem:[#allocation7 + $0xc8] ss:$16 sps:$4 sm:$0xff]  }
 0x375   :  { %6650 = vmatpush1.bf16.msra.mxu0 %v8933_v63  ;;  %v8990_v63 = vld [vmem:[#allocation7 + $0x2e0] ss:$16 sps:$4 sm:$0xff]  }
 0x376   :  { %6651 = vmatprep.subr.bf16.mxu0 %v8938_v4  ;;  %v8998_v4 = vld [vmem:[#allocation7 + $0x304] ss:$16 sps:$4 sm:$0xff]  }
 0x377   :  { %5409 = vmatpush1.bf16.msra.mxu1 %v8486_v3  ;;  %v8993_v3 = vld [vmem:[#allocation7 + $0xe8] ss:$16 sps:$4 sm:$0xff]  }
 0x378   :  { %5410 = vmatprep.subr.bf16.mxu1 %v8495_v0  ;;  %v9001_v0 = vld [vmem:[#allocation7 + $0x10c] ss:$16 sps:$4 sm:$0xff]  }
 0x379   :  { %6652 = vmatpush1.bf16.msra.mxu0 %v8936_v8  ;;  %v9004_v8 = vld [vmem:[#allocation7 + $0x324] ss:$16 sps:$4 sm:$0xff]  }
 0x37a   :  { %6653 = vmatprep.subr.bf16.mxu0 %v8941_v13  ;;  %v9002_v13 = vld [vmem:[#allocation7 + $0x320] ss:$16 sps:$4 sm:$0xff]  }
 0x37b   :  { %5411 = vmatpush1.bf16.msra.mxu1 %v8494_v9  ;;  %v9007_v9 = vld [vmem:[#allocation7 + $0x12c] ss:$16 sps:$4 sm:$0xff]  }
 0x37c   :  { %5412 = vmatprep.subr.bf16.mxu1 %v8503_v31  ;;  %v9005_v31 = vld [vmem:[#allocation7 + $0x128] ss:$16 sps:$4 sm:$0xff]  }
 0x37d   :  { %6654 = vmatpush1.bf16.msra.mxu0 %v8939_v20  ;;  %v9008_v20 = vld [vmem:[#allocation7 + $0x340] ss:$16 sps:$4 sm:$0xff]  }
 0x37e   :  { %6655 = vmatprep.subr.bf16.mxu0 %v8944_v26  ;;  %v9016_v26 = vld [vmem:[#allocation7 + $0x364] ss:$16 sps:$4 sm:$0xff]  }
 0x37f   :  { %5413 = vmatpush1.bf16.msra.mxu1 %v8502_v21  ;;  %v9011_v21 = vld [vmem:[#allocation7 + $0x148] ss:$16 sps:$4 sm:$0xff]  }
 0x380   :  { %5414 = vmatprep.subr.bf16.mxu1 %v8511_v27  ;;  %v9019_v27 = vld [vmem:[#allocation7 + $0x16c] ss:$16 sps:$4 sm:$0xff]  }
 0x381   :  { %6656 = vmatpush1.bf16.msra.mxu0 %v8942_v25  ;;  %v9022_v25 = vld [vmem:[#allocation7 + $0x384] ss:$16 sps:$4 sm:$0xff]  }
 0x382   :  { %6657 = vmatprep.subr.bf16.mxu0 %v8947_v39  ;;  %v9020_v39 = vld [vmem:[#allocation7 + $0x380] ss:$16 sps:$4 sm:$0xff]  }
 0x383   :  { %5415 = vmatpush1.bf16.msra.mxu1 %v8510_v32  ;;  %v9025_v32 = vld [vmem:[#allocation7 + $0x18c] ss:$16 sps:$4 sm:$0xff]  }
 0x384   :  { %5416 = vmatprep.subr.bf16.mxu1 %v8519_v34  ;;  %v9023_v34 = vld [vmem:[#allocation7 + $0x188] ss:$16 sps:$4 sm:$0xff]  }
 0x385   :  { %6658 = vmatpush1.bf16.msra.mxu0 %v8945_v36  ;;  %v9028_v36 = vld [vmem:[#allocation7 + $0x3a4] ss:$16 sps:$4 sm:$0xff]  }
 0x386   :  { %6668 = vmatprep.subr.bf16.mxu0 %v8950_v60  ;;  %v9029_v60 = vld [vmem:[#allocation7 + $0x1a8] ss:$16 sps:$4 sm:$0xff]  }
 0x387   :  { %5417 = vmatpush1.bf16.msra.mxu1 %v8518_v33  ;;  %v9031_v33 = vld [vmem:[#allocation7 + $0x1ac] ss:$16 sps:$4 sm:$0xff]  }
 0x388   :  { %6709 = vmatprep.subr.bf16.mxu1 %v8953_v23  ;;  %6660 = vmatmul.mubr.bf16.vlgmr.msra.gmra.mrb[8].mxu0 %v9880_v43  ;;  %v9034_v23 = vld [vmem:[#allocation7 + $0x3c4] ss:$16 sps:$4 sm:$0xff]  }
 0x389   :  { %6669 = vmatpush1.bf16.msra.mxu0 %v8948_v53  ;;  %6700 = vmatprep.mubr.bf16.mxu0 %v9883_v38  ;;  %v9032_v53 = vld [vmem:[#allocation7 + $0x3c0] ss:$16 sps:$4 sm:$0xff]  }
 0x38a   :  { %5435 = vmatmul.mubr.bf16.vlgmr.msra.gmra.mrb[8].mxu1 %v9670_v24  ;;  %6670 = vmatprep.subr.bf16.mxu0 %v8956_v55  ;;  %v8971_v24 = vld [vmem:[#allocation7 + $0x6c] ss:$16 sps:$4 sm:$0xff]   ;;  %v9040_v55 = vld [vmem:[#allocation7 + $0x3e4] ss:$16 sps:$4 sm:$0xff]  }
 0x38b   :  { %6710 = vmatpush1.bf16.msra.mxu1 %v8951_v40  ;;  %6741 = vmatprep.mubr.bf16.mxu1 %v9872_v12  ;;  %v8972_v12 = vld [vmem:[#allocation7 + $0x280] ss:$16 sps:$4 sm:$0xff]   ;;  %v9035_v40 = vld [vmem:[#allocation7 + $0x1c8] ss:$16 sps:$4 sm:$0xff]  }
 0x38c   :  { %6711 = vmatprep.subr.bf16.mxu1 %v8959_v44  ;;  %v9043_v44 = vld [vmem:[#allocation7 + $0x1ec] ss:$16 sps:$4 sm:$0xff]  }
 0x38d   :  { %6671 = vmatpush1.bf16.msra.mxu0 %v8954_v30  ;;  %v9038_v30 = vld [vmem:[#allocation7 + $0x3e0] ss:$16 sps:$4 sm:$0xff]  }
 0x38e   :  { %6672 = vmatprep.subr.bf16.mxu0 %v8962_v19  ;;  %v5853_v19 = vmax.f32 %v9870_v48, 0.0  ;;  %v9050_v48 = vld [vmem:[#allocation7 + $0x248] ss:$16 sps:$4 sm:$0xff]  }
 0x38f   :  { %6712 = vmatpush1.bf16.msra.mxu1 %v8957_v17  ;;  %v9041_v17 = vld [vmem:[#allocation7 + $0x1e8] ss:$16 sps:$4 sm:$0xff]  }
 0x390   :  { %6713 = vmatprep.subr.bf16.mxu1 %v8965_v42  ;;  %v9046_v42 = vld [vmem:[#allocation7 + $0x20c] ss:$16 sps:$4 sm:$0xff]  }
 0x391   :  { %6673 = vmatpush1.bf16.msra.mxu0 %v8960_v45  ;;  %v9889_v45 = vpack.c.bf16 %v5853_v19, %v5853_v19 }
 0x392   :  { %6674 = vmatprep.subr.bf16.mxu0 %v8968_v47  ;;  %v9049_v47 = vld [vmem:[#allocation7 + $0x22c] ss:$16 sps:$4 sm:$0xff]  }
 0x393   :  { %6714 = vmatpush1.bf16.msra.mxu1 %v8963_v46  ;;  %v9044_v46 = vld [vmem:[#allocation7 + $0x208] ss:$16 sps:$4 sm:$0xff]  }
 0x394   :  { %6715 = vmatprep.subr.bf16.mxu1 %v8971_v24  ;;  %v9047_v24 = vld [vmem:[#allocation7 + $0x228] ss:$16 sps:$4 sm:$0xff]  }
 0x395   :  { %6675 = vmatpush1.bf16.msra.mxu0 %v8966_v35  ;;  %v9052_v35 = vld [vmem:[#allocation7 + $0x24c] ss:$16 sps:$4 sm:$0xff]  }
 0x396   :  { %6676 = vmatprep.subr.bf16.mxu0 %v8974_v49  ;;  %v9053_v49 = vld [vmem:[#allocation7 + $0x268] ss:$16 sps:$4 sm:$0xff]  }
 0x397   :  { %6716 = vmatpush1.bf16.msra.mxu1 %v8969_v41  ;;  %v9055_v41 = vld [vmem:[#allocation7 + $0x26c] ss:$16 sps:$4 sm:$0xff]  }
 0x398   :  { %6717 = vmatprep.subr.bf16.mxu1 %v8977_v22  ;;  %v9058_v22 = vld [vmem:[#allocation7 + $0x28c] ss:$16 sps:$4 sm:$0xff]  }
 0x399   :  { %6677 = vmatpush1.bf16.msra.mxu0 %v8972_v12  ;;  %v9056_v12 = vld [vmem:[#allocation7 + $0x288] ss:$16 sps:$4 sm:$0xff]  }
 0x39a   :  { %6678 = vmatprep.subr.bf16.mxu0 %v8980_v51  ;;  %v9064_v51 = vld [vmem:[#allocation7 + $0x2cc] ss:$16 sps:$4 sm:$0xff]  }
 0x39b   :  { %6718 = vmatpush1.bf16.msra.mxu1 %v8975_v50  ;;  %v9061_v50 = vld [vmem:[#allocation7 + $0x2ac] ss:$16 sps:$4 sm:$0xff]  }
 0x39c   :  { %6719 = vmatprep.subr.bf16.mxu1 %v8983_v61  ;;  %v9067_v61 = vld [vmem:[#allocation7 + $0x2ec] ss:$16 sps:$4 sm:$0xff]  }
 0x39d   :  { %6679 = vmatpush1.bf16.msra.mxu0 %v8978_v18  ;;  %v9065_v18 = vld [vmem:[#allocation7 + $0x2e8] ss:$16 sps:$4 sm:$0xff]  }
 0x39e   :  { %6680 = vmatprep.subr.bf16.mxu0 %v8986_v58  ;;  %v9068_v58 = vld [vmem:[#allocation7 + $0x308] ss:$16 sps:$4 sm:$0xff]  }
 0x39f   :  { %6720 = vmatpush1.bf16.msra.mxu1 %v8981_v52  ;;  %v9070_v52 = vld [vmem:[#allocation7 + $0x30c] ss:$16 sps:$4 sm:$0xff]  }
 0x3a0   :  { %6721 = vmatprep.subr.bf16.mxu1 %v8989_v54  ;;  %v9073_v54 = vld [vmem:[#allocation7 + $0x32c] ss:$16 sps:$4 sm:$0xff]  }
 0x3a1   :  { %6681 = vmatpush1.bf16.msra.mxu0 %v8984_v56  ;;  %v9071_v56 = vld [vmem:[#allocation7 + $0x328] ss:$16 sps:$4 sm:$0xff]  }
 0x3a2   :  { %6682 = vmatprep.subr.bf16.mxu0 %v8992_v59  ;;  %v9074_v59 = vld [vmem:[#allocation7 + $0x348] ss:$16 sps:$4 sm:$0xff]  }
 0x3a3   :  { %6722 = vmatpush1.bf16.msra.mxu1 %v8987_v16  ;;  %v9076_v16 = vld [vmem:[#allocation7 + $0x34c] ss:$16 sps:$4 sm:$0xff]  }
 0x3a4   :  { %6723 = vmatprep.subr.bf16.mxu1 %v8995_v62  ;;  %v9079_v62 = vld [vmem:[#allocation7 + $0x36c] ss:$16 sps:$4 sm:$0xff]  }
 0x3a5   :  { %6683 = vmatpush1.bf16.msra.mxu0 %v8990_v63  ;;  %v9077_v63 = vld [vmem:[#allocation7 + $0x368] ss:$16 sps:$4 sm:$0xff]  }
 0x3a6   :  { %6684 = vmatprep.subr.bf16.mxu0 %v8998_v4  ;;  %v9080_v4 = vld [vmem:[#allocation7 + $0x388] ss:$16 sps:$4 sm:$0xff]  }
 0x3a7   :  { %6724 = vmatpush1.bf16.msra.mxu1 %v8993_v3  ;;  %v9082_v3 = vld [vmem:[#allocation7 + $0x38c] ss:$16 sps:$4 sm:$0xff]  }
 0x3a8   :  { %6725 = vmatprep.subr.bf16.mxu1 %v9001_v0  ;;  %v9085_v0 = vld [vmem:[#allocation7 + $0x3ac] ss:$16 sps:$4 sm:$0xff]  }
 0x3a9   :  { %6685 = vmatpush1.bf16.msra.mxu0 %v8996_v5  ;;  %v9083_v5 = vld [vmem:[#allocation7 + $0x3a8] ss:$16 sps:$4 sm:$0xff]  }
 0x3aa   :  { %6686 = vmatprep.subr.bf16.mxu0 %v9004_v8  ;;  %v9086_v8 = vld [vmem:[#allocation7 + $0x3c8] ss:$16 sps:$4 sm:$0xff]  }
 0x3ab   :  { %6726 = vmatpush1.bf16.msra.mxu1 %v8999_v7  ;;  %v9088_v7 = vld [vmem:[#allocation7 + $0x3cc] ss:$16 sps:$4 sm:$0xff]  }
 0x3ac   :  { %6727 = vmatprep.subr.bf16.mxu1 %v9007_v9  ;;  %v9091_v9 = vld [vmem:[#allocation7 + $0x3ec] ss:$16 sps:$4 sm:$0xff]  }
 0x3ad   :  { %6687 = vmatpush1.bf16.msra.mxu0 %v9002_v13  ;;  %v9089_v13 = vld [vmem:[#allocation7 + $0x3e8] ss:$16 sps:$4 sm:$0xff]  }
 0x3ae   :  { %6688 = vmatprep.subr.bf16.mxu0 %v9010_v14 }
 0x3af   :  { %6728 = vmatpush1.bf16.msra.mxu1 %v9005_v31 }
 0x3b0   :  { %6729 = vmatprep.subr.bf16.mxu1 %v9013_v15 }
 0x3b1   :  { %6689 = vmatpush1.bf16.msra.mxu0 %v9008_v20 }
 0x3b2   :  { %6690 = vmatprep.subr.bf16.mxu0 %v9016_v26 }
 0x3b3   :  { %6730 = vmatpush1.bf16.msra.mxu1 %v9011_v21 }
 0x3b4   :  { %6731 = vmatprep.subr.bf16.mxu1 %v9019_v27 }
 0x3b5   :  { %6691 = vmatpush1.bf16.msra.mxu0 %v9014_v28 }
 0x3b6   :  { %6692 = vmatprep.subr.bf16.mxu0 %v9022_v25 }
 0x3b7   :  { %6732 = vmatpush1.bf16.msra.mxu1 %v9017_v29 }
 0x3b8   :  { %6733 = vmatprep.subr.bf16.mxu1 %v9025_v32 }
 0x3b9   :  { %6693 = vmatpush1.bf16.msra.mxu0 %v9020_v39 }
 0x3ba   :  { %6694 = vmatprep.subr.bf16.mxu0 %v9028_v36 }
 0x3bb   :  { %6734 = vmatpush1.bf16.msra.mxu1 %v9023_v34 }
 0x3bc   :  { %6735 = vmatprep.subr.bf16.mxu1 %v9031_v33 }
 0x3bd   :  { %6695 = vmatpush1.bf16.msra.mxu0 %v9026_v37 }
 0x3be   :  { %6696 = vmatprep.subr.bf16.mxu0 %v9034_v23 }
 0x3bf   :  { %6736 = vmatpush1.bf16.msra.mxu1 %v9029_v60 }
 0x3c0   :  { %6737 = vmatprep.subr.bf16.mxu1 %v9037_v1 }
 0x3c1   :  { %6697 = vmatpush1.bf16.msra.mxu0 %v9032_v53 }
 0x3c2   :  { %6698 = vmatprep.subr.bf16.mxu0 %v9040_v55 }
 0x3c3   :  { %6738 = vmatpush1.bf16.msra.mxu1 %v9035_v40 }
 0x3c4   :  { %6739 = vmatprep.subr.bf16.mxu1 %v9043_v44 }
 0x3c5   :  { %6699 = vmatpush1.bf16.msra.mxu0 %v9038_v30 }
 0x3c7   :  { %6740 = vmatpush1.bf16.msra.mxu1 %v9041_v17 }
 0x3c8   :  { %6750 = vmatprep.subr.bf16.mxu1 %v9046_v42  ;;  %6701 = vmatmul.mubr.bf16.vlgmr.msra.gmra.mrb[8].mxu0 %v9889_v45 }
 0x3ca   :  { %6742 = vmatmul.mubr.bf16.vlgmr.msra.gmra.mrb[12].mxu1 %v9880_v43  ;;  %v9059_v43 = vld [vmem:[#allocation7 + $0x2a8] ss:$16 sps:$4 sm:$0xff]  }
 0x3cb   :  { %6751 = vmatpush1.bf16.msra.mxu1 %v9044_v46  ;;  %6782 = vmatprep.mubr.bf16.mxu1 %v9883_v38  ;;  %v9062_v38 = vld [vmem:[#allocation7 + $0x2c8] ss:$16 sps:$4 sm:$0xff]  }
 0x3cc   :  { %6752 = vmatprep.subr.bf16.mxu1 %v9049_v47 }
 0x3cf   :  { %6753 = vmatpush1.bf16.msra.mxu1 %v9047_v24 }
 0x3d0   :  { %6754 = vmatprep.subr.bf16.mxu1 %v9052_v35 }
 0x3d3   :  { %6755 = vmatpush1.bf16.msra.mxu1 %v9050_v48 }
 0x3d4   :  { %6756 = vmatprep.subr.bf16.mxu1 %v9055_v41 }
 0x3d7   :  { %6757 = vmatpush1.bf16.msra.mxu1 %v9053_v49 }
 0x3d8   :  { %6758 = vmatprep.subr.bf16.mxu1 %v9058_v22 }
 0x3db   :  { %6759 = vmatpush1.bf16.msra.mxu1 %v9056_v12 }
 0x3dc   :  { %6760 = vmatprep.subr.bf16.mxu1 %v9061_v50 }
 0x3df   :  { %6761 = vmatpush1.bf16.msra.mxu1 %v9059_v43 }
 0x3e0   :  { %6762 = vmatprep.subr.bf16.mxu1 %v9064_v51 }
 0x3e3   :  { %6763 = vmatpush1.bf16.msra.mxu1 %v9062_v38 }
 0x3e4   :  { %6764 = vmatprep.subr.bf16.mxu1 %v9067_v61 }
 0x3e7   :  { %6765 = vmatpush1.bf16.msra.mxu1 %v9065_v18 }
 0x3e8   :  { %6766 = vmatprep.subr.bf16.mxu1 %v9070_v52 }
 0x3eb   :  { %6767 = vmatpush1.bf16.msra.mxu1 %v9068_v58 }
 0x3ec   :  { %6768 = vmatprep.subr.bf16.mxu1 %v9073_v54 }
 0x3ef   :  { %6769 = vmatpush1.bf16.msra.mxu1 %v9071_v56 }
 0x3f0   :  { %6770 = vmatprep.subr.bf16.mxu1 %v9076_v16 }
 0x3f3   :  { %6771 = vmatpush1.bf16.msra.mxu1 %v9074_v59 }
 0x3f4   :  { %6772 = vmatprep.subr.bf16.mxu1 %v9079_v62 }
 0x3f7   :  { %6773 = vmatpush1.bf16.msra.mxu1 %v9077_v63 }
 0x3f8   :  { %6774 = vmatprep.subr.bf16.mxu1 %v9082_v3 }
 0x3fb   :  { %6775 = vmatpush1.bf16.msra.mxu1 %v9080_v4 }
 0x3fc   :  { %6776 = vmatprep.subr.bf16.mxu1 %v9085_v0 }
 0x3ff   :  { %6777 = vmatpush1.bf16.msra.mxu1 %v9083_v5 }
 0x400   :  { %6778 = vmatprep.subr.bf16.mxu1 %v9088_v7 }
 0x403   :  { %6779 = vmatpush1.bf16.msra.mxu1 %v9086_v8 }
 0x404   :  { %6780 = vmatprep.subr.bf16.mxu1 %v9091_v9 }
 0x407   :  { %6781 = vmatpush1.bf16.msra.mxu1 %v9089_v13 }
 0x40a   :  { %6783 = vmatmul.mubr.bf16.vlgmr.msra.gmra.mrb[12].mxu1 %v9889_v45 }
 0x41b   :  { %v9895_v31 = vpop.f32.mrb[4].mxu0 }
 0x41c   :  { %v5455_v14 = vsel %vm5454_vm0, %v9895_v31, 0.0  ;;  %v5487_v15 = vmul.f32 %v9895_v31, %v9895_v31  ;;  %v9901_v20 = vpop.f32.mrb[5].mxu0 }
 0x41d   :  { %v5456_v21 = vrot.slane %v5455_v14, 4  ;;  %v5462_v26 = vsel %vm5454_vm0, %v9901_v20, 0.0  ;;  %v5488_v27 = vmul.f32 %v9901_v20, %v9901_v20  ;;  %v5194_v28 = vpop.f32.mrb[6].mxu0 }
 0x41e   :  { %v5491_v29 = vsel %vm5454_vm0, %v5487_v15, 0.0  ;;  %v5463_v25 = vrot.slane %v5462_v26, 4  ;;  %v5195_v32 = vpop.f32.mrb[7].mxu0  ;;  %v9092_v28 = vld [vmem:[#allocation10] ss:$8 sps:$4 sm:$0xff]  }
 0x41f   :  { %v5457_v39 = vadd.f32 %v5456_v21, %v5455_v14  ;;  %v5492_v34 = vrot.slane %v5491_v29, 4  ;;  %v5498_v36 = vsel %vm5454_vm0, %v5488_v27, 0.0  ;;  %v9094_v21 = vld [vmem:[#allocation10 + $0x4] ss:$8 sps:$4 sm:$0xff]  }
 0x420   :  { %v5464_v33 = vadd.f32 %v5463_v25, %v5462_v26  ;;  %v5499_v37 = vrot.slane %v5498_v36, 4  ;;  %7385 = vmatprep.subr.bf16.mxu0 %v9094_v21 }
 0x421   :  { %v5458_v60 = vrot.slane %v5457_v39, 2  ;;  %v5493_v23 = vadd.f32 %v5492_v34, %v5491_v29  ;;  %7386 = vmatpush1.bf16.msra.mxu0 %v9092_v28 }
 0x422   :  { %v5465_v1 = vrot.slane %v5464_v33, 2  ;;  %v5500_v53 = vadd.f32 %v5499_v37, %v5498_v36 }
 0x423   :  { %v5459_v40 = vadd.f32 %v5458_v60, %v5457_v39  ;;  %v5494_v55 = vrot.slane %v5493_v23, 2 }
 0x424   :  { %v5466_v44 = vadd.f32 %v5465_v1, %v5464_v33  ;;  %v5501_v30 = vrot.slane %v5500_v53, 2  ;;  %v9097_v33 = vld [vmem:[#allocation10 + $0x14] ss:$8 sps:$4 sm:$0xff]  }
 0x425   :  { %v5460_v17 = vrot.slane %v5459_v40, 1  ;;  %v5495_v19 = vadd.f32 %v5494_v55, %v5493_v23  ;;  %v9095_v23 = vld [vmem:[#allocation10 + $0x10] ss:$8 sps:$4 sm:$0xff]   ;;  %7387 = vmatprep.subr.bf16.mxu0 %v9097_v33  ;;  %v9124_v33 = vld [vmem:[#allocation10 + $0xa4] ss:$8 sps:$4 sm:$0xff]  }
 0x426   :  { %v5467_v42 = vrot.slane %v5466_v44, 1  ;;  %v5502_v45 = vadd.f32 %v5501_v30, %v5500_v53  ;;  %7388 = vmatpush1.bf16.msra.mxu0 %v9095_v23 }
 0x427   :  { %v5461_v46 = vadd.f32 %v5460_v17, %v5459_v40  ;;  %v5496_v47 = vrot.slane %v5495_v19, 1  ;;  %v9100_v17 = vld [vmem:[#allocation10 + $0x24] ss:$8 sps:$4 sm:$0xff]  }
 0x428   :  { %v5468_v24 = vadd.f32 %v5467_v42, %v5466_v44  ;;  %v5503_v35 = vrot.slane %v5502_v45, 1  ;;  %7389 = vmatprep.subr.bf16.mxu0 %v9100_v17 }
 0x429   :  { %v9909_v48 = vmul.f32 0.5, %v5461_v46  ;;  %v5497_v41 = vadd.f32 %v5496_v47, %v5495_v19 }
 0x42a   :  { %v9911_v49 = vmul.f32 0.5, %v5468_v24  ;;  %v5504_v22 = vadd.f32 %v5503_v35, %v5502_v45  ;;  %v9098_v45 = vld [vmem:[#allocation10 + $0x20] ss:$8 sps:$4 sm:$0xff]  }
 0x42b   :  { %v5519_v12 = vmul.f32 0.5, %v5497_v41  ;;  %v5523_v50 = vmul.f32 %v9909_v48, %v9909_v48  ;;  %7390 = vmatpush1.bf16.msra.mxu0 %v9098_v45  ;;  %v9125_v45 = vld [vmem:[#allocation10 + $0xb0] ss:$8 sps:$4 sm:$0xff]  }
 0x42c   :  { %v5520_v43 = vmul.f32 0.5, %v5504_v22  ;;  %v5524_v51 = vmul.f32 %v9911_v49, %v9911_v49 }
 0x42d   :  { %v5527_v38 = vsub.f32 %v5519_v12, %v5523_v50  ;;  %v9103_v12 = vld [vmem:[#allocation10 + $0x34] ss:$8 sps:$4 sm:$0xff]  }
 0x42e   :  { %v5528_v61 = vsub.f32 %v5520_v43, %v5524_v51  ;;  %v9101_v51 = vld [vmem:[#allocation10 + $0x30] ss:$8 sps:$4 sm:$0xff]   ;;  %7391 = vmatprep.subr.bf16.mxu0 %v9103_v12 }
 0x42f   :  { %v5531_v18 = vadd.f32 1e-05, %v5527_v38  ;;  %7392 = vmatpush1.bf16.msra.mxu0 %v9101_v51  ;;  %v9134_v51 = vld [vmem:[#allocation10 + $0xe0] ss:$8 sps:$4 sm:$0xff]  }
 0x430   :  { %v5532_v52 = vadd.f32 1e-05, %v5528_v61 }
 0x431   :  { %9212 = vrsqrt.f32 %v5531_v18 }
 0x432   :  { %9214 = vrsqrt.f32 %v5532_v52  ;;  %v9106_v52 = vld [vmem:[#allocation10 + $0x44] ss:$8 sps:$4 sm:$0xff]  }
 0x433   :  { %7393 = vmatprep.subr.bf16.mxu0 %v9106_v52 }
 0x43b   :  { %v9917_v58 = vpop.eup %9212 }
 0x43c   :  { %v9919_v54 = vpop.eup %9214 }
 0x43d   :  { %v5543_v56 = vcombine.low %v9917_v58, %v9919_v54 }
 0x45d   :  { %v9923_v16 = vpop.f32.mrb[8].mxu1 }
 0x45e   :  { %v5469_v59 = vsel %vm5454_vm0, %v9923_v16, 0.0  ;;  %v5489_v62 = vmul.f32 %v9923_v16, %v9923_v16  ;;  %v9929_v63 = vpop.f32.mrb[9].mxu1 }
 0x45f   :  { %v5470_v3 = vrot.slane %v5469_v59, 4  ;;  %v5476_v4 = vsel %vm5454_vm0, %v9929_v63, 0.0  ;;  %v5490_v0 = vmul.f32 %v9929_v63, %v9929_v63  ;;  %v5440_v5 = vpop.f32.mrb[10].mxu1 }
 0x460   :  { %v5505_v7 = vsel %vm5454_vm0, %v5489_v62, 0.0  ;;  %v5477_v8 = vrot.slane %v5476_v4, 4  ;;  %v5441_v9 = vpop.f32.mrb[11].mxu1  ;;  %v9104_v62 = vld [vmem:[#allocation10 + $0x40] ss:$8 sps:$4 sm:$0xff]  }
 0x461   :  { %v5471_v13 = vadd.f32 %v5470_v3, %v5469_v59  ;;  %v5506_v14 = vrot.slane %v5505_v7, 4  ;;  %v5512_v15 = vsel %vm5454_vm0, %v5490_v0, 0.0  ;;  %7394 = vmatpush1.bf16.msra.mxu0 %v9104_v62  ;;  %v9109_v3 = vld [vmem:[#allocation10 + $0x54] ss:$8 sps:$4 sm:$0xff]   ;;  %v9112_v0 = vld [vmem:[#allocation10 + $0x64] ss:$8 sps:$4 sm:$0xff]  }
 0x462   :  { %v5478_v26 = vadd.f32 %v5477_v8, %v5476_v4  ;;  %v5513_v27 = vrot.slane %v5512_v15, 4  ;;  %v9107_v4 = vld [vmem:[#allocation10 + $0x50] ss:$8 sps:$4 sm:$0xff]   ;;  %7395 = vmatprep.subr.bf16.mxu0 %v9109_v3  ;;  %v9110_v5 = vld [vmem:[#allocation10 + $0x60] ss:$8 sps:$4 sm:$0xff]  }
 0x463   :  { %v5472_v29 = vrot.slane %v5471_v13, 2  ;;  %v5507_v25 = vadd.f32 %v5506_v14, %v5505_v7  ;;  %v9115_v8 = vld [vmem:[#allocation10 + $0x74] ss:$8 sps:$4 sm:$0xff]   ;;  %v9137_v3 = vld [vmem:[#allocation10 + $0xf0] ss:$8 sps:$4 sm:$0xff]  }
 0x464   :  { %v5479_v32 = vrot.slane %v5478_v26, 2  ;;  %v5514_v39 = vadd.f32 %v5513_v27, %v5512_v15  ;;  %v5551_v15 = vrot.slane %v5543_v56, %v9651_v57  ;;  %v9116_v27 = vld [vmem:[#allocation10 + $0x80] ss:$8 sps:$4 sm:$0xff]  }
 0x465   :  { %v5473_v34 = vadd.f32 %v5472_v29, %v5471_v13  ;;  %v5508_v36 = vrot.slane %v5507_v25, 2  ;;  %7396 = vmatpush1.bf16.msra.mxu0 %v9107_v4  ;;  %v9113_v13 = vld [vmem:[#allocation10 + $0x70] ss:$8 sps:$4 sm:$0xff]   ;;  %v5451_v29 = vld [vmem:[#allocation8 + $0x4] ss:$8 sm:$0xf] }
 0x466   :  { %v5480_v37 = vadd.f32 %v5479_v32, %v5478_v26  ;;  %v5515_v60 = vrot.slane %v5514_v39, 2  ;;  %7397 = vmatprep.subr.bf16.mxu0 %v9112_v0  ;;  %v9118_v26 = vld [vmem:[#allocation10 + $0x84] ss:$8 sps:$4 sm:$0xff]   ;;  %v9121_v32 = vld [vmem:[#allocation10 + $0x94] ss:$8 sps:$4 sm:$0xff]  }
 0x467   :  { %v5474_v1 = vrot.slane %v5473_v34, 1  ;;  %v5509_v53 = vadd.f32 %v5508_v36, %v5507_v25 }
 0x468   :  { %v5481_v40 = vrot.slane %v5480_v37, 1  ;;  %v5516_v55 = vadd.f32 %v5515_v60, %v5514_v39  ;;  %v9119_v39 = vld [vmem:[#allocation10 + $0x90] ss:$8 sps:$4 sm:$0xff]  }
 0x469   :  { %v5475_v44 = vadd.f32 %v5474_v1, %v5473_v34  ;;  %v5510_v30 = vrot.slane %v5509_v53, 1  ;;  %7398 = vmatpush1.bf16.msra.mxu0 %v9110_v5 }
 0x46a   :  { %v5482_v19 = vadd.f32 %v5481_v40, %v5480_v37  ;;  %v5517_v42 = vrot.slane %v5516_v55, 1  ;;  %7399 = vmatprep.subr.bf16.mxu0 %v9115_v8  ;;  %v9122_v37 = vld [vmem:[#allocation10 + $0xa0] ss:$8 sps:$4 sm:$0xff]  }
 0x46b   :  { %v5485_v46 = vmul.f32 0.5, %v5475_v44  ;;  %v5511_v47 = vadd.f32 %v5510_v30, %v5509_v53 }
 0x46c   :  { %v5486_v24 = vmul.f32 0.5, %v5482_v19  ;;  %v5518_v35 = vadd.f32 %v5517_v42, %v5516_v55  ;;  %v9127_v42 = vld [vmem:[#allocation10 + $0xb4] ss:$8 sps:$4 sm:$0xff]  }
 0x46d   :  { %v5521_v41 = vmul.f32 0.5, %v5511_v47  ;;  %v5525_v22 = vmul.f32 %v5485_v46, %v5485_v46  ;;  %7400 = vmatpush1.bf16.msra.mxu0 %v9113_v13  ;;  %v9130_v47 = vld [vmem:[#allocation10 + $0xc4] ss:$8 sps:$4 sm:$0xff]  }
 0x46e   :  { %v5522_v50 = vmul.f32 0.5, %v5518_v35  ;;  %v5526_v43 = vmul.f32 %v5486_v24, %v5486_v24  ;;  %7401 = vmatprep.subr.bf16.mxu0 %v9118_v26  ;;  %v9131_v35 = vld [vmem:[#allocation10 + $0xd0] ss:$8 sps:$4 sm:$0xff]  }
 0x46f   :  { %v5529_v38 = vsub.f32 %v5521_v41, %v5525_v22 }
 0x470   :  { %v5530_v61 = vsub.f32 %v5522_v50, %v5526_v43 }
 0x471   :  { %v5533_v18 = vadd.f32 1e-05, %v5529_v38  ;;  %7402 = vmatpush1.bf16.msra.mxu0 %v9116_v27  ;;  %v9136_v38 = vld [vmem:[#allocation10 + $0xe4] ss:$8 sps:$4 sm:$0xff]  }
 0x472   :  { %v5534_v59 = vadd.f32 1e-05, %v5530_v61  ;;  %7403 = vmatprep.subr.bf16.mxu0 %v9121_v32  ;;  %v9142_v32 = vld [vmem:[#allocation10 + $0x104] ss:$8 sps:$4 sm:$0xff]  }
 0x473   :  { %9216 = vrsqrt.f32 %v5533_v18 }
 0x474   :  { %9218 = vrsqrt.f32 %v5534_v59  ;;  %v9139_v59 = vld [vmem:[#allocation10 + $0xf4] ss:$8 sps:$4 sm:$0xff]  }
 0x475   :  { %7404 = vmatpush1.bf16.msra.mxu0 %v9119_v39 }
 0x476   :  { %7405 = vmatprep.subr.bf16.mxu0 %v9124_v33 }
 0x479   :  { %7406 = vmatpush1.bf16.msra.mxu0 %v9122_v37 }
 0x47a   :  { %7407 = vmatprep.subr.bf16.mxu0 %v9127_v42 }
 0x47d   :  { %v9217_v7 = vpop.eup %9216  ;;  %7408 = vmatpush1.bf16.msra.mxu0 %v9125_v45 }
 0x47e   :  { %v9219_v9 = vpop.eup %9218  ;;  %7409 = vmatprep.subr.bf16.mxu0 %v9130_v47 }
 0x47f   :  { %v5544_v14 = vcombine.low %v9217_v7, %v9219_v9 }
 0x481   :  { %v5558_v21 = vrot.slane %v5544_v14, %v9651_v57 }
 0x483   :  { %v5559_v28 = vcombine.low %v5551_v15, %v5558_v21 }
 0x485   :  { %v5566_v25 = vrot.slane %v5559_v28, %v9651_v57 }
 0x487   :  { %v5568_v34 = vmul.f32 %v5566_v25, %v5451_v29 }
 0x489   :  { %v5573_v36 = vrot.slane %v5568_v34, %v9835_v10  ;;  %v5577_v58 = vrot.slane %v5568_v34, %v9838_v11  ;;  %v5581_v54 = vrot.slane %v5568_v34, %v9828_v2  ;;  %v5585_v56 = vrot.slane %v5568_v34, %v9831_v6 }
 0x48b   :  { %v5590_v60 = vmul.f32 %v5573_v36, %v9909_v48  ;;  %v5591_v23 = vmul.f32 %v5577_v58, %v9911_v49  ;;  %v5592_v1 = vmul.f32 %v5581_v54, %v5485_v46  ;;  %v5593_v53 = vmul.f32 %v5585_v56, %v5486_v24  ;;  %v9128_v24 = vld [vmem:[#allocation10 + $0xc0] ss:$8 sps:$4 sm:$0xff]  }
 0x48c   :  { %v5627_v40 = vmul.f32 %v5585_v56, %v9929_v63  ;;  %v5625_v55 = vmul.f32 %v5577_v58, %v9901_v20  ;;  %v5624_v44 = vmul.f32 %v5573_v36, %v9895_v31  ;;  %v5626_v30 = vmul.f32 %v5581_v54, %v9923_v16  ;;  %v5453_v63 = vld [vmem:[#allocation8 + $0x5] ss:$8 sm:$0xf]  ;;  %7410 = vmatpush1.bf16.msra.mxu0 %v9128_v24 }
 0x48d   :  { %v5598_v17 = vcombine.low %v5590_v60, %v5591_v23  ;;  %v5599_v19 = vcombine.low %v5592_v1, %v5593_v53  ;;  %v9133_v16 = vld [vmem:[#allocation10 + $0xd4] ss:$8 sps:$4 sm:$0xff]  }
 0x48e   :  { %7411 = vmatprep.subr.bf16.mxu0 %v9133_v16 }
 0x48f   :  { %v5606_v48 = vrot.slane %v5598_v17, %v9651_v57  ;;  %v5613_v49 = vrot.slane %v5599_v19, %v9651_v57 }
 0x490   :  { %7412 = vmatpush1.bf16.msra.mxu0 %v9131_v35 }
 0x491   :  { %v5614_v46 = vcombine.low %v5606_v48, %v5613_v49  ;;  %7413 = vmatprep.subr.bf16.mxu0 %v9136_v38 }
 0x493   :  { %v5621_v20 = vrot.slane %v5614_v46, %v9651_v57 }
 0x494   :  { %7414 = vmatpush1.bf16.msra.mxu0 %v9134_v51 }
 0x495   :  { %v5623_v31 = vsub.f32 %v5453_v63, %v5621_v20  ;;  %7415 = vmatprep.subr.bf16.mxu0 %v9139_v59 }
 0x497   :  { %v5644_v41 = vrot.slane %v5623_v31, %v9831_v6  ;;  %v5636_v22 = vrot.slane %v5623_v31, %v9838_v11  ;;  %v5632_v12 = vrot.slane %v5623_v31, %v9835_v10  ;;  %v5640_v50 = vrot.slane %v5623_v31, %v9828_v2 }
 0x498   :  { %7416 = vmatpush1.bf16.msra.mxu0 %v9137_v3 }
 0x499   :  { %v9960_v43 = vadd.f32 %v5644_v41, %v5627_v40  ;;  %v9962_v61 = vadd.f32 %v5636_v22, %v5625_v55  ;;  %v9964_v18 = vadd.f32 %v5632_v12, %v5624_v44  ;;  %v9966_v52 = vadd.f32 %v5640_v50, %v5626_v30  ;;  %7426 = vmatprep.subr.bf16.mxu0 %v9142_v32 }
 0x49b   :  { %v9968_v62 = vpop.f32.mrb[8].mxu0 }
 0x49c   :  { %v6791_v4 = vsel %vm5454_vm0, %v9968_v62, 0.0  ;;  %v6823_v0 = vmul.f32 %v9968_v62, %v9968_v62  ;;  %v9974_v5 = vpop.f32.mrb[9].mxu0 }
 0x49d   :  { %v6792_v7 = vrot.slane %v6791_v4, 4  ;;  %v6798_v8 = vsel %vm5454_vm0, %v9974_v5, 0.0  ;;  %v6824_v9 = vmul.f32 %v9974_v5, %v9974_v5  ;;  %v6706_v13 = vpop.f32.mrb[10].mxu0 }
 0x49e   :  { %v6827_v14 = vsel %vm5454_vm0, %v6823_v0, 0.0  ;;  %v6799_v15 = vrot.slane %v6798_v8, 4  ;;  %v6707_v21 = vpop.f32.mrb[11].mxu0 }
 0x49f   :  { %v6793_v26 = vadd.f32 %v6792_v7, %v6791_v4  ;;  %v6828_v27 = vrot.slane %v6827_v14, 4  ;;  %v6834_v28 = vsel %vm5454_vm0, %v6824_v9, 0.0 }
 0x4a0   :  { %v6800_v29 = vadd.f32 %v6799_v15, %v6798_v8  ;;  %v6835_v25 = vrot.slane %v6834_v28, 4 }
 0x4a1   :  { %v6794_v39 = vrot.slane %v6793_v26, 2  ;;  %v6829_v34 = vadd.f32 %v6828_v27, %v6827_v14 }
 0x4a2   :  { %v6801_v36 = vrot.slane %v6800_v29, 2  ;;  %v6836_v58 = vadd.f32 %v6835_v25, %v6834_v28 }
 0x4a3   :  { %v6795_v54 = vadd.f32 %v6794_v39, %v6793_v26  ;;  %v6830_v56 = vrot.slane %v6829_v34, 2 }
 0x4a4   :  { %v6802_v33 = vadd.f32 %v6801_v36, %v6800_v29  ;;  %v6837_v37 = vrot.slane %v6836_v58, 2 }
 0x4a5   :  { %v6796_v60 = vrot.slane %v6795_v54, 1  ;;  %v6831_v23 = vadd.f32 %v6830_v56, %v6829_v34 }
 0x4a6   :  { %v6803_v1 = vrot.slane %v6802_v33, 1  ;;  %v6838_v53 = vadd.f32 %v6837_v37, %v6836_v58 }
 0x4a7   :  { %v6797_v40 = vadd.f32 %v6796_v60, %v6795_v54  ;;  %v6832_v55 = vrot.slane %v6831_v23, 1 }
 0x4a8   :  { %v6804_v44 = vadd.f32 %v6803_v1, %v6802_v33  ;;  %v6839_v30 = vrot.slane %v6838_v53, 1 }
 0x4a9   :  { %v9982_v17 = vmul.f32 0.5, %v6797_v40  ;;  %v6833_v19 = vadd.f32 %v6832_v55, %v6831_v23 }
 0x4aa   :  { %v9984_v42 = vmul.f32 0.5, %v6804_v44  ;;  %v6840_v45 = vadd.f32 %v6839_v30, %v6838_v53 }
 0x4ab   :  { %v6855_v48 = vmul.f32 0.5, %v6833_v19  ;;  %v6859_v49 = vmul.f32 %v9982_v17, %v9982_v17 }
 0x4ac   :  { %v6856_v46 = vmul.f32 0.5, %v6840_v45  ;;  %v6860_v47 = vmul.f32 %v9984_v42, %v9984_v42 }
 0x4ad   :  { %v6863_v63 = vsub.f32 %v6855_v48, %v6859_v49 }
 0x4ae   :  { %v6864_v24 = vsub.f32 %v6856_v46, %v6860_v47 }
 0x4af   :  { %v6867_v20 = vadd.f32 1e-05, %v6863_v63 }
 0x4b0   :  { %v6868_v31 = vadd.f32 1e-05, %v6864_v24 }
 0x4b1   :  { %9220 = vrsqrt.f32 %v6867_v20 }
 0x4b2   :  { %9222 = vrsqrt.f32 %v6868_v31 }
 0x4bb   :  { %v9221_v16 = vpop.eup %9220 }
 0x4bc   :  { %v9223_v35 = vpop.eup %9222 }
 0x4bd   :  { %v6879_v41 = vcombine.low %v9221_v16, %v9223_v35 }
 0x4bf   :  { %v6887_v31 = vrot.slane %v6879_v41, %v9651_v57 }
 0x4dd   :  { %v9990_v22 = vpop.f32.mrb[12].mxu1 }
 0x4de   :  { %v6805_v12 = vsel %vm5454_vm0, %v9990_v22, 0.0  ;;  %v6825_v50 = vmul.f32 %v9990_v22, %v9990_v22  ;;  %v6786_v51 = vpop.f32.mrb[13].mxu1 }
 0x4df   :  { %v6806_v38 = vrot.slane %v6805_v12, 4  ;;  %v6812_v59 = vsel %vm5454_vm0, %v6786_v51, 0.0  ;;  %v6826_v3 = vmul.f32 %v6786_v51, %v6786_v51  ;;  %v6788_v4 = vpop.f32.mrb[14].mxu1 }
 0x4e0   :  { %v6841_v0 = vsel %vm5454_vm0, %v6825_v50, 0.0  ;;  %v6813_v7 = vrot.slane %v6812_v59, 4  ;;  %v6789_v8 = vpop.f32.mrb[15].mxu1 }
 0x4e1   :  { %v6807_v9 = vadd.f32 %v6806_v38, %v6805_v12  ;;  %v6842_v13 = vrot.slane %v6841_v0, 4  ;;  %v6848_v14 = vsel %vm5454_vm0, %v6826_v3, 0.0  ;;  %v5447_v12 = vld [vmem:[#allocation8 + $0x2] ss:$8 sm:$0xf] }
 0x4e2   :  { %v6814_v15 = vadd.f32 %v6813_v7, %v6812_v59  ;;  %v6849_v21 = vrot.slane %v6848_v14, 4 }
 0x4e3   :  { %v6808_v26 = vrot.slane %v6807_v9, 2  ;;  %v6843_v27 = vadd.f32 %v6842_v13, %v6841_v0 }
 0x4e4   :  { %v6815_v28 = vrot.slane %v6814_v15, 2  ;;  %v6850_v29 = vadd.f32 %v6849_v21, %v6848_v14 }
 0x4e5   :  { %v6809_v25 = vadd.f32 %v6808_v26, %v6807_v9  ;;  %v6844_v32 = vrot.slane %v6843_v27, 2 }
 0x4e6   :  { %v6816_v39 = vadd.f32 %v6815_v28, %v6814_v15  ;;  %v6851_v34 = vrot.slane %v6850_v29, 2 }
 0x4e7   :  { %v6810_v36 = vrot.slane %v6809_v25, 1  ;;  %v6845_v58 = vadd.f32 %v6844_v32, %v6843_v27  ;;  %v5449_v32 = vld [vmem:[#allocation8 + $0x3] ss:$8 sm:$0xf] }
 0x4e8   :  { %v6817_v54 = vrot.slane %v6816_v39, 1  ;;  %v6852_v56 = vadd.f32 %v6851_v34, %v6850_v29 }
 0x4e9   :  { %v6811_v33 = vadd.f32 %v6810_v36, %v6809_v25  ;;  %v6846_v37 = vrot.slane %v6845_v58, 1 }
 0x4ea   :  { %v6818_v60 = vadd.f32 %v6817_v54, %v6816_v39  ;;  %v6853_v23 = vrot.slane %v6852_v56, 1 }
 0x4eb   :  { %v6821_v1 = vmul.f32 0.5, %v6811_v33  ;;  %v6847_v53 = vadd.f32 %v6846_v37, %v6845_v58 }
 0x4ec   :  { %v6822_v40 = vmul.f32 0.5, %v6818_v60  ;;  %v6854_v55 = vadd.f32 %v6853_v23, %v6852_v56  ;;  %v9140_v23 = vld [vmem:[#allocation10 + $0x100] ss:$8 sps:$4 sm:$0xff]  }
 0x4ed   :  { %v6857_v44 = vmul.f32 0.5, %v6847_v53  ;;  %v6861_v30 = vmul.f32 %v6821_v1, %v6821_v1 }
 0x4ee   :  { %v6858_v19 = vmul.f32 0.5, %v6854_v55  ;;  %v6862_v45 = vmul.f32 %v6822_v40, %v6822_v40  ;;  %v9154_v55 = vld [vmem:[#allocation10 + $0x144] ss:$8 sps:$4 sm:$0xff]  }
 0x4ef   :  { %v6865_v48 = vsub.f32 %v6857_v44, %v6861_v30  ;;  %v9152_v44 = vld [vmem:[#allocation10 + $0x140] ss:$8 sps:$4 sm:$0xff]   ;;  %v9157_v30 = vld [vmem:[#allocation10 + $0x154] ss:$8 sps:$4 sm:$0xff]  }
 0x4f0   :  { %v6866_v49 = vsub.f32 %v6858_v19, %v6862_v45  ;;  %v9155_v19 = vld [vmem:[#allocation10 + $0x150] ss:$8 sps:$4 sm:$0xff]   ;;  %v9160_v45 = vld [vmem:[#allocation10 + $0x164] ss:$8 sps:$4 sm:$0xff]  }
 0x4f1   :  { %v6869_v46 = vadd.f32 1e-05, %v6865_v48  ;;  %v9158_v48 = vld [vmem:[#allocation10 + $0x160] ss:$8 sps:$4 sm:$0xff]  }
 0x4f2   :  { %v6870_v47 = vadd.f32 1e-05, %v6866_v49  ;;  %v9163_v49 = vld [vmem:[#allocation10 + $0x174] ss:$8 sps:$4 sm:$0xff]  }
 0x4f3   :  { %9224 = vrsqrt.f32 %v6869_v46  ;;  %v9161_v46 = vld [vmem:[#allocation10 + $0x170] ss:$8 sps:$4 sm:$0xff]  }
 0x4f4   :  { %9226 = vrsqrt.f32 %v6870_v47  ;;  %v9166_v47 = vld [vmem:[#allocation10 + $0x184] ss:$8 sps:$4 sm:$0xff]  }
 0x4fd   :  { %v9225_v63 = vpop.eup %9224 }
 0x4fe   :  { %v9227_v24 = vpop.eup %9226 }
 0x4ff   :  { %v6880_v20 = vcombine.low %v9225_v63, %v9227_v24  ;;  %v9164_v63 = vld [vmem:[#allocation10 + $0x180] ss:$8 sps:$4 sm:$0xff]   ;;  %v9169_v24 = vld [vmem:[#allocation10 + $0x194] ss:$8 sps:$4 sm:$0xff]  }
 0x501   :  { %v6894_v16 = vrot.slane %v6880_v20, %v9651_v57  ;;  %v9167_v20 = vld [vmem:[#allocation10 + $0x190] ss:$8 sps:$4 sm:$0xff]  }
 0x503   :  { %v6895_v35 = vcombine.low %v6887_v31, %v6894_v16  ;;  %v9172_v31 = vld [vmem:[#allocation10 + $0x1a4] ss:$8 sps:$4 sm:$0xff]   ;;  %v9170_v16 = vld [vmem:[#allocation10 + $0x1a0] ss:$8 sps:$4 sm:$0xff]  }
 0x505   :  { %v6902_v50 = vrot.slane %v6895_v35, %v9651_v57  ;;  %v9175_v35 = vld [vmem:[#allocation10 + $0x1b4] ss:$8 sps:$4 sm:$0xff]  }
 0x507   :  { %v6904_v38 = vmul.f32 %v6902_v50, %v5447_v12  ;;  %v9173_v12 = vld [vmem:[#allocation10 + $0x1b0] ss:$8 sps:$4 sm:$0xff]   ;;  %v9178_v50 = vld [vmem:[#allocation10 + $0x1c4] ss:$8 sps:$4 sm:$0xff]  }
 0x509   :  { %v6909_v59 = vrot.slane %v6904_v38, %v9835_v10  ;;  %v6913_v3 = vrot.slane %v6904_v38, %v9838_v11  ;;  %v6917_v4 = vrot.slane %v6904_v38, %v9828_v2  ;;  %v6921_v0 = vrot.slane %v6904_v38, %v9831_v6  ;;  %v9176_v38 = vld [vmem:[#allocation10 + $0x1c0] ss:$8 sps:$4 sm:$0xff]  }
 0x50b   :  { %v6926_v7 = vmul.f32 %v6909_v59, %v9982_v17  ;;  %v6927_v8 = vmul.f32 %v6913_v3, %v9984_v42  ;;  %v6928_v41 = vmul.f32 %v6917_v4, %v6821_v1  ;;  %v6929_v9 = vmul.f32 %v6921_v0, %v6822_v40  ;;  %v9149_v40 = vld [vmem:[#allocation10 + $0x130] ss:$8 sps:$4 sm:$0xff]  }
 0x50c   :  { %v6963_v13 = vmul.f32 %v6921_v0, %v6786_v51  ;;  %v6961_v14 = vmul.f32 %v6913_v3, %v9974_v5  ;;  %v6960_v15 = vmul.f32 %v6909_v59, %v9968_v62  ;;  %v6962_v21 = vmul.f32 %v6917_v4, %v9990_v22  ;;  %v9181_v59 = vld [vmem:[#allocation10 + $0x1d4] ss:$8 sps:$4 sm:$0xff]   ;;  %v9179_v3 = vld [vmem:[#allocation10 + $0x1d0] ss:$8 sps:$4 sm:$0xff]   ;;  %v9184_v4 = vld [vmem:[#allocation10 + $0x1e4] ss:$8 sps:$4 sm:$0xff]  }
 0x50d   :  { %v6934_v26 = vcombine.low %v6926_v7, %v6927_v8  ;;  %v6935_v27 = vcombine.low %v6928_v41, %v6929_v9  ;;  %v9182_v0 = vld [vmem:[#allocation10 + $0x1e0] ss:$8 sps:$4 sm:$0xff]   ;;  %v9187_v7 = vld [vmem:[#allocation10 + $0x1f4] ss:$8 sps:$4 sm:$0xff]   ;;  %v9185_v8 = vld [vmem:[#allocation10 + $0x1f0] ss:$8 sps:$4 sm:$0xff]  }
 0x50f   :  { %v6942_v28 = vrot.slane %v6934_v26, %v9651_v57  ;;  %v6949_v29 = vrot.slane %v6935_v27, %v9651_v57  ;;  %v9191_v26 = vld [vmem:[#allocation11 + $0x18] sm:$0xff]   ;;  %v9192_v27 = vld [vmem:[#allocation11 + $0x20] sm:$0xff]  }
 0x511   :  { %v6950_v25 = vcombine.low %v6942_v28, %v6949_v29  ;;  %v9193_v28 = vld [vmem:[#allocation11 + $0x28] sm:$0xff]   ;;  %v9194_v29 = vld [vmem:[#allocation11 + $0x30] sm:$0xff]  }
 0x513   :  { %v6957_v17 = vrot.slane %v6950_v25, %v9651_v57  ;;  %v9195_v25 = vld [vmem:[#allocation11 + $0x38] sm:$0xff]  }
 0x515   :  { %v6959_v42 = vsub.f32 %v5449_v32, %v6957_v17 }
 0x517   :  { %v6980_v39 = vrot.slane %v6959_v42, %v9831_v6  ;;  %v6972_v51 = vrot.slane %v6959_v42, %v9838_v11  ;;  %v6968_v5 = vrot.slane %v6959_v42, %v9835_v10  ;;  %v6976_v62 = vrot.slane %v6959_v42, %v9828_v2  ;;  %v9145_v2 = vld [vmem:[#allocation10 + $0x114] ss:$8 sps:$4 sm:$0xff]  }
 0x519   :  { %v6988_v22 = vadd.f32 %v6980_v39, %v6963_v13  ;;  %v6986_v34 = vadd.f32 %v6972_v51, %v6961_v14  ;;  %v6985_v36 = vadd.f32 %v6968_v5, %v6960_v15  ;;  %v6987_v58 = vadd.f32 %v6976_v62, %v6962_v21  ;;  %v9188_v13 = vld [vmem:[#allocation11] sm:$0xff]   ;;  %v9189_v15 = vld [vmem:[#allocation11 + $0x8] sm:$0xff]   ;;  %v9190_v21 = vld [vmem:[#allocation11 + $0x10] sm:$0xff]  }
 0x51a   :  { %v9486_v14 = vmov 0.0  }
 0x51b   :  { %v6990_v54 = vadd.f32 %v6986_v34, %v9962_v61  ;;  %v6989_v56 = vadd.f32 %v6985_v36, %v9964_v18  ;;  %v6992_v33 = vadd.f32 %v6988_v22, %v9960_v43  ;;  %v10022_v57 = vadd.f32 %v6987_v58, %v9966_v52  ;;  %v9143_v61 = vld [vmem:[#allocation10 + $0x110] ss:$8 sps:$4 sm:$0xff]   ;;  %v9148_v18 = vld [vmem:[#allocation10 + $0x124] ss:$8 sps:$4 sm:$0xff]   ;;  %v9146_v43 = vld [vmem:[#allocation10 + $0x120] ss:$8 sps:$4 sm:$0xff]   ;;  %8747 = vmatprep.subr.bf16.mxu1 %v9486_v14 }
 0x51c   :  { %v9151_v52 = vld [vmem:[#allocation10 + $0x134] ss:$8 sps:$4 sm:$0xff]   ;;  %8748 = vmatpush3.bf16.msra.mxu1 %v9188_v13  ;;  %8763 = vmatprep.mubr.msk.bf16.mxu1 %vm9487_vm1, %v9486_v14 }
 0x51d   :  { %v6994_v6 = vmax.f32 %v6990_v54, 0.0  ;;  %v6993_v37 = vmax.f32 %v6989_v56, 0.0  ;;  %v6996_v11 = vmax.f32 %v6992_v33, 0.0  ;;  %v6995_v41 = vmax.f32 %v10022_v57, 0.0  ;;  %8749 = vmatprep.subr.bf16.mxu1 %v9486_v14 }
 0x51f   :  { %v6998_v60 = vpack.c.bf16 %v6994_v6, %v6994_v6  ;;  %v6997_v1 = vpack.c.bf16 %v6993_v37, %v6993_v37  ;;  %v7000_v53 = vpack.c.bf16 %v6996_v11, %v6996_v11  ;;  %v6999_v9 = vpack.c.bf16 %v6995_v41, %v6995_v41 }
 0x520   :  { %8750 = vmatpush3.bf16.msra.mxu1 %v9189_v15 }
 0x521   :  { %7417 = vmatprep.mubr.bf16.mxu0 %v6998_v60  ;;  %8751 = vmatprep.subr.bf16.mxu1 %v9486_v14 }
 0x522   :  { %7418 = vmatmul.mubr.bf16.vlgmr.msra.gmra.mrb[12].mxu0 %v6997_v1 }
 0x523   :  { %7427 = vmatpush1.bf16.msra.mxu0 %v9140_v23  ;;  %7458 = vmatprep.mubr.bf16.mxu0 %v7000_v53 }
 0x524   :  { %7428 = vmatprep.subr.bf16.mxu0 %v9145_v2  ;;  %8752 = vmatpush3.bf16.msra.mxu1 %v9190_v21 }
 0x525   :  { %8753 = vmatprep.subr.bf16.mxu1 %v9486_v14 }
 0x527   :  { %7429 = vmatpush1.bf16.msra.mxu0 %v9143_v61 }
 0x528   :  { %7430 = vmatprep.subr.bf16.mxu0 %v9148_v18  ;;  %8754 = vmatpush3.bf16.msra.mxu1 %v9191_v26  ;;  %v7467_v18 = vld [vmem:[#allocation13] sm:$0x1] }
 0x529   :  { %8755 = vmatprep.subr.bf16.mxu1 %v9486_v14 }
 0x52b   :  { %7431 = vmatpush1.bf16.msra.mxu0 %v9146_v43 }
 0x52c   :  { %7432 = vmatprep.subr.bf16.mxu0 %v9151_v52  ;;  %8756 = vmatpush3.bf16.msra.mxu1 %v9192_v27 }
 0x52d   :  { %8757 = vmatprep.subr.bf16.mxu1 %v9486_v14 }
 0x52f   :  { %7433 = vmatpush1.bf16.msra.mxu0 %v9149_v40  ;;  %v7468_v40 = vld [vmem:[#allocation13 + $0x1] sm:$0x1] }
 0x530   :  { %7434 = vmatprep.subr.bf16.mxu0 %v9154_v55  ;;  %8758 = vmatpush3.bf16.msra.mxu1 %v9193_v28 }
 0x531   :  { %8759 = vmatprep.subr.bf16.mxu1 %v9486_v14 }
 0x533   :  { %7435 = vmatpush1.bf16.msra.mxu0 %v9152_v44 }
 0x534   :  { %7436 = vmatprep.subr.bf16.mxu0 %v9157_v30  ;;  %8760 = vmatpush3.bf16.msra.mxu1 %v9194_v29 }
 0x535   :  { %8761 = vmatprep.subr.bf16.mxu1 %v9486_v14 }
 0x537   :  { %7437 = vmatpush1.bf16.msra.mxu0 %v9155_v19 }
 0x538   :  { %7438 = vmatprep.subr.bf16.mxu0 %v9160_v45  ;;  %8762 = vmatpush3.bf16.msra.mxu1 %v9195_v25 }
 0x539   :  { %8767 = vmatprep.subr.bf16.mxu1 %v9486_v14 }
 0x53b   :  { %7439 = vmatpush1.bf16.msra.mxu0 %v9158_v48 }
 0x53c   :  { %7440 = vmatprep.subr.bf16.mxu0 %v9163_v49 }
 0x53f   :  { %7441 = vmatpush1.bf16.msra.mxu0 %v9161_v46 }
 0x540   :  { %7442 = vmatprep.subr.bf16.mxu0 %v9166_v47  ;;  %v9196_v47 = vld [vmem:[#allocation14] sm:$0xff]  }
 0x543   :  { %7443 = vmatpush1.bf16.msra.mxu0 %v9164_v63  ;;  %v9197_v63 = vld [vmem:[#allocation14 + $0x8] sm:$0xff]  }
 0x544   :  { %7444 = vmatprep.subr.bf16.mxu0 %v9169_v24  ;;  %v9198_v24 = vld [vmem:[#allocation14 + $0x10] sm:$0xff]  }
 0x547   :  { %7445 = vmatpush1.bf16.msra.mxu0 %v9167_v20  ;;  %v9199_v20 = vld [vmem:[#allocation14 + $0x18] sm:$0xff]  }
 0x548   :  { %7446 = vmatprep.subr.bf16.mxu0 %v9172_v31  ;;  %v9200_v31 = vld [vmem:[#allocation14 + $0x20] sm:$0xff]  }
 0x54b   :  { %7447 = vmatpush1.bf16.msra.mxu0 %v9170_v16  ;;  %v9201_v16 = vld [vmem:[#allocation14 + $0x28] sm:$0xff]  }
 0x54c   :  { %7448 = vmatprep.subr.bf16.mxu0 %v9175_v35  ;;  %v9202_v35 = vld [vmem:[#allocation14 + $0x30] sm:$0xff]  }
 0x54f   :  { %7449 = vmatpush1.bf16.msra.mxu0 %v9173_v12  ;;  %v9203_v12 = vld [vmem:[#allocation14 + $0x38] sm:$0xff]  }
 0x550   :  { %7450 = vmatprep.subr.bf16.mxu0 %v9178_v50 }
 0x553   :  { %7451 = vmatpush1.bf16.msra.mxu0 %v9176_v38 }
 0x554   :  { %7452 = vmatprep.subr.bf16.mxu0 %v9181_v59 }
 0x557   :  { %7453 = vmatpush1.bf16.msra.mxu0 %v9179_v3 }
 0x558   :  { %7454 = vmatprep.subr.bf16.mxu0 %v9184_v4 }
 0x55b   :  { %7455 = vmatpush1.bf16.msra.mxu0 %v9182_v0 }
 0x55c   :  { %7456 = vmatprep.subr.bf16.mxu0 %v9187_v7 }
 0x55f   :  { %7457 = vmatpush1.bf16.msra.mxu0 %v9185_v8 }
 0x562   :  { %7459 = vmatmul.mubr.bf16.vlgmr.msra.gmra.mrb[12].mxu0 %v6999_v9 }
 0x635   :  { %v7460_v32 = vpop.f32.mrb[12].mxu0 }
 0x636   :  { %v7507_v17 = vsel %vm5454_vm0, %v7460_v32, 0.0  ;;  %v7515_v42 = vmul.f32 %v7460_v32, %v7460_v32  ;;  %v10037_v39 = vpop.f32.mrb[13].mxu0 }
 0x637   :  { %v7508_v51 = vrot.slane %v7507_v17, 4  ;;  %v7464_v5 = vpop.f32.mrb[14].mxu0  ;;  %v7473_v50 = vsel %vm5454_vm0, %v10037_v39, 0.0  ;;  %v7481_v38 = vmul.f32 %v10037_v39, %v10037_v39 }
 0x638   :  { %v7516_v62 = vsel %vm5454_vm0, %v7515_v42, 0.0  ;;  %v7465_v22 = vpop.f32.mrb[15].mxu0  ;;  %v7474_v59 = vrot.slane %v7473_v50, 4 }
 0x639   :  { %v7509_v34 = vadd.f32 %v7508_v51, %v7507_v17  ;;  %v7517_v36 = vrot.slane %v7516_v62, 4  ;;  %v7482_v3 = vsel %vm5454_vm0, %v7481_v38, 0.0 }
 0x63a   :  { %v7475_v4 = vadd.f32 %v7474_v59, %v7473_v50  ;;  %v7483_v0 = vrot.slane %v7482_v3, 4 }
 0x63b   :  { %v7510_v58 = vrot.slane %v7509_v34, 2  ;;  %v7518_v54 = vadd.f32 %v7517_v36, %v7516_v62 }
 0x63c   :  { %v7476_v7 = vrot.slane %v7475_v4, 2  ;;  %v7484_v8 = vadd.f32 %v7483_v0, %v7482_v3  ;;  %v8720_v0 = vld [vmem:[#allocation16] ss:$0 sm:$0xff] }
 0x63d   :  { %v7511_v56 = vadd.f32 %v7510_v58, %v7509_v34  ;;  %v7519_v33 = vrot.slane %v7518_v54, 2 }
 0x63e   :  { %v7477_v41 = vadd.f32 %v7476_v7, %v7475_v4  ;;  %v7485_v9 = vrot.slane %v7484_v8, 2 }
 0x63f   :  { %v7512_v57 = vrot.slane %v7511_v56, 1  ;;  %v7520_v6 = vadd.f32 %v7519_v33, %v7518_v54 }
 0x640   :  { %v7478_v13 = vrot.slane %v7477_v41, 1  ;;  %v7486_v15 = vadd.f32 %v7485_v9, %v7484_v8 }
 0x641   :  { %v7513_v37 = vadd.f32 %v7512_v57, %v7511_v56  ;;  %v7521_v11 = vrot.slane %v7520_v6, 1 }
 0x642   :  { %v7479_v21 = vadd.f32 %v7478_v13, %v7477_v41 }
 0x643   :  { %v7514_v60 = vmul.f32 0.5, %v7513_v37  ;;  %v7522_v23 = vadd.f32 %v7521_v11, %v7520_v6 }
 0x644   :  { %v7480_v26 = vmul.f32 0.5, %v7479_v21 }
 0x645   :  { %v7523_v1 = vmul.f32 0.5, %v7522_v23  ;;  %v7524_v2 = vmul.f32 %v7514_v60, %v7514_v60 }
 0x646   :  { %v7490_v29 = vmul.f32 %v7480_v26, %v7480_v26 }
 0x647   :  { %v7525_v53 = vsub.f32 %v7523_v1, %v7524_v2 }
 0x649   :  { %v7526_v61 = vadd.f32 1e-05, %v7525_v53 }
 0x64b   :  { %9228 = vrsqrt.f32 %v7526_v61 }
 0x655   :  { %v9229_v43 = vpop.eup %9228 }
 0x656   :  { %v7528_v52 = vmul.f32 %v9229_v43, %v7467_v18 }
 0x658   :  { %v7529_v55 = vmul.f32 %v7528_v52, %v7514_v60  ;;  %v7534_v44 = vrot.slane %v7528_v52, %v9835_v10 }
 0x65a   :  { %v7530_v30 = vsub.f32 %v7468_v40, %v7529_v55  ;;  %v7535_v19 = vmul.f32 %v7534_v44, %v7460_v32  ;;  %v7471_v40 = vld [vmem:[#allocation13 + $0x4] sm:$0x1] }
 0x65c   :  { %v7539_v45 = vrot.slane %v7530_v30, %v9835_v10  ;;  %v7472_v30 = vld [vmem:[#allocation13 + $0x5] sm:$0x1] }
 0x65e   :  { %v7540_v48 = vadd.f32 %v7539_v45, %v7535_v19  ;;  %v7469_v19 = vld [vmem:[#allocation13 + $0x2] sm:$0x1] }
 0x660   :  { %v7541_v49 = vmax.f32 %v7540_v48, 0.0 }
 0x662   :  { %v7542_v46 = vpack.c.bf16 %v7541_v49, %v7541_v49 }
 0x664   :  { %8764 = vmatmul.mubr.bf16.vlgmr.msra.gmra.mrb[16].mxu1 %v7542_v46  ;;  %v7470_v46 = vld [vmem:[#allocation13 + $0x3] sm:$0x1] }
 0x665   :  { %8783 = vmatprep.mubr.msk.bf16.mxu1 %vm9487_vm1, %v9486_v14  ;;  %8768 = vmatpush3.bf16.msra.mxu1 %v9196_v47 }
 0x666   :  { %8769 = vmatprep.subr.bf16.mxu1 %v9486_v14 }
 0x669   :  { %8770 = vmatpush3.bf16.msra.mxu1 %v9197_v63 }
 0x66a   :  { %8771 = vmatprep.subr.bf16.mxu1 %v9486_v14 }
 0x66d   :  { %8772 = vmatpush3.bf16.msra.mxu1 %v9198_v24 }
 0x66e   :  { %8773 = vmatprep.subr.bf16.mxu1 %v9486_v14 }
 0x671   :  { %8774 = vmatpush3.bf16.msra.mxu1 %v9199_v20 }
 0x672   :  { %8775 = vmatprep.subr.bf16.mxu1 %v9486_v14 }
 0x675   :  { %8776 = vmatpush3.bf16.msra.mxu1 %v9200_v31 }
 0x676   :  { %8777 = vmatprep.subr.bf16.mxu1 %v9486_v14 }
 0x679   :  { %8778 = vmatpush3.bf16.msra.mxu1 %v9201_v16 }
 0x67a   :  { %8779 = vmatprep.subr.bf16.mxu1 %v9486_v14 }
 0x67d   :  { %8780 = vmatpush3.bf16.msra.mxu1 %v9202_v35 }
 0x67e   :  { %8781 = vmatprep.subr.bf16.mxu1 %v9486_v14  ;;  %v7487_v14 = vrot.slane %v7486_v15, 1 }
 0x680   :  { %v7488_v27 = vadd.f32 %v7487_v14, %v7486_v15 }
 0x681   :  { %8782 = vmatpush3.bf16.msra.mxu1 %v9203_v12 }
 0x682   :  { %v7489_v28 = vmul.f32 0.5, %v7488_v27 }
 0x684   :  { %v7491_v34 = vsub.f32 %v7489_v28, %v7490_v29 }
 0x686   :  { %v7492_v33 = vadd.f32 1e-05, %v7491_v34 }
 0x688   :  { %9230 = vrsqrt.f32 %v7492_v33 }
 0x692   :  { %v9231_v52 = vpop.eup %9230 }
 0x693   :  { %v7494_v55 = vmul.f32 %v9231_v52, %v7471_v40 }
 0x695   :  { %v7495_v44 = vmul.f32 %v7494_v55, %v7480_v26  ;;  %v7500_v47 = vrot.slane %v7494_v55, %v9835_v10 }
 0x697   :  { %v7496_v48 = vsub.f32 %v7472_v30, %v7495_v44  ;;  %v7501_v16 = vmul.f32 %v7500_v47, %v10037_v39 }
 0x699   :  { %v7505_v20 = vrot.slane %v7496_v48, %v9835_v10 }
 0x69b   :  { %v7506_v50 = vadd.f32 %v7505_v20, %v7501_v16 }
 0x737   :  { %v7641_v25 = vpop.f32.mrb[16].mxu1 }
 0x738   :  { %v7647_v32 = vsel %vm5454_vm0, %v7641_v25, 0.0  ;;  %v7655_v17 = vmul.f32 %v7641_v25, %v7641_v25  ;;  %v8765_v42 = vpop.f32.mrb[17].mxu1 }
 0x739   :  { %v7648_v51 = vrot.slane %v7647_v32, 4  ;;  %v7644_v5 = vpop.f32.mrb[18].mxu1 }
 0x73a   :  { %v7656_v62 = vsel %vm5454_vm0, %v7655_v17, 0.0  ;;  %v8766_v22 = vpop.f32.mrb[19].mxu1 }
 0x73b   :  { %v7649_v36 = vadd.f32 %v7648_v51, %v7647_v32  ;;  %v7657_v58 = vrot.slane %v7656_v62, 4 }
 0x73d   :  { %v7650_v54 = vrot.slane %v7649_v36, 2  ;;  %v7658_v56 = vadd.f32 %v7657_v58, %v7656_v62 }
 0x73f   :  { %v7651_v57 = vadd.f32 %v7650_v54, %v7649_v36  ;;  %v7659_v6 = vrot.slane %v7658_v56, 2 }
 0x741   :  { %v7652_v37 = vrot.slane %v7651_v57, 1  ;;  %v7660_v11 = vadd.f32 %v7659_v6, %v7658_v56 }
 0x743   :  { %v7653_v60 = vadd.f32 %v7652_v37, %v7651_v57  ;;  %v7661_v23 = vrot.slane %v7660_v11, 1 }
 0x745   :  { %v7654_v1 = vmul.f32 0.5, %v7653_v60  ;;  %v7662_v2 = vadd.f32 %v7661_v23, %v7660_v11 }
 0x747   :  { %v7663_v53 = vmul.f32 0.5, %v7662_v2  ;;  %v7664_v61 = vmul.f32 %v7654_v1, %v7654_v1 }
 0x749   :  { %v7665_v18 = vsub.f32 %v7663_v53, %v7664_v61 }
 0x74b   :  { %v7666_v43 = vadd.f32 1e-05, %v7665_v18 }
 0x74d   :  { %9232 = vrsqrt.f32 %v7666_v43 }
 0x757   :  { %v9233_v45 = vpop.eup %9232 }
 0x758   :  { %v7668_v49 = vmul.f32 %v9233_v45, %v7469_v19 }
 0x75a   :  { %v7669_v63 = vmul.f32 %v7668_v49, %v7654_v1  ;;  %v7674_v24 = vrot.slane %v7668_v49, %v9835_v10 }
 0x75c   :  { %v7670_v31 = vsub.f32 %v7470_v46, %v7669_v63  ;;  %v7675_v35 = vmul.f32 %v7674_v24, %v7641_v25 }
 0x75e   :  { %v7679_v12 = vrot.slane %v7670_v31, %v9835_v10 }
 0x760   :  { %v7680_v38 = vadd.f32 %v7679_v12, %v7675_v35 }
 0x762   :  { %v7681_v59 = vadd.f32 %v7680_v38, %v7506_v50 }
 0x764   :  { %v7682_v3 = vmax.f32 %v7681_v59, 0.0 }
 0x766   :  { %v7683_v4 = vpack.c.bf16 %v7682_v3, %v7682_v3 }
 0x768   :  { %8784 = vmatmul.mubr.bf16.vlgmr.msra.gmra.mrb[20].mxu1 %v7683_v4 }
 0x83b   :  { %v7789_v7 = vpop.f32.mrb[20].mxu1 }
 0x83c   :  { %v7790_v8 = vadd.f32 %v8720_v0, %v7789_v7  ;;  %v8785_v41 = vpop.f32.mrb[21].mxu1 }
 0x83d   :  { %v7792_v9 = vpop.f32.mrb[22].mxu1 }
 0x83e   :  { %7795 = vst [vmem:[#allocation17] sm:$0x3] %v7790_v8  ;;  %v8786_v13 = vpop.f32.mrb[23].mxu1 }
 0x83f   :  { %9444 = shalt.err (!%p9441_p6)
}
 0x840   :  { %s9445_s28 = scalar_lea.hbm %s10084_s9, 32 }
 0x841   :  { %p9446_p7 = scmp.ne.s32.totalorder %s10084_s9, %s9445_s28  ;;  %p9449_p8 = scmp.lt.u32.totalorder %s9445_s28, %s10084_s9 }
 0x843   :  { %p9451_p9 = pnand %p9449_p8, %p9446_p7 }
 0x845   :  { %9454 = shalt.err (!%p9451_p9)
}
 0x846   :  { %7805 = dma.vmem_to_hbm [thread:$0]  %s7803_s2, 32, %s10084_s9, [#allocation4]  }
 0x847   :  { %9465 = dma.done.wait [#allocation4], 32  }
 0x848   :  { %9466 = vsyncadd [#allocation4], 4294967264 }
 0x849   :  { %7809 = vsyncpa [#allocation3], 1 }
 0x84a   :  { %7810 = vsyncpa [#allocation6], 1 }
 0x84b   :  { %7811 = vsyncpa [#allocation9], 1 }
 0x84c   :  { %7812 = vsyncpa [#allocation12], 1 }
 0x84d   :  { %7813 = vsyncpa [#allocation15], 1 }
 0x84e   :  { %7814 = vsyncpa [#allocation4], 1 }

</bundles_post_ra>
